<compile_context>
chip_gen: v5e
topology: v5e:2x2
jax: 0.10.0
libtpu: 0.0.40
codegen_flags: <defaults>
</compile_context>

<pallas_src>
import functools

import jax
import jax.numpy as jnp
from jax.experimental import pallas as pl
from jax.experimental.pallas import tpu as pltpu


# ----------------------------------------------------------------------------
# In-kernel helpers
# ----------------------------------------------------------------------------
def _lstm_layer(xp_ref, w_hh, hf_ref, hb_ref, *, T, B, H):
    """Interleaved fwd/bwd recurrence for one bidirectional LSTM layer.

    xp_ref: (T*B, 16H) VMEM scratch holding the hoisted input-side gate
            pre-activations. Columns 0:8H belong to the forward direction,
            8H:16H to the backward direction; within each half the layout is
            gate-interleaved [i_f i_b f_f f_b g_f g_b o_f o_b] with the other
            direction's lanes zero, so the two row-slices can simply be added.
    w_hh:   (2H, 8H) block-structured fused recurrent weight
            (rows 0:H multiply h_fwd, rows H:2H multiply h_bwd).
    hf_ref/hb_ref: (T*B, H) VMEM scratch, written time-ordered.
    """
    G8 = 8 * H
    h_cat = jnp.zeros((B, 2 * H), jnp.float32)   # [h_fwd | h_bwd]
    c_cat = jnp.zeros((B, 2 * H), jnp.float32)   # [c_fwd | c_bwd]
    for s in range(T):
        rf = s * B             # row offset of fwd time step s
        rb = (T - 1 - s) * B   # row offset of bwd time step T-1-s
        # Input-side contributions (independent of the recurrence).
        gate_in = xp_ref[rf:rf + B, 0:G8] + xp_ref[rb:rb + B, G8:2 * G8]
        # Single fused recurrent matmul for both directions.
        gates = gate_in + jnp.dot(h_cat, w_hh,
                                  preferred_element_type=jnp.float32)
        # Two EUP passes over the packed 8H lanes (instead of 8 tiny ones).
        sig = jax.nn.sigmoid(gates)
        tnh = jnp.tanh(gates)
        i_cat = sig[:, 0:2 * H]
        f_cat = sig[:, 2 * H:4 * H]
        g_cat = tnh[:, 4 * H:6 * H]
        o_cat = sig[:, 6 * H:8 * H]
        c_cat = f_cat * c_cat + i_cat * g_cat
        h_cat = o_cat * jnp.tanh(c_cat)
        # Stage hidden states time-ordered (aligned, full-sublane stores).
        hf_ref[rf:rf + B, :] = h_cat[:, 0:H]
        hb_ref[rb:rb + B, :] = h_cat[:, H:2 * H]


def _fused_bilstm_kernel(x_ref, w_in0_ref, b0_ref, w_hh_ref, w_in1_ref,
                         b1_ref, w_emb_ref, b_emb_ref, out_ref,
                         xp_ref, h0f_ref, h0b_ref, h1f_ref, h1b_ref,
                         *, T, B, H):
    """Entire BidirectionalLSTM forward in one kernel invocation."""
    # ---- Layer 0: hoisted input projection for all T steps, both dirs ----
    xp_ref[...] = (jnp.dot(x_ref[...], w_in0_ref[...],
                           preferred_element_type=jnp.float32) + b0_ref[...])
    _lstm_layer(xp_ref, w_hh_ref[0], h0f_ref, h0b_ref, T=T, B=B, H=H)

    # ---- Layer 1: batched input projection from staged layer-0 outputs ----
    w_in1 = w_in1_ref[...]
    xp_ref[...] = (
        jnp.dot(h0f_ref[...], w_in1[0:H], preferred_element_type=jnp.float32)
        + jnp.dot(h0b_ref[...], w_in1[H:2 * H],
                  preferred_element_type=jnp.float32)
        + b1_ref[...])
    _lstm_layer(xp_ref, w_hh_ref[1], h1f_ref, h1b_ref, T=T, B=B, H=H)

    # ---- Final Linear(2H -> nOut): batched over T*B rows, one store ----
    w_emb = w_emb_ref[...]
    out = (jnp.dot(h1f_ref[...], w_emb[0:H],
                   preferred_element_type=jnp.float32)
           + jnp.dot(h1b_ref[...], w_emb[H:2 * H],
                     preferred_element_type=jnp.float32)
           + b_emb_ref[...])
    out_ref[...] = out.astype(out_ref.dtype)


# ----------------------------------------------------------------------------
# Wrapper
# ----------------------------------------------------------------------------
@jax.jit
def bidirectional_lstm_forward(x, packed):
    """Equivalent of BidirectionalLSTM.forward (eval mode). x: (T, B, nIn)."""
    T, B, n_in = x.shape
    H = packed["w_hh"].shape[1] // 2
    n_out = packed["w_emb"].shape[1]

    # Pad batch up to a full sublane tile; padded rows are independent and
    # sliced away below (zero real cost: those sublanes were idle anyway).
    B_pad = ((B + 7) // 8) * 8
    x_pad = jnp.pad(x.astype(jnp.float32), ((0, 0), (0, B_pad - B), (0, 0)))
    x2d = x_pad.reshape(T * B_pad, n_in)

    args = (x2d, packed["w_in0"], packed["b0"], packed["w_hh"],
            packed["w_in1"], packed["b1"], packed["w_emb"], packed["b_emb"])
    in_specs = [
        pl.BlockSpec(a.shape, lambda i, _n=a.ndim: (0,) * _n) for a in args
    ]

    kernel = functools.partial(_fused_bilstm_kernel, T=T, B=B_pad, H=H)
    out2d = pl.pallas_call(
        kernel,
        out_shape=jax.ShapeDtypeStruct((T * B_pad, n_out), jnp.float32),
        grid=(1,),
        in_specs=in_specs,
        out_specs=pl.BlockSpec((T * B_pad, n_out), lambda i: (0, 0)),
        scratch_shapes=[
            pltpu.VMEM((T * B_pad, 16 * H), jnp.float32),  # staged input proj
            pltpu.VMEM((T * B_pad, H), jnp.float32),       # layer-0 fwd hidden
            pltpu.VMEM((T * B_pad, H), jnp.float32),       # layer-0 bwd hidden
            pltpu.VMEM((T * B_pad, H), jnp.float32),       # layer-1 fwd hidden
            pltpu.VMEM((T * B_pad, H), jnp.float32),       # layer-1 bwd hidden
        ],
        compiler_params=pltpu.CompilerParams(
            dimension_semantics=("arbitrary",)),
    )(*args)
    return out2d.reshape(T, B_pad, n_out)[:, :B, :]


# ----------------------------------------------------------------------------
# Parameters: PyTorch-convention raw params + packing into the fused layout
# ----------------------------------------------------------------------------
def make_raw_params(key, n_in, n_hidden, n_out):
    """PyTorch-style init: U(-1/sqrt(H), 1/sqrt(H)); Linear uses fan_in=2H."""
    H = n_hidden
    bound = 1.0 / (H ** 0.5)

    def uni(k, shape, b):
        return jax.random.uniform(k, shape, jnp.float32, -b, b)

    keys = jax.random.split(key, 18)
    ki = 0
    raw = {}
    for layer, in_sz in (("l0", n_in), ("l1", 2 * H)):
        for d in ("fwd", "bwd"):
            w_ih = uni(keys[ki], (4 * H, in_sz), bound); ki += 1
            w_hh = uni(keys[ki], (4 * H, H), bound); ki += 1
            b_ih = uni(keys[ki], (4 * H,), bound); ki += 1
            b_hh = uni(keys[ki], (4 * H,), bound); ki += 1
            raw[f"{layer}_{d}"] = (w_ih, w_hh, b_ih, b_hh)
    eb = 1.0 / ((2 * H) ** 0.5)
    raw["emb_w"] = uni(keys[ki], (n_out, 2 * H), eb); ki += 1
    raw["emb_b"] = uni(keys[ki], (n_out,), eb)
    return raw


def pack_params(raw, n_hidden):
    """Repack PyTorch-layout params into the fused/interleaved kernel layout."""
    H = n_hidden
    G8 = 8 * H

    def fuse_dir(w_ih, w_hh, b_ih, b_hh, direction):
        # Gate-interleaved column layout [i_f i_b f_f f_b g_f g_b o_f o_b];
        # this direction's columns populated, the other direction's left zero.
        K = w_ih.shape[1]
        off = 0 if direction == "fwd" else H
        w_in = jnp.zeros((K, G8), jnp.float32)
        w_rec = jnp.zeros((H, G8), jnp.float32)
        bias = jnp.zeros((G8,), jnp.float32)
        for g in range(4):                      # PyTorch gate order: i, f, g, o
            cols = slice(2 * H * g + off, 2 * H * g + off + H)
            rows = slice(g * H, (g + 1) * H)
            w_in = w_in.at[:, cols].set(w_ih[rows, :].T)
            w_rec = w_rec.at[:, cols].set(w_hh[rows, :].T)
            bias = bias.at[cols].set(b_ih[rows] + b_hh[rows])
        return w_in, w_rec, bias

    packed = {}
    w_hh_layers = []
    for layer in ("l0", "l1"):
        wf_in, wf_rec, bf = fuse_dir(*raw[f"{layer}_fwd"], "fwd")
        wb_in, wb_rec, bb = fuse_dir(*raw[f"{layer}_bwd"], "bwd")
        # (K, 16H): cols 0:8H -> fwd-direction gates, 8H:16H -> bwd-direction.
        packed[f"w_in{layer[1]}"] = jnp.concatenate([wf_in, wb_in], axis=1)
        packed[f"b{layer[1]}"] = jnp.concatenate([bf, bb]).reshape(1, 2 * G8)
        # (2H, 8H): rows 0:H multiply h_fwd, rows H:2H multiply h_bwd.
        w_hh_layers.append(jnp.concatenate([wf_rec, wb_rec], axis=0))
    packed["w_hh"] = jnp.stack(w_hh_layers)            # (2, 2H, 8H)
    packed["w_emb"] = raw["emb_w"].T                   # (2H, nOut)
    packed["b_emb"] = raw["emb_b"].reshape(1, -1)      # (1, nOut)
    return packed


# ----------------------------------------------------------------------------
# Pure-JAX reference (PyTorch semantics, eval mode)
# ----------------------------------------------------------------------------
def reference_forward(x, raw):
    T, B, _ = x.shape
    hp = jax.lax.Precision.HIGHEST

    def run_dir(seq, w_ih, w_hh, b_ih, b_hh, reverse):
        H = w_hh.shape[1]
        h = jnp.zeros((B, H), jnp.float32)
        c = jnp.zeros((B, H), jnp.float32)
        outs = [None] * T
        order = range(T - 1, -1, -1) if reverse else range(T)
        for t in order:
            g = (jnp.dot(seq[t], w_ih.T, precision=hp)
                 + jnp.dot(h, w_hh.T, precision=hp) + b_ih + b_hh)
            i = jax.nn.sigmoid(g[:, 0:H])
            f = jax.nn.sigmoid(g[:, H:2 * H])
            gg = jnp.tanh(g[:, 2 * H:3 * H])
            o = jax.nn.sigmoid(g[:, 3 * H:4 * H])
            c = f * c + i * gg
            h = o * jnp.tanh(c)
            outs[t] = h
        return jnp.stack(outs)

    seq = x
    for layer in range(2):
        f = run_dir(seq, *raw[f"l{layer}_fwd"], reverse=False)
        b = run_dir(seq, *raw[f"l{layer}_bwd"], reverse=True)
        seq = jnp.concatenate([f, b], axis=-1)
    out = (jnp.dot(seq.reshape(T * B, -1), raw["emb_w"].T, precision=hp)
           + raw["emb_b"])
    return out.reshape(T, B, -1)


if __name__ == "__main__":
    T, B = 8, 2
    N_IN, N_HIDDEN, N_OUT = 16, 32, 8

    key = jax.random.PRNGKey(0)
    k_x, k_p = jax.random.split(key)
    x = jax.random.normal(k_x, (T, B, N_IN), jnp.float32)
    raw = make_raw_params(k_p, N_IN, N_HIDDEN, N_OUT)
    packed = pack_params(raw, N_HIDDEN)

    out = bidirectional_lstm_forward(x, packed)
    out = jax.block_until_ready(out)
    assert out.shape == (T, B, N_OUT), out.shape
    assert jnp.all(jnp.isfinite(out))

    ref = reference_forward(x, raw)
    max_err = float(jnp.max(jnp.abs(out - ref)))
    assert max_err < 1e-2, f"mismatch vs reference: max abs err = {max_err}"

    print("KERNEL_OK")
</pallas_src>

<mosaic_0001>
module attributes {stable_mosaic.version = 11 : i64} {
  func.func @_fused_bilstm_kernel(%arg0: i32, %arg1: memref<64x16xf32, #tpu.memory_space<vmem>>, %arg2: memref<16x512xf32, #tpu.memory_space<vmem>>, %arg3: memref<1x512xf32, #tpu.memory_space<vmem>>, %arg4: memref<2x64x256xf32, #tpu.memory_space<vmem>>, %arg5: memref<64x512xf32, #tpu.memory_space<vmem>>, %arg6: memref<1x512xf32, #tpu.memory_space<vmem>>, %arg7: memref<64x8xf32, #tpu.memory_space<vmem>>, %arg8: memref<1x8xf32, #tpu.memory_space<vmem>>, %arg9: memref<64x8xf32, #tpu.memory_space<vmem>>, %arg10: memref<64x512xf32, #tpu.memory_space<vmem>>, %arg11: memref<64x32xf32, #tpu.memory_space<vmem>>, %arg12: memref<64x32xf32, #tpu.memory_space<vmem>>, %arg13: memref<64x32xf32, #tpu.memory_space<vmem>>, %arg14: memref<64x32xf32, #tpu.memory_space<vmem>>) attributes {dimension_semantics = [#tpu.dimension_semantics<arbitrary>], iteration_bounds = array<i64: 1>, scalar_prefetch = 0 : i64, scratch_operands = 5 : i64, tpu.core_type = #tpu.core_type<tc>, window_params = [{pipeline_mode = #tpu.pipeline_mode<synchronous>, transform_indices = @transform_0, window_bounds = array<i64: 64, 16>}, {pipeline_mode = #tpu.pipeline_mode<synchronous>, transform_indices = @transform_1, window_bounds = array<i64: 16, 512>}, {pipeline_mode = #tpu.pipeline_mode<synchronous>, transform_indices = @transform_2, window_bounds = array<i64: 1, 512>}, {pipeline_mode = #tpu.pipeline_mode<synchronous>, transform_indices = @transform_3, window_bounds = array<i64: 2, 64, 256>}, {pipeline_mode = #tpu.pipeline_mode<synchronous>, transform_indices = @transform_4, window_bounds = array<i64: 64, 512>}, {pipeline_mode = #tpu.pipeline_mode<synchronous>, transform_indices = @transform_5, window_bounds = array<i64: 1, 512>}, {pipeline_mode = #tpu.pipeline_mode<synchronous>, transform_indices = @transform_6, window_bounds = array<i64: 64, 8>}, {pipeline_mode = #tpu.pipeline_mode<synchronous>, transform_indices = @transform_7, window_bounds = array<i64: 1, 8>}, {pipeline_mode = #tpu.pipeline_mode<synchronous>, transform_indices = @transform_8, window_bounds = array<i64: 64, 8>}]} {
    %c0 = arith.constant 0 : index
    %c0_0 = arith.constant 0 : index
    %0 = vector.load %arg1[%c0, %c0_0] : memref<64x16xf32, #tpu.memory_space<vmem>>, vector<64x16xf32>
    %c0_1 = arith.constant 0 : index
    %c0_2 = arith.constant 0 : index
    %1 = vector.load %arg2[%c0_1, %c0_2] : memref<16x512xf32, #tpu.memory_space<vmem>>, vector<16x512xf32>
    %cst = arith.constant dense<0.000000e+00> : vector<64x512xf32>
    %2 = tpu.matmul %0, %1, %cst {dimension_numbers = #tpu.dot_dimension_numbers<[1], [0], [0], [1], [0, 0, 1, 1], [], []>} : vector<64x16xf32>, vector<16x512xf32>, vector<64x512xf32> -> vector<64x512xf32>
    %c0_3 = arith.constant 0 : index
    %c0_4 = arith.constant 0 : index
    %3 = vector.load %arg3[%c0_3, %c0_4] : memref<1x512xf32, #tpu.memory_space<vmem>>, vector<1x512xf32>
    %4 = vector.broadcast %3 : vector<1x512xf32> to vector<64x512xf32>
    %5 = arith.addf %2, %4 : vector<64x512xf32>
    %c0_5 = arith.constant 0 : index
    %c0_6 = arith.constant 0 : index
    %6 = vector.load %arg10[%c0_5, %c0_6] : memref<64x512xf32, #tpu.memory_space<vmem>>, vector<64x512xf32>
    tpu.vector_store %arg10[%c0_5, %c0_6], %5 {strides = array<i32>} : memref<64x512xf32, #tpu.memory_space<vmem>>, vector<64x512xf32>,
    %c0_7 = arith.constant 0 : index
    %c0_8 = arith.constant 0 : index
    %c0_9 = arith.constant 0 : index
    %7 = vector.load %arg4[%c0_7, %c0_8, %c0_9] : memref<2x64x256xf32, #tpu.memory_space<vmem>>, vector<1x64x256xf32>
    %8 = vector.shape_cast %7 : vector<1x64x256xf32> to vector<64x256xf32>
    %cst_10 = arith.constant 0.000000e+00 : f32
    %9 = vector.broadcast %cst_10 : f32 to vector<8x64xf32>
    %cst_11 = arith.constant 0.000000e+00 : f32
    %10 = vector.broadcast %cst_11 : f32 to vector<8x64xf32>
    %c0_12 = arith.constant 0 : index
    %c0_13 = arith.constant 0 : index
    %11 = vector.load %arg10[%c0_12, %c0_13] : memref<64x512xf32, #tpu.memory_space<vmem>>, vector<8x256xf32>
    %c56 = arith.constant 56 : index
    %c256 = arith.constant 256 : index
    %12 = vector.load %arg10[%c56, %c256] : memref<64x512xf32, #tpu.memory_space<vmem>>, vector<8x256xf32>
    %13 = arith.addf %11, %12 : vector<8x256xf32>
    %cst_14 = arith.constant dense<0.000000e+00> : vector<8x256xf32>
    %14 = tpu.matmul %9, %8, %cst_14 {dimension_numbers = #tpu.dot_dimension_numbers<[1], [0], [0], [1], [0, 0, 1, 1], [], []>} : vector<8x64xf32>, vector<64x256xf32>, vector<8x256xf32> -> vector<8x256xf32>
    %15 = arith.addf %13, %14 : vector<8x256xf32>
    %16 = arith.negf %15 : vector<8x256xf32>
    %17 = math.exp %16 : vector<8x256xf32>
    %cst_15 = arith.constant 1.000000e+00 : f32
    %18 = vector.broadcast %cst_15 : f32 to vector<8x256xf32>
    %19 = arith.addf %18, %17 : vector<8x256xf32>
    %20 = arith.divf %18, %19 : vector<8x256xf32>
    %21 = math.tanh %15 : vector<8x256xf32>
    %22 = vector.extract_strided_slice %20 {offsets = [0, 0], sizes = [8, 64], strides = [1, 1]} : vector<8x256xf32> to vector<8x64xf32>
    %23 = vector.extract_strided_slice %20 {offsets = [0, 64], sizes = [8, 64], strides = [1, 1]} : vector<8x256xf32> to vector<8x64xf32>
    %24 = vector.extract_strided_slice %21 {offsets = [0, 128], sizes = [8, 64], strides = [1, 1]} : vector<8x256xf32> to vector<8x64xf32>
    %25 = vector.extract_strided_slice %20 {offsets = [0, 192], sizes = [8, 64], strides = [1, 1]} : vector<8x256xf32> to vector<8x64xf32>
    %26 = arith.mulf %23, %10 : vector<8x64xf32>
    %27 = arith.mulf %22, %24 : vector<8x64xf32>
    %28 = arith.addf %26, %27 : vector<8x64xf32>
    %29 = math.tanh %28 : vector<8x64xf32>
    %30 = arith.mulf %25, %29 : vector<8x64xf32>
    %31 = vector.extract_strided_slice %30 {offsets = [0, 0], sizes = [8, 32], strides = [1, 1]} : vector<8x64xf32> to vector<8x32xf32>
    %c0_16 = arith.constant 0 : index
    %c0_17 = arith.constant 0 : index
    %32 = vector.load %arg11[%c0_16, %c0_17] : memref<64x32xf32, #tpu.memory_space<vmem>>, vector<8x32xf32>
    tpu.vector_store %arg11[%c0_16, %c0_17], %31 {strides = array<i32>} : memref<64x32xf32, #tpu.memory_space<vmem>>, vector<8x32xf32>,
    %33 = vector.extract_strided_slice %30 {offsets = [0, 32], sizes = [8, 32], strides = [1, 1]} : vector<8x64xf32> to vector<8x32xf32>
    %c56_18 = arith.constant 56 : index
    %c0_19 = arith.constant 0 : index
    %34 = vector.load %arg12[%c56_18, %c0_19] : memref<64x32xf32, #tpu.memory_space<vmem>>, vector<8x32xf32>
    tpu.vector_store %arg12[%c56_18, %c0_19], %33 {strides = array<i32>} : memref<64x32xf32, #tpu.memory_space<vmem>>, vector<8x32xf32>,
    %c8 = arith.constant 8 : index
    %c0_20 = arith.constant 0 : index
    %35 = vector.load %arg10[%c8, %c0_20] : memref<64x512xf32, #tpu.memory_space<vmem>>, vector<8x256xf32>
    %c48 = arith.constant 48 : index
    %c256_21 = arith.constant 256 : index
    %36 = vector.load %arg10[%c48, %c256_21] : memref<64x512xf32, #tpu.memory_space<vmem>>, vector<8x256xf32>
    %37 = arith.addf %35, %36 : vector<8x256xf32>
    %cst_22 = arith.constant dense<0.000000e+00> : vector<8x256xf32>
    %38 = tpu.matmul %30, %8, %cst_22 {dimension_numbers = #tpu.dot_dimension_numbers<[1], [0], [0], [1], [0, 0, 1, 1], [], []>} : vector<8x64xf32>, vector<64x256xf32>, vector<8x256xf32> -> vector<8x256xf32>
    %39 = arith.addf %37, %38 : vector<8x256xf32>
    %40 = arith.negf %39 : vector<8x256xf32>
    %41 = math.exp %40 : vector<8x256xf32>
    %cst_23 = arith.constant 1.000000e+00 : f32
    %42 = vector.broadcast %cst_23 : f32 to vector<8x256xf32>
    %43 = arith.addf %42, %41 : vector<8x256xf32>
    %44 = arith.divf %42, %43 : vector<8x256xf32>
    %45 = math.tanh %39 : vector<8x256xf32>
    %46 = vector.extract_strided_slice %44 {offsets = [0, 0], sizes = [8, 64], strides = [1, 1]} : vector<8x256xf32> to vector<8x64xf32>
    %47 = vector.extract_strided_slice %44 {offsets = [0, 64], sizes = [8, 64], strides = [1, 1]} : vector<8x256xf32> to vector<8x64xf32>
    %48 = vector.extract_strided_slice %45 {offsets = [0, 128], sizes = [8, 64], strides = [1, 1]} : vector<8x256xf32> to vector<8x64xf32>
    %49 = vector.extract_strided_slice %44 {offsets = [0, 192], sizes = [8, 64], strides = [1, 1]} : vector<8x256xf32> to vector<8x64xf32>
    %50 = arith.mulf %47, %28 : vector<8x64xf32>
    %51 = arith.mulf %46, %48 : vector<8x64xf32>
    %52 = arith.addf %50, %51 : vector<8x64xf32>
    %53 = math.tanh %52 : vector<8x64xf32>
    %54 = arith.mulf %49, %53 : vector<8x64xf32>
    %55 = vector.extract_strided_slice %54 {offsets = [0, 0], sizes = [8, 32], strides = [1, 1]} : vector<8x64xf32> to vector<8x32xf32>
    %c8_24 = arith.constant 8 : index
    %c0_25 = arith.constant 0 : index
    %56 = vector.load %arg11[%c8_24, %c0_25] : memref<64x32xf32, #tpu.memory_space<vmem>>, vector<8x32xf32>
    tpu.vector_store %arg11[%c8_24, %c0_25], %55 {strides = array<i32>} : memref<64x32xf32, #tpu.memory_space<vmem>>, vector<8x32xf32>,
    %57 = vector.extract_strided_slice %54 {offsets = [0, 32], sizes = [8, 32], strides = [1, 1]} : vector<8x64xf32> to vector<8x32xf32>
    %c48_26 = arith.constant 48 : index
    %c0_27 = arith.constant 0 : index
    %58 = vector.load %arg12[%c48_26, %c0_27] : memref<64x32xf32, #tpu.memory_space<vmem>>, vector<8x32xf32>
    tpu.vector_store %arg12[%c48_26, %c0_27], %57 {strides = array<i32>} : memref<64x32xf32, #tpu.memory_space<vmem>>, vector<8x32xf32>,
    %c16 = arith.constant 16 : index
    %c0_28 = arith.constant 0 : index
    %59 = vector.load %arg10[%c16, %c0_28] : memref<64x512xf32, #tpu.memory_space<vmem>>, vector<8x256xf32>
    %c40 = arith.constant 40 : index
    %c256_29 = arith.constant 256 : index
    %60 = vector.load %arg10[%c40, %c256_29] : memref<64x512xf32, #tpu.memory_space<vmem>>, vector<8x256xf32>
    %61 = arith.addf %59, %60 : vector<8x256xf32>
    %cst_30 = arith.constant dense<0.000000e+00> : vector<8x256xf32>
    %62 = tpu.matmul %54, %8, %cst_30 {dimension_numbers = #tpu.dot_dimension_numbers<[1], [0], [0], [1], [0, 0, 1, 1], [], []>} : vector<8x64xf32>, vector<64x256xf32>, vector<8x256xf32> -> vector<8x256xf32>
    %63 = arith.addf %61, %62 : vector<8x256xf32>
    %64 = arith.negf %63 : vector<8x256xf32>
    %65 = math.exp %64 : vector<8x256xf32>
    %cst_31 = arith.constant 1.000000e+00 : f32
    %66 = vector.broadcast %cst_31 : f32 to vector<8x256xf32>
    %67 = arith.addf %66, %65 : vector<8x256xf32>
    %68 = arith.divf %66, %67 : vector<8x256xf32>
    %69 = math.tanh %63 : vector<8x256xf32>
    %70 = vector.extract_strided_slice %68 {offsets = [0, 0], sizes = [8, 64], strides = [1, 1]} : vector<8x256xf32> to vector<8x64xf32>
    %71 = vector.extract_strided_slice %68 {offsets = [0, 64], sizes = [8, 64], strides = [1, 1]} : vector<8x256xf32> to vector<8x64xf32>
    %72 = vector.extract_strided_slice %69 {offsets = [0, 128], sizes = [8, 64], strides = [1, 1]} : vector<8x256xf32> to vector<8x64xf32>
    %73 = vector.extract_strided_slice %68 {offsets = [0, 192], sizes = [8, 64], strides = [1, 1]} : vector<8x256xf32> to vector<8x64xf32>
    %74 = arith.mulf %71, %52 : vector<8x64xf32>
    %75 = arith.mulf %70, %72 : vector<8x64xf32>
    %76 = arith.addf %74, %75 : vector<8x64xf32>
    %77 = math.tanh %76 : vector<8x64xf32>
    %78 = arith.mulf %73, %77 : vector<8x64xf32>
    %79 = vector.extract_strided_slice %78 {offsets = [0, 0], sizes = [8, 32], strides = [1, 1]} : vector<8x64xf32> to vector<8x32xf32>
    %c16_32 = arith.constant 16 : index
    %c0_33 = arith.constant 0 : index
    %80 = vector.load %arg11[%c16_32, %c0_33] : memref<64x32xf32, #tpu.memory_space<vmem>>, vector<8x32xf32>
    tpu.vector_store %arg11[%c16_32, %c0_33], %79 {strides = array<i32>} : memref<64x32xf32, #tpu.memory_space<vmem>>, vector<8x32xf32>,
    %81 = vector.extract_strided_slice %78 {offsets = [0, 32], sizes = [8, 32], strides = [1, 1]} : vector<8x64xf32> to vector<8x32xf32>
    %c40_34 = arith.constant 40 : index
    %c0_35 = arith.constant 0 : index
    %82 = vector.load %arg12[%c40_34, %c0_35] : memref<64x32xf32, #tpu.memory_space<vmem>>, vector<8x32xf32>
    tpu.vector_store %arg12[%c40_34, %c0_35], %81 {strides = array<i32>} : memref<64x32xf32, #tpu.memory_space<vmem>>, vector<8x32xf32>,
    %c24 = arith.constant 24 : index
    %c0_36 = arith.constant 0 : index
    %83 = vector.load %arg10[%c24, %c0_36] : memref<64x512xf32, #tpu.memory_space<vmem>>, vector<8x256xf32>
    %c32 = arith.constant 32 : index
    %c256_37 = arith.constant 256 : index
    %84 = vector.load %arg10[%c32, %c256_37] : memref<64x512xf32, #tpu.memory_space<vmem>>, vector<8x256xf32>
    %85 = arith.addf %83, %84 : vector<8x256xf32>
    %cst_38 = arith.constant dense<0.000000e+00> : vector<8x256xf32>
    %86 = tpu.matmul %78, %8, %cst_38 {dimension_numbers = #tpu.dot_dimension_numbers<[1], [0], [0], [1], [0, 0, 1, 1], [], []>} : vector<8x64xf32>, vector<64x256xf32>, vector<8x256xf32> -> vector<8x256xf32>
    %87 = arith.addf %85, %86 : vector<8x256xf32>
    %88 = arith.negf %87 : vector<8x256xf32>
    %89 = math.exp %88 : vector<8x256xf32>
    %cst_39 = arith.constant 1.000000e+00 : f32
    %90 = vector.broadcast %cst_39 : f32 to vector<8x256xf32>
    %91 = arith.addf %90, %89 : vector<8x256xf32>
    %92 = arith.divf %90, %91 : vector<8x256xf32>
    %93 = math.tanh %87 : vector<8x256xf32>
    %94 = vector.extract_strided_slice %92 {offsets = [0, 0], sizes = [8, 64], strides = [1, 1]} : vector<8x256xf32> to vector<8x64xf32>
    %95 = vector.extract_strided_slice %92 {offsets = [0, 64], sizes = [8, 64], strides = [1, 1]} : vector<8x256xf32> to vector<8x64xf32>
    %96 = vector.extract_strided_slice %93 {offsets = [0, 128], sizes = [8, 64], strides = [1, 1]} : vector<8x256xf32> to vector<8x64xf32>
    %97 = vector.extract_strided_slice %92 {offsets = [0, 192], sizes = [8, 64], strides = [1, 1]} : vector<8x256xf32> to vector<8x64xf32>
    %98 = arith.mulf %95, %76 : vector<8x64xf32>
    %99 = arith.mulf %94, %96 : vector<8x64xf32>
    %100 = arith.addf %98, %99 : vector<8x64xf32>
    %101 = math.tanh %100 : vector<8x64xf32>
    %102 = arith.mulf %97, %101 : vector<8x64xf32>
    %103 = vector.extract_strided_slice %102 {offsets = [0, 0], sizes = [8, 32], strides = [1, 1]} : vector<8x64xf32> to vector<8x32xf32>
    %c24_40 = arith.constant 24 : index
    %c0_41 = arith.constant 0 : index
    %104 = vector.load %arg11[%c24_40, %c0_41] : memref<64x32xf32, #tpu.memory_space<vmem>>, vector<8x32xf32>
    tpu.vector_store %arg11[%c24_40, %c0_41], %103 {strides = array<i32>} : memref<64x32xf32, #tpu.memory_space<vmem>>, vector<8x32xf32>,
    %105 = vector.extract_strided_slice %102 {offsets = [0, 32], sizes = [8, 32], strides = [1, 1]} : vector<8x64xf32> to vector<8x32xf32>
    %c32_42 = arith.constant 32 : index
    %c0_43 = arith.constant 0 : index
    %106 = vector.load %arg12[%c32_42, %c0_43] : memref<64x32xf32, #tpu.memory_space<vmem>>, vector<8x32xf32>
    tpu.vector_store %arg12[%c32_42, %c0_43], %105 {strides = array<i32>} : memref<64x32xf32, #tpu.memory_space<vmem>>, vector<8x32xf32>,
    %c32_44 = arith.constant 32 : index
    %c0_45 = arith.constant 0 : index
    %107 = vector.load %arg10[%c32_44, %c0_45] : memref<64x512xf32, #tpu.memory_space<vmem>>, vector<8x256xf32>
    %c24_46 = arith.constant 24 : index
    %c256_47 = arith.constant 256 : index
    %108 = vector.load %arg10[%c24_46, %c256_47] : memref<64x512xf32, #tpu.memory_space<vmem>>, vector<8x256xf32>
    %109 = arith.addf %107, %108 : vector<8x256xf32>
    %cst_48 = arith.constant dense<0.000000e+00> : vector<8x256xf32>
    %110 = tpu.matmul %102, %8, %cst_48 {dimension_numbers = #tpu.dot_dimension_numbers<[1], [0], [0], [1], [0, 0, 1, 1], [], []>} : vector<8x64xf32>, vector<64x256xf32>, vector<8x256xf32> -> vector<8x256xf32>
    %111 = arith.addf %109, %110 : vector<8x256xf32>
    %112 = arith.negf %111 : vector<8x256xf32>
    %113 = math.exp %112 : vector<8x256xf32>
    %cst_49 = arith.constant 1.000000e+00 : f32
    %114 = vector.broadcast %cst_49 : f32 to vector<8x256xf32>
    %115 = arith.addf %114, %113 : vector<8x256xf32>
    %116 = arith.divf %114, %115 : vector<8x256xf32>
    %117 = math.tanh %111 : vector<8x256xf32>
    %118 = vector.extract_strided_slice %116 {offsets = [0, 0], sizes = [8, 64], strides = [1, 1]} : vector<8x256xf32> to vector<8x64xf32>
    %119 = vector.extract_strided_slice %116 {offsets = [0, 64], sizes = [8, 64], strides = [1, 1]} : vector<8x256xf32> to vector<8x64xf32>
    %120 = vector.extract_strided_slice %117 {offsets = [0, 128], sizes = [8, 64], strides = [1, 1]} : vector<8x256xf32> to vector<8x64xf32>
    %121 = vector.extract_strided_slice %116 {offsets = [0, 192], sizes = [8, 64], strides = [1, 1]} : vector<8x256xf32> to vector<8x64xf32>
    %122 = arith.mulf %119, %100 : vector<8x64xf32>
    %123 = arith.mulf %118, %120 : vector<8x64xf32>
    %124 = arith.addf %122, %123 : vector<8x64xf32>
    %125 = math.tanh %124 : vector<8x64xf32>
    %126 = arith.mulf %121, %125 : vector<8x64xf32>
    %127 = vector.extract_strided_slice %126 {offsets = [0, 0], sizes = [8, 32], strides = [1, 1]} : vector<8x64xf32> to vector<8x32xf32>
    %c32_50 = arith.constant 32 : index
    %c0_51 = arith.constant 0 : index
    %128 = vector.load %arg11[%c32_50, %c0_51] : memref<64x32xf32, #tpu.memory_space<vmem>>, vector<8x32xf32>
    tpu.vector_store %arg11[%c32_50, %c0_51], %127 {strides = array<i32>} : memref<64x32xf32, #tpu.memory_space<vmem>>, vector<8x32xf32>,
    %129 = vector.extract_strided_slice %126 {offsets = [0, 32], sizes = [8, 32], strides = [1, 1]} : vector<8x64xf32> to vector<8x32xf32>
    %c24_52 = arith.constant 24 : index
    %c0_53 = arith.constant 0 : index
    %130 = vector.load %arg12[%c24_52, %c0_53] : memref<64x32xf32, #tpu.memory_space<vmem>>, vector<8x32xf32>
    tpu.vector_store %arg12[%c24_52, %c0_53], %129 {strides = array<i32>} : memref<64x32xf32, #tpu.memory_space<vmem>>, vector<8x32xf32>,
    %c40_54 = arith.constant 40 : index
    %c0_55 = arith.constant 0 : index
    %131 = vector.load %arg10[%c40_54, %c0_55] : memref<64x512xf32, #tpu.memory_space<vmem>>, vector<8x256xf32>
    %c16_56 = arith.constant 16 : index
    %c256_57 = arith.constant 256 : index
    %132 = vector.load %arg10[%c16_56, %c256_57] : memref<64x512xf32, #tpu.memory_space<vmem>>, vector<8x256xf32>
    %133 = arith.addf %131, %132 : vector<8x256xf32>
    %cst_58 = arith.constant dense<0.000000e+00> : vector<8x256xf32>
    %134 = tpu.matmul %126, %8, %cst_58 {dimension_numbers = #tpu.dot_dimension_numbers<[1], [0], [0], [1], [0, 0, 1, 1], [], []>} : vector<8x64xf32>, vector<64x256xf32>, vector<8x256xf32> -> vector<8x256xf32>
    %135 = arith.addf %133, %134 : vector<8x256xf32>
    %136 = arith.negf %135 : vector<8x256xf32>
    %137 = math.exp %136 : vector<8x256xf32>
    %cst_59 = arith.constant 1.000000e+00 : f32
    %138 = vector.broadcast %cst_59 : f32 to vector<8x256xf32>
    %139 = arith.addf %138, %137 : vector<8x256xf32>
    %140 = arith.divf %138, %139 : vector<8x256xf32>
    %141 = math.tanh %135 : vector<8x256xf32>
    %142 = vector.extract_strided_slice %140 {offsets = [0, 0], sizes = [8, 64], strides = [1, 1]} : vector<8x256xf32> to vector<8x64xf32>
    %143 = vector.extract_strided_slice %140 {offsets = [0, 64], sizes = [8, 64], strides = [1, 1]} : vector<8x256xf32> to vector<8x64xf32>
    %144 = vector.extract_strided_slice %141 {offsets = [0, 128], sizes = [8, 64], strides = [1, 1]} : vector<8x256xf32> to vector<8x64xf32>
    %145 = vector.extract_strided_slice %140 {offsets = [0, 192], sizes = [8, 64], strides = [1, 1]} : vector<8x256xf32> to vector<8x64xf32>
    %146 = arith.mulf %143, %124 : vector<8x64xf32>
    %147 = arith.mulf %142, %144 : vector<8x64xf32>
    %148 = arith.addf %146, %147 : vector<8x64xf32>
    %149 = math.tanh %148 : vector<8x64xf32>
    %150 = arith.mulf %145, %149 : vector<8x64xf32>
    %151 = vector.extract_strided_slice %150 {offsets = [0, 0], sizes = [8, 32], strides = [1, 1]} : vector<8x64xf32> to vector<8x32xf32>
    %c40_60 = arith.constant 40 : index
    %c0_61 = arith.constant 0 : index
    %152 = vector.load %arg11[%c40_60, %c0_61] : memref<64x32xf32, #tpu.memory_space<vmem>>, vector<8x32xf32>
    tpu.vector_store %arg11[%c40_60, %c0_61], %151 {strides = array<i32>} : memref<64x32xf32, #tpu.memory_space<vmem>>, vector<8x32xf32>,
    %153 = vector.extract_strided_slice %150 {offsets = [0, 32], sizes = [8, 32], strides = [1, 1]} : vector<8x64xf32> to vector<8x32xf32>
    %c16_62 = arith.constant 16 : index
    %c0_63 = arith.constant 0 : index
    %154 = vector.load %arg12[%c16_62, %c0_63] : memref<64x32xf32, #tpu.memory_space<vmem>>, vector<8x32xf32>
    tpu.vector_store %arg12[%c16_62, %c0_63], %153 {strides = array<i32>} : memref<64x32xf32, #tpu.memory_space<vmem>>, vector<8x32xf32>,
    %c48_64 = arith.constant 48 : index
    %c0_65 = arith.constant 0 : index
    %155 = vector.load %arg10[%c48_64, %c0_65] : memref<64x512xf32, #tpu.memory_space<vmem>>, vector<8x256xf32>
    %c8_66 = arith.constant 8 : index
    %c256_67 = arith.constant 256 : index
    %156 = vector.load %arg10[%c8_66, %c256_67] : memref<64x512xf32, #tpu.memory_space<vmem>>, vector<8x256xf32>
    %157 = arith.addf %155, %156 : vector<8x256xf32>
    %cst_68 = arith.constant dense<0.000000e+00> : vector<8x256xf32>
    %158 = tpu.matmul %150, %8, %cst_68 {dimension_numbers = #tpu.dot_dimension_numbers<[1], [0], [0], [1], [0, 0, 1, 1], [], []>} : vector<8x64xf32>, vector<64x256xf32>, vector<8x256xf32> -> vector<8x256xf32>
    %159 = arith.addf %157, %158 : vector<8x256xf32>
    %160 = arith.negf %159 : vector<8x256xf32>
    %161 = math.exp %160 : vector<8x256xf32>
    %cst_69 = arith.constant 1.000000e+00 : f32
    %162 = vector.broadcast %cst_69 : f32 to vector<8x256xf32>
    %163 = arith.addf %162, %161 : vector<8x256xf32>
    %164 = arith.divf %162, %163 : vector<8x256xf32>
    %165 = math.tanh %159 : vector<8x256xf32>
    %166 = vector.extract_strided_slice %164 {offsets = [0, 0], sizes = [8, 64], strides = [1, 1]} : vector<8x256xf32> to vector<8x64xf32>
    %167 = vector.extract_strided_slice %164 {offsets = [0, 64], sizes = [8, 64], strides = [1, 1]} : vector<8x256xf32> to vector<8x64xf32>
    %168 = vector.extract_strided_slice %165 {offsets = [0, 128], sizes = [8, 64], strides = [1, 1]} : vector<8x256xf32> to vector<8x64xf32>
    %169 = vector.extract_strided_slice %164 {offsets = [0, 192], sizes = [8, 64], strides = [1, 1]} : vector<8x256xf32> to vector<8x64xf32>
    %170 = arith.mulf %167, %148 : vector<8x64xf32>
    %171 = arith.mulf %166, %168 : vector<8x64xf32>
    %172 = arith.addf %170, %171 : vector<8x64xf32>
    %173 = math.tanh %172 : vector<8x64xf32>
    %174 = arith.mulf %169, %173 : vector<8x64xf32>
    %175 = vector.extract_strided_slice %174 {offsets = [0, 0], sizes = [8, 32], strides = [1, 1]} : vector<8x64xf32> to vector<8x32xf32>
    %c48_70 = arith.constant 48 : index
    %c0_71 = arith.constant 0 : index
    %176 = vector.load %arg11[%c48_70, %c0_71] : memref<64x32xf32, #tpu.memory_space<vmem>>, vector<8x32xf32>
    tpu.vector_store %arg11[%c48_70, %c0_71], %175 {strides = array<i32>} : memref<64x32xf32, #tpu.memory_space<vmem>>, vector<8x32xf32>,
    %177 = vector.extract_strided_slice %174 {offsets = [0, 32], sizes = [8, 32], strides = [1, 1]} : vector<8x64xf32> to vector<8x32xf32>
    %c8_72 = arith.constant 8 : index
    %c0_73 = arith.constant 0 : index
    %178 = vector.load %arg12[%c8_72, %c0_73] : memref<64x32xf32, #tpu.memory_space<vmem>>, vector<8x32xf32>
    tpu.vector_store %arg12[%c8_72, %c0_73], %177 {strides = array<i32>} : memref<64x32xf32, #tpu.memory_space<vmem>>, vector<8x32xf32>,
    %c56_74 = arith.constant 56 : index
    %c0_75 = arith.constant 0 : index
    %179 = vector.load %arg10[%c56_74, %c0_75] : memref<64x512xf32, #tpu.memory_space<vmem>>, vector<8x256xf32>
    %c0_76 = arith.constant 0 : index
    %c256_77 = arith.constant 256 : index
    %180 = vector.load %arg10[%c0_76, %c256_77] : memref<64x512xf32, #tpu.memory_space<vmem>>, vector<8x256xf32>
    %181 = arith.addf %179, %180 : vector<8x256xf32>
    %cst_78 = arith.constant dense<0.000000e+00> : vector<8x256xf32>
    %182 = tpu.matmul %174, %8, %cst_78 {dimension_numbers = #tpu.dot_dimension_numbers<[1], [0], [0], [1], [0, 0, 1, 1], [], []>} : vector<8x64xf32>, vector<64x256xf32>, vector<8x256xf32> -> vector<8x256xf32>
    %183 = arith.addf %181, %182 : vector<8x256xf32>
    %184 = arith.negf %183 : vector<8x256xf32>
    %185 = math.exp %184 : vector<8x256xf32>
    %cst_79 = arith.constant 1.000000e+00 : f32
    %186 = vector.broadcast %cst_79 : f32 to vector<8x256xf32>
    %187 = arith.addf %186, %185 : vector<8x256xf32>
    %188 = arith.divf %186, %187 : vector<8x256xf32>
    %189 = math.tanh %183 : vector<8x256xf32>
    %190 = vector.extract_strided_slice %188 {offsets = [0, 0], sizes = [8, 64], strides = [1, 1]} : vector<8x256xf32> to vector<8x64xf32>
    %191 = vector.extract_strided_slice %188 {offsets = [0, 64], sizes = [8, 64], strides = [1, 1]} : vector<8x256xf32> to vector<8x64xf32>
    %192 = vector.extract_strided_slice %189 {offsets = [0, 128], sizes = [8, 64], strides = [1, 1]} : vector<8x256xf32> to vector<8x64xf32>
    %193 = vector.extract_strided_slice %188 {offsets = [0, 192], sizes = [8, 64], strides = [1, 1]} : vector<8x256xf32> to vector<8x64xf32>
    %194 = arith.mulf %191, %172 : vector<8x64xf32>
    %195 = arith.mulf %190, %192 : vector<8x64xf32>
    %196 = arith.addf %194, %195 : vector<8x64xf32>
    %197 = math.tanh %196 : vector<8x64xf32>
    %198 = arith.mulf %193, %197 : vector<8x64xf32>
    %199 = vector.extract_strided_slice %198 {offsets = [0, 0], sizes = [8, 32], strides = [1, 1]} : vector<8x64xf32> to vector<8x32xf32>
    %c56_80 = arith.constant 56 : index
    %c0_81 = arith.constant 0 : index
    %200 = vector.load %arg11[%c56_80, %c0_81] : memref<64x32xf32, #tpu.memory_space<vmem>>, vector<8x32xf32>
    tpu.vector_store %arg11[%c56_80, %c0_81], %199 {strides = array<i32>} : memref<64x32xf32, #tpu.memory_space<vmem>>, vector<8x32xf32>,
    %201 = vector.extract_strided_slice %198 {offsets = [0, 32], sizes = [8, 32], strides = [1, 1]} : vector<8x64xf32> to vector<8x32xf32>
    %c0_82 = arith.constant 0 : index
    %c0_83 = arith.constant 0 : index
    %202 = vector.load %arg12[%c0_82, %c0_83] : memref<64x32xf32, #tpu.memory_space<vmem>>, vector<8x32xf32>
    tpu.vector_store %arg12[%c0_82, %c0_83], %201 {strides = array<i32>} : memref<64x32xf32, #tpu.memory_space<vmem>>, vector<8x32xf32>,
    %c0_84 = arith.constant 0 : index
    %c0_85 = arith.constant 0 : index
    %203 = vector.load %arg5[%c0_84, %c0_85] : memref<64x512xf32, #tpu.memory_space<vmem>>, vector<64x512xf32>
    %c0_86 = arith.constant 0 : index
    %c0_87 = arith.constant 0 : index
    %204 = vector.load %arg11[%c0_86, %c0_87] : memref<64x32xf32, #tpu.memory_space<vmem>>, vector<64x32xf32>
    %205 = vector.extract_strided_slice %203 {offsets = [0, 0], sizes = [32, 512], strides = [1, 1]} : vector<64x512xf32> to vector<32x512xf32>
    %cst_88 = arith.constant dense<0.000000e+00> : vector<64x512xf32>
    %206 = tpu.matmul %204, %205, %cst_88 {dimension_numbers = #tpu.dot_dimension_numbers<[1], [0], [0], [1], [0, 0, 1, 1], [], []>} : vector<64x32xf32>, vector<32x512xf32>, vector<64x512xf32> -> vector<64x512xf32>
    %c0_89 = arith.constant 0 : index
    %c0_90 = arith.constant 0 : index
    %207 = vector.load %arg12[%c0_89, %c0_90] : memref<64x32xf32, #tpu.memory_space<vmem>>, vector<64x32xf32>
    %208 = vector.extract_strided_slice %203 {offsets = [32, 0], sizes = [32, 512], strides = [1, 1]} : vector<64x512xf32> to vector<32x512xf32>
    %cst_91 = arith.constant dense<0.000000e+00> : vector<64x512xf32>
    %209 = tpu.matmul %207, %208, %cst_91 {dimension_numbers = #tpu.dot_dimension_numbers<[1], [0], [0], [1], [0, 0, 1, 1], [], []>} : vector<64x32xf32>, vector<32x512xf32>, vector<64x512xf32> -> vector<64x512xf32>
    %210 = arith.addf %206, %209 : vector<64x512xf32>
    %c0_92 = arith.constant 0 : index
    %c0_93 = arith.constant 0 : index
    %211 = vector.load %arg6[%c0_92, %c0_93] : memref<1x512xf32, #tpu.memory_space<vmem>>, vector<1x512xf32>
    %212 = vector.broadcast %211 : vector<1x512xf32> to vector<64x512xf32>
    %213 = arith.addf %210, %212 : vector<64x512xf32>
    %c0_94 = arith.constant 0 : index
    %c0_95 = arith.constant 0 : index
    %214 = vector.load %arg10[%c0_94, %c0_95] : memref<64x512xf32, #tpu.memory_space<vmem>>, vector<64x512xf32>
    tpu.vector_store %arg10[%c0_94, %c0_95], %213 {strides = array<i32>} : memref<64x512xf32, #tpu.memory_space<vmem>>, vector<64x512xf32>,
    %c1 = arith.constant 1 : index
    %c0_96 = arith.constant 0 : index
    %c0_97 = arith.constant 0 : index
    %215 = vector.load %arg4[%c1, %c0_96, %c0_97] : memref<2x64x256xf32, #tpu.memory_space<vmem>>, vector<1x64x256xf32>
    %216 = vector.shape_cast %215 : vector<1x64x256xf32> to vector<64x256xf32>
    %cst_98 = arith.constant 0.000000e+00 : f32
    %217 = vector.broadcast %cst_98 : f32 to vector<8x64xf32>
    %cst_99 = arith.constant 0.000000e+00 : f32
    %218 = vector.broadcast %cst_99 : f32 to vector<8x64xf32>
    %c0_100 = arith.constant 0 : index
    %c0_101 = arith.constant 0 : index
    %219 = vector.load %arg10[%c0_100, %c0_101] : memref<64x512xf32, #tpu.memory_space<vmem>>, vector<8x256xf32>
    %c56_102 = arith.constant 56 : index
    %c256_103 = arith.constant 256 : index
    %220 = vector.load %arg10[%c56_102, %c256_103] : memref<64x512xf32, #tpu.memory_space<vmem>>, vector<8x256xf32>
    %221 = arith.addf %219, %220 : vector<8x256xf32>
    %cst_104 = arith.constant dense<0.000000e+00> : vector<8x256xf32>
    %222 = tpu.matmul %217, %216, %cst_104 {dimension_numbers = #tpu.dot_dimension_numbers<[1], [0], [0], [1], [0, 0, 1, 1], [], []>} : vector<8x64xf32>, vector<64x256xf32>, vector<8x256xf32> -> vector<8x256xf32>
    %223 = arith.addf %221, %222 : vector<8x256xf32>
    %224 = arith.negf %223 : vector<8x256xf32>
    %225 = math.exp %224 : vector<8x256xf32>
    %cst_105 = arith.constant 1.000000e+00 : f32
    %226 = vector.broadcast %cst_105 : f32 to vector<8x256xf32>
    %227 = arith.addf %226, %225 : vector<8x256xf32>
    %228 = arith.divf %226, %227 : vector<8x256xf32>
    %229 = math.tanh %223 : vector<8x256xf32>
    %230 = vector.extract_strided_slice %228 {offsets = [0, 0], sizes = [8, 64], strides = [1, 1]} : vector<8x256xf32> to vector<8x64xf32>
    %231 = vector.extract_strided_slice %228 {offsets = [0, 64], sizes = [8, 64], strides = [1, 1]} : vector<8x256xf32> to vector<8x64xf32>
    %232 = vector.extract_strided_slice %229 {offsets = [0, 128], sizes = [8, 64], strides = [1, 1]} : vector<8x256xf32> to vector<8x64xf32>
    %233 = vector.extract_strided_slice %228 {offsets = [0, 192], sizes = [8, 64], strides = [1, 1]} : vector<8x256xf32> to vector<8x64xf32>
    %234 = arith.mulf %231, %218 : vector<8x64xf32>
    %235 = arith.mulf %230, %232 : vector<8x64xf32>
    %236 = arith.addf %234, %235 : vector<8x64xf32>
    %237 = math.tanh %236 : vector<8x64xf32>
    %238 = arith.mulf %233, %237 : vector<8x64xf32>
    %239 = vector.extract_strided_slice %238 {offsets = [0, 0], sizes = [8, 32], strides = [1, 1]} : vector<8x64xf32> to vector<8x32xf32>
    %c0_106 = arith.constant 0 : index
    %c0_107 = arith.constant 0 : index
    %240 = vector.load %arg13[%c0_106, %c0_107] : memref<64x32xf32, #tpu.memory_space<vmem>>, vector<8x32xf32>
    tpu.vector_store %arg13[%c0_106, %c0_107], %239 {strides = array<i32>} : memref<64x32xf32, #tpu.memory_space<vmem>>, vector<8x32xf32>,
    %241 = vector.extract_strided_slice %238 {offsets = [0, 32], sizes = [8, 32], strides = [1, 1]} : vector<8x64xf32> to vector<8x32xf32>
    %c56_108 = arith.constant 56 : index
    %c0_109 = arith.constant 0 : index
    %242 = vector.load %arg14[%c56_108, %c0_109] : memref<64x32xf32, #tpu.memory_space<vmem>>, vector<8x32xf32>
    tpu.vector_store %arg14[%c56_108, %c0_109], %241 {strides = array<i32>} : memref<64x32xf32, #tpu.memory_space<vmem>>, vector<8x32xf32>,
    %c8_110 = arith.constant 8 : index
    %c0_111 = arith.constant 0 : index
    %243 = vector.load %arg10[%c8_110, %c0_111] : memref<64x512xf32, #tpu.memory_space<vmem>>, vector<8x256xf32>
    %c48_112 = arith.constant 48 : index
    %c256_113 = arith.constant 256 : index
    %244 = vector.load %arg10[%c48_112, %c256_113] : memref<64x512xf32, #tpu.memory_space<vmem>>, vector<8x256xf32>
    %245 = arith.addf %243, %244 : vector<8x256xf32>
    %cst_114 = arith.constant dense<0.000000e+00> : vector<8x256xf32>
    %246 = tpu.matmul %238, %216, %cst_114 {dimension_numbers = #tpu.dot_dimension_numbers<[1], [0], [0], [1], [0, 0, 1, 1], [], []>} : vector<8x64xf32>, vector<64x256xf32>, vector<8x256xf32> -> vector<8x256xf32>
    %247 = arith.addf %245, %246 : vector<8x256xf32>
    %248 = arith.negf %247 : vector<8x256xf32>
    %249 = math.exp %248 : vector<8x256xf32>
    %cst_115 = arith.constant 1.000000e+00 : f32
    %250 = vector.broadcast %cst_115 : f32 to vector<8x256xf32>
    %251 = arith.addf %250, %249 : vector<8x256xf32>
    %252 = arith.divf %250, %251 : vector<8x256xf32>
    %253 = math.tanh %247 : vector<8x256xf32>
    %254 = vector.extract_strided_slice %252 {offsets = [0, 0], sizes = [8, 64], strides = [1, 1]} : vector<8x256xf32> to vector<8x64xf32>
    %255 = vector.extract_strided_slice %252 {offsets = [0, 64], sizes = [8, 64], strides = [1, 1]} : vector<8x256xf32> to vector<8x64xf32>
    %256 = vector.extract_strided_slice %253 {offsets = [0, 128], sizes = [8, 64], strides = [1, 1]} : vector<8x256xf32> to vector<8x64xf32>
    %257 = vector.extract_strided_slice %252 {offsets = [0, 192], sizes = [8, 64], strides = [1, 1]} : vector<8x256xf32> to vector<8x64xf32>
    %258 = arith.mulf %255, %236 : vector<8x64xf32>
    %259 = arith.mulf %254, %256 : vector<8x64xf32>
    %260 = arith.addf %258, %259 : vector<8x64xf32>
    %261 = math.tanh %260 : vector<8x64xf32>
    %262 = arith.mulf %257, %261 : vector<8x64xf32>
    %263 = vector.extract_strided_slice %262 {offsets = [0, 0], sizes = [8, 32], strides = [1, 1]} : vector<8x64xf32> to vector<8x32xf32>
    %c8_116 = arith.constant 8 : index
    %c0_117 = arith.constant 0 : index
    %264 = vector.load %arg13[%c8_116, %c0_117] : memref<64x32xf32, #tpu.memory_space<vmem>>, vector<8x32xf32>
    tpu.vector_store %arg13[%c8_116, %c0_117], %263 {strides = array<i32>} : memref<64x32xf32, #tpu.memory_space<vmem>>, vector<8x32xf32>,
    %265 = vector.extract_strided_slice %262 {offsets = [0, 32], sizes = [8, 32], strides = [1, 1]} : vector<8x64xf32> to vector<8x32xf32>
    %c48_118 = arith.constant 48 : index
    %c0_119 = arith.constant 0 : index
    %266 = vector.load %arg14[%c48_118, %c0_119] : memref<64x32xf32, #tpu.memory_space<vmem>>, vector<8x32xf32>
    tpu.vector_store %arg14[%c48_118, %c0_119], %265 {strides = array<i32>} : memref<64x32xf32, #tpu.memory_space<vmem>>, vector<8x32xf32>,
    %c16_120 = arith.constant 16 : index
    %c0_121 = arith.constant 0 : index
    %267 = vector.load %arg10[%c16_120, %c0_121] : memref<64x512xf32, #tpu.memory_space<vmem>>, vector<8x256xf32>
    %c40_122 = arith.constant 40 : index
    %c256_123 = arith.constant 256 : index
    %268 = vector.load %arg10[%c40_122, %c256_123] : memref<64x512xf32, #tpu.memory_space<vmem>>, vector<8x256xf32>
    %269 = arith.addf %267, %268 : vector<8x256xf32>
    %cst_124 = arith.constant dense<0.000000e+00> : vector<8x256xf32>
    %270 = tpu.matmul %262, %216, %cst_124 {dimension_numbers = #tpu.dot_dimension_numbers<[1], [0], [0], [1], [0, 0, 1, 1], [], []>} : vector<8x64xf32>, vector<64x256xf32>, vector<8x256xf32> -> vector<8x256xf32>
    %271 = arith.addf %269, %270 : vector<8x256xf32>
    %272 = arith.negf %271 : vector<8x256xf32>
    %273 = math.exp %272 : vector<8x256xf32>
    %cst_125 = arith.constant 1.000000e+00 : f32
    %274 = vector.broadcast %cst_125 : f32 to vector<8x256xf32>
    %275 = arith.addf %274, %273 : vector<8x256xf32>
    %276 = arith.divf %274, %275 : vector<8x256xf32>
    %277 = math.tanh %271 : vector<8x256xf32>
    %278 = vector.extract_strided_slice %276 {offsets = [0, 0], sizes = [8, 64], strides = [1, 1]} : vector<8x256xf32> to vector<8x64xf32>
    %279 = vector.extract_strided_slice %276 {offsets = [0, 64], sizes = [8, 64], strides = [1, 1]} : vector<8x256xf32> to vector<8x64xf32>
    %280 = vector.extract_strided_slice %277 {offsets = [0, 128], sizes = [8, 64], strides = [1, 1]} : vector<8x256xf32> to vector<8x64xf32>
    %281 = vector.extract_strided_slice %276 {offsets = [0, 192], sizes = [8, 64], strides = [1, 1]} : vector<8x256xf32> to vector<8x64xf32>
    %282 = arith.mulf %279, %260 : vector<8x64xf32>
    %283 = arith.mulf %278, %280 : vector<8x64xf32>
    %284 = arith.addf %282, %283 : vector<8x64xf32>
    %285 = math.tanh %284 : vector<8x64xf32>
    %286 = arith.mulf %281, %285 : vector<8x64xf32>
    %287 = vector.extract_strided_slice %286 {offsets = [0, 0], sizes = [8, 32], strides = [1, 1]} : vector<8x64xf32> to vector<8x32xf32>
    %c16_126 = arith.constant 16 : index
    %c0_127 = arith.constant 0 : index
    %288 = vector.load %arg13[%c16_126, %c0_127] : memref<64x32xf32, #tpu.memory_space<vmem>>, vector<8x32xf32>
    tpu.vector_store %arg13[%c16_126, %c0_127], %287 {strides = array<i32>} : memref<64x32xf32, #tpu.memory_space<vmem>>, vector<8x32xf32>,
    %289 = vector.extract_strided_slice %286 {offsets = [0, 32], sizes = [8, 32], strides = [1, 1]} : vector<8x64xf32> to vector<8x32xf32>
    %c40_128 = arith.constant 40 : index
    %c0_129 = arith.constant 0 : index
    %290 = vector.load %arg14[%c40_128, %c0_129] : memref<64x32xf32, #tpu.memory_space<vmem>>, vector<8x32xf32>
    tpu.vector_store %arg14[%c40_128, %c0_129], %289 {strides = array<i32>} : memref<64x32xf32, #tpu.memory_space<vmem>>, vector<8x32xf32>,
    %c24_130 = arith.constant 24 : index
    %c0_131 = arith.constant 0 : index
    %291 = vector.load %arg10[%c24_130, %c0_131] : memref<64x512xf32, #tpu.memory_space<vmem>>, vector<8x256xf32>
    %c32_132 = arith.constant 32 : index
    %c256_133 = arith.constant 256 : index
    %292 = vector.load %arg10[%c32_132, %c256_133] : memref<64x512xf32, #tpu.memory_space<vmem>>, vector<8x256xf32>
    %293 = arith.addf %291, %292 : vector<8x256xf32>
    %cst_134 = arith.constant dense<0.000000e+00> : vector<8x256xf32>
    %294 = tpu.matmul %286, %216, %cst_134 {dimension_numbers = #tpu.dot_dimension_numbers<[1], [0], [0], [1], [0, 0, 1, 1], [], []>} : vector<8x64xf32>, vector<64x256xf32>, vector<8x256xf32> -> vector<8x256xf32>
    %295 = arith.addf %293, %294 : vector<8x256xf32>
    %296 = arith.negf %295 : vector<8x256xf32>
    %297 = math.exp %296 : vector<8x256xf32>
    %cst_135 = arith.constant 1.000000e+00 : f32
    %298 = vector.broadcast %cst_135 : f32 to vector<8x256xf32>
    %299 = arith.addf %298, %297 : vector<8x256xf32>
    %300 = arith.divf %298, %299 : vector<8x256xf32>
    %301 = math.tanh %295 : vector<8x256xf32>
    %302 = vector.extract_strided_slice %300 {offsets = [0, 0], sizes = [8, 64], strides = [1, 1]} : vector<8x256xf32> to vector<8x64xf32>
    %303 = vector.extract_strided_slice %300 {offsets = [0, 64], sizes = [8, 64], strides = [1, 1]} : vector<8x256xf32> to vector<8x64xf32>
    %304 = vector.extract_strided_slice %301 {offsets = [0, 128], sizes = [8, 64], strides = [1, 1]} : vector<8x256xf32> to vector<8x64xf32>
    %305 = vector.extract_strided_slice %300 {offsets = [0, 192], sizes = [8, 64], strides = [1, 1]} : vector<8x256xf32> to vector<8x64xf32>
    %306 = arith.mulf %303, %284 : vector<8x64xf32>
    %307 = arith.mulf %302, %304 : vector<8x64xf32>
    %308 = arith.addf %306, %307 : vector<8x64xf32>
    %309 = math.tanh %308 : vector<8x64xf32>
    %310 = arith.mulf %305, %309 : vector<8x64xf32>
    %311 = vector.extract_strided_slice %310 {offsets = [0, 0], sizes = [8, 32], strides = [1, 1]} : vector<8x64xf32> to vector<8x32xf32>
    %c24_136 = arith.constant 24 : index
    %c0_137 = arith.constant 0 : index
    %312 = vector.load %arg13[%c24_136, %c0_137] : memref<64x32xf32, #tpu.memory_space<vmem>>, vector<8x32xf32>
    tpu.vector_store %arg13[%c24_136, %c0_137], %311 {strides = array<i32>} : memref<64x32xf32, #tpu.memory_space<vmem>>, vector<8x32xf32>,
    %313 = vector.extract_strided_slice %310 {offsets = [0, 32], sizes = [8, 32], strides = [1, 1]} : vector<8x64xf32> to vector<8x32xf32>
    %c32_138 = arith.constant 32 : index
    %c0_139 = arith.constant 0 : index
    %314 = vector.load %arg14[%c32_138, %c0_139] : memref<64x32xf32, #tpu.memory_space<vmem>>, vector<8x32xf32>
    tpu.vector_store %arg14[%c32_138, %c0_139], %313 {strides = array<i32>} : memref<64x32xf32, #tpu.memory_space<vmem>>, vector<8x32xf32>,
    %c32_140 = arith.constant 32 : index
    %c0_141 = arith.constant 0 : index
    %315 = vector.load %arg10[%c32_140, %c0_141] : memref<64x512xf32, #tpu.memory_space<vmem>>, vector<8x256xf32>
    %c24_142 = arith.constant 24 : index
    %c256_143 = arith.constant 256 : index
    %316 = vector.load %arg10[%c24_142, %c256_143] : memref<64x512xf32, #tpu.memory_space<vmem>>, vector<8x256xf32>
    %317 = arith.addf %315, %316 : vector<8x256xf32>
    %cst_144 = arith.constant dense<0.000000e+00> : vector<8x256xf32>
    %318 = tpu.matmul %310, %216, %cst_144 {dimension_numbers = #tpu.dot_dimension_numbers<[1], [0], [0], [1], [0, 0, 1, 1], [], []>} : vector<8x64xf32>, vector<64x256xf32>, vector<8x256xf32> -> vector<8x256xf32>
    %319 = arith.addf %317, %318 : vector<8x256xf32>
    %320 = arith.negf %319 : vector<8x256xf32>
    %321 = math.exp %320 : vector<8x256xf32>
    %cst_145 = arith.constant 1.000000e+00 : f32
    %322 = vector.broadcast %cst_145 : f32 to vector<8x256xf32>
    %323 = arith.addf %322, %321 : vector<8x256xf32>
    %324 = arith.divf %322, %323 : vector<8x256xf32>
    %325 = math.tanh %319 : vector<8x256xf32>
    %326 = vector.extract_strided_slice %324 {offsets = [0, 0], sizes = [8, 64], strides = [1, 1]} : vector<8x256xf32> to vector<8x64xf32>
    %327 = vector.extract_strided_slice %324 {offsets = [0, 64], sizes = [8, 64], strides = [1, 1]} : vector<8x256xf32> to vector<8x64xf32>
    %328 = vector.extract_strided_slice %325 {offsets = [0, 128], sizes = [8, 64], strides = [1, 1]} : vector<8x256xf32> to vector<8x64xf32>
    %329 = vector.extract_strided_slice %324 {offsets = [0, 192], sizes = [8, 64], strides = [1, 1]} : vector<8x256xf32> to vector<8x64xf32>
    %330 = arith.mulf %327, %308 : vector<8x64xf32>
    %331 = arith.mulf %326, %328 : vector<8x64xf32>
    %332 = arith.addf %330, %331 : vector<8x64xf32>
    %333 = math.tanh %332 : vector<8x64xf32>
    %334 = arith.mulf %329, %333 : vector<8x64xf32>
    %335 = vector.extract_strided_slice %334 {offsets = [0, 0], sizes = [8, 32], strides = [1, 1]} : vector<8x64xf32> to vector<8x32xf32>
    %c32_146 = arith.constant 32 : index
    %c0_147 = arith.constant 0 : index
    %336 = vector.load %arg13[%c32_146, %c0_147] : memref<64x32xf32, #tpu.memory_space<vmem>>, vector<8x32xf32>
    tpu.vector_store %arg13[%c32_146, %c0_147], %335 {strides = array<i32>} : memref<64x32xf32, #tpu.memory_space<vmem>>, vector<8x32xf32>,
    %337 = vector.extract_strided_slice %334 {offsets = [0, 32], sizes = [8, 32], strides = [1, 1]} : vector<8x64xf32> to vector<8x32xf32>
    %c24_148 = arith.constant 24 : index
    %c0_149 = arith.constant 0 : index
    %338 = vector.load %arg14[%c24_148, %c0_149] : memref<64x32xf32, #tpu.memory_space<vmem>>, vector<8x32xf32>
    tpu.vector_store %arg14[%c24_148, %c0_149], %337 {strides = array<i32>} : memref<64x32xf32, #tpu.memory_space<vmem>>, vector<8x32xf32>,
    %c40_150 = arith.constant 40 : index
    %c0_151 = arith.constant 0 : index
    %339 = vector.load %arg10[%c40_150, %c0_151] : memref<64x512xf32, #tpu.memory_space<vmem>>, vector<8x256xf32>
    %c16_152 = arith.constant 16 : index
    %c256_153 = arith.constant 256 : index
    %340 = vector.load %arg10[%c16_152, %c256_153] : memref<64x512xf32, #tpu.memory_space<vmem>>, vector<8x256xf32>
    %341 = arith.addf %339, %340 : vector<8x256xf32>
    %cst_154 = arith.constant dense<0.000000e+00> : vector<8x256xf32>
    %342 = tpu.matmul %334, %216, %cst_154 {dimension_numbers = #tpu.dot_dimension_numbers<[1], [0], [0], [1], [0, 0, 1, 1], [], []>} : vector<8x64xf32>, vector<64x256xf32>, vector<8x256xf32> -> vector<8x256xf32>
    %343 = arith.addf %341, %342 : vector<8x256xf32>
    %344 = arith.negf %343 : vector<8x256xf32>
    %345 = math.exp %344 : vector<8x256xf32>
    %cst_155 = arith.constant 1.000000e+00 : f32
    %346 = vector.broadcast %cst_155 : f32 to vector<8x256xf32>
    %347 = arith.addf %346, %345 : vector<8x256xf32>
    %348 = arith.divf %346, %347 : vector<8x256xf32>
    %349 = math.tanh %343 : vector<8x256xf32>
    %350 = vector.extract_strided_slice %348 {offsets = [0, 0], sizes = [8, 64], strides = [1, 1]} : vector<8x256xf32> to vector<8x64xf32>
    %351 = vector.extract_strided_slice %348 {offsets = [0, 64], sizes = [8, 64], strides = [1, 1]} : vector<8x256xf32> to vector<8x64xf32>
    %352 = vector.extract_strided_slice %349 {offsets = [0, 128], sizes = [8, 64], strides = [1, 1]} : vector<8x256xf32> to vector<8x64xf32>
    %353 = vector.extract_strided_slice %348 {offsets = [0, 192], sizes = [8, 64], strides = [1, 1]} : vector<8x256xf32> to vector<8x64xf32>
    %354 = arith.mulf %351, %332 : vector<8x64xf32>
    %355 = arith.mulf %350, %352 : vector<8x64xf32>
    %356 = arith.addf %354, %355 : vector<8x64xf32>
    %357 = math.tanh %356 : vector<8x64xf32>
    %358 = arith.mulf %353, %357 : vector<8x64xf32>
    %359 = vector.extract_strided_slice %358 {offsets = [0, 0], sizes = [8, 32], strides = [1, 1]} : vector<8x64xf32> to vector<8x32xf32>
    %c40_156 = arith.constant 40 : index
    %c0_157 = arith.constant 0 : index
    %360 = vector.load %arg13[%c40_156, %c0_157] : memref<64x32xf32, #tpu.memory_space<vmem>>, vector<8x32xf32>
    tpu.vector_store %arg13[%c40_156, %c0_157], %359 {strides = array<i32>} : memref<64x32xf32, #tpu.memory_space<vmem>>, vector<8x32xf32>,
    %361 = vector.extract_strided_slice %358 {offsets = [0, 32], sizes = [8, 32], strides = [1, 1]} : vector<8x64xf32> to vector<8x32xf32>
    %c16_158 = arith.constant 16 : index
    %c0_159 = arith.constant 0 : index
    %362 = vector.load %arg14[%c16_158, %c0_159] : memref<64x32xf32, #tpu.memory_space<vmem>>, vector<8x32xf32>
    tpu.vector_store %arg14[%c16_158, %c0_159], %361 {strides = array<i32>} : memref<64x32xf32, #tpu.memory_space<vmem>>, vector<8x32xf32>,
    %c48_160 = arith.constant 48 : index
    %c0_161 = arith.constant 0 : index
    %363 = vector.load %arg10[%c48_160, %c0_161] : memref<64x512xf32, #tpu.memory_space<vmem>>, vector<8x256xf32>
    %c8_162 = arith.constant 8 : index
    %c256_163 = arith.constant 256 : index
    %364 = vector.load %arg10[%c8_162, %c256_163] : memref<64x512xf32, #tpu.memory_space<vmem>>, vector<8x256xf32>
    %365 = arith.addf %363, %364 : vector<8x256xf32>
    %cst_164 = arith.constant dense<0.000000e+00> : vector<8x256xf32>
    %366 = tpu.matmul %358, %216, %cst_164 {dimension_numbers = #tpu.dot_dimension_numbers<[1], [0], [0], [1], [0, 0, 1, 1], [], []>} : vector<8x64xf32>, vector<64x256xf32>, vector<8x256xf32> -> vector<8x256xf32>
    %367 = arith.addf %365, %366 : vector<8x256xf32>
    %368 = arith.negf %367 : vector<8x256xf32>
    %369 = math.exp %368 : vector<8x256xf32>
    %cst_165 = arith.constant 1.000000e+00 : f32
    %370 = vector.broadcast %cst_165 : f32 to vector<8x256xf32>
    %371 = arith.addf %370, %369 : vector<8x256xf32>
    %372 = arith.divf %370, %371 : vector<8x256xf32>
    %373 = math.tanh %367 : vector<8x256xf32>
    %374 = vector.extract_strided_slice %372 {offsets = [0, 0], sizes = [8, 64], strides = [1, 1]} : vector<8x256xf32> to vector<8x64xf32>
    %375 = vector.extract_strided_slice %372 {offsets = [0, 64], sizes = [8, 64], strides = [1, 1]} : vector<8x256xf32> to vector<8x64xf32>
    %376 = vector.extract_strided_slice %373 {offsets = [0, 128], sizes = [8, 64], strides = [1, 1]} : vector<8x256xf32> to vector<8x64xf32>
    %377 = vector.extract_strided_slice %372 {offsets = [0, 192], sizes = [8, 64], strides = [1, 1]} : vector<8x256xf32> to vector<8x64xf32>
    %378 = arith.mulf %375, %356 : vector<8x64xf32>
    %379 = arith.mulf %374, %376 : vector<8x64xf32>
    %380 = arith.addf %378, %379 : vector<8x64xf32>
    %381 = math.tanh %380 : vector<8x64xf32>
    %382 = arith.mulf %377, %381 : vector<8x64xf32>
    %383 = vector.extract_strided_slice %382 {offsets = [0, 0], sizes = [8, 32], strides = [1, 1]} : vector<8x64xf32> to vector<8x32xf32>
    %c48_166 = arith.constant 48 : index
    %c0_167 = arith.constant 0 : index
    %384 = vector.load %arg13[%c48_166, %c0_167] : memref<64x32xf32, #tpu.memory_space<vmem>>, vector<8x32xf32>
    tpu.vector_store %arg13[%c48_166, %c0_167], %383 {strides = array<i32>} : memref<64x32xf32, #tpu.memory_space<vmem>>, vector<8x32xf32>,
    %385 = vector.extract_strided_slice %382 {offsets = [0, 32], sizes = [8, 32], strides = [1, 1]} : vector<8x64xf32> to vector<8x32xf32>
    %c8_168 = arith.constant 8 : index
    %c0_169 = arith.constant 0 : index
    %386 = vector.load %arg14[%c8_168, %c0_169] : memref<64x32xf32, #tpu.memory_space<vmem>>, vector<8x32xf32>
    tpu.vector_store %arg14[%c8_168, %c0_169], %385 {strides = array<i32>} : memref<64x32xf32, #tpu.memory_space<vmem>>, vector<8x32xf32>,
    %c56_170 = arith.constant 56 : index
    %c0_171 = arith.constant 0 : index
    %387 = vector.load %arg10[%c56_170, %c0_171] : memref<64x512xf32, #tpu.memory_space<vmem>>, vector<8x256xf32>
    %c0_172 = arith.constant 0 : index
    %c256_173 = arith.constant 256 : index
    %388 = vector.load %arg10[%c0_172, %c256_173] : memref<64x512xf32, #tpu.memory_space<vmem>>, vector<8x256xf32>
    %389 = arith.addf %387, %388 : vector<8x256xf32>
    %cst_174 = arith.constant dense<0.000000e+00> : vector<8x256xf32>
    %390 = tpu.matmul %382, %216, %cst_174 {dimension_numbers = #tpu.dot_dimension_numbers<[1], [0], [0], [1], [0, 0, 1, 1], [], []>} : vector<8x64xf32>, vector<64x256xf32>, vector<8x256xf32> -> vector<8x256xf32>
    %391 = arith.addf %389, %390 : vector<8x256xf32>
    %392 = arith.negf %391 : vector<8x256xf32>
    %393 = math.exp %392 : vector<8x256xf32>
    %cst_175 = arith.constant 1.000000e+00 : f32
    %394 = vector.broadcast %cst_175 : f32 to vector<8x256xf32>
    %395 = arith.addf %394, %393 : vector<8x256xf32>
    %396 = arith.divf %394, %395 : vector<8x256xf32>
    %397 = math.tanh %391 : vector<8x256xf32>
    %398 = vector.extract_strided_slice %396 {offsets = [0, 0], sizes = [8, 64], strides = [1, 1]} : vector<8x256xf32> to vector<8x64xf32>
    %399 = vector.extract_strided_slice %396 {offsets = [0, 64], sizes = [8, 64], strides = [1, 1]} : vector<8x256xf32> to vector<8x64xf32>
    %400 = vector.extract_strided_slice %397 {offsets = [0, 128], sizes = [8, 64], strides = [1, 1]} : vector<8x256xf32> to vector<8x64xf32>
    %401 = vector.extract_strided_slice %396 {offsets = [0, 192], sizes = [8, 64], strides = [1, 1]} : vector<8x256xf32> to vector<8x64xf32>
    %402 = arith.mulf %399, %380 : vector<8x64xf32>
    %403 = arith.mulf %398, %400 : vector<8x64xf32>
    %404 = arith.addf %402, %403 : vector<8x64xf32>
    %405 = math.tanh %404 : vector<8x64xf32>
    %406 = arith.mulf %401, %405 : vector<8x64xf32>
    %407 = vector.extract_strided_slice %406 {offsets = [0, 0], sizes = [8, 32], strides = [1, 1]} : vector<8x64xf32> to vector<8x32xf32>
    %c56_176 = arith.constant 56 : index
    %c0_177 = arith.constant 0 : index
    %408 = vector.load %arg13[%c56_176, %c0_177] : memref<64x32xf32, #tpu.memory_space<vmem>>, vector<8x32xf32>
    tpu.vector_store %arg13[%c56_176, %c0_177], %407 {strides = array<i32>} : memref<64x32xf32, #tpu.memory_space<vmem>>, vector<8x32xf32>,
    %409 = vector.extract_strided_slice %406 {offsets = [0, 32], sizes = [8, 32], strides = [1, 1]} : vector<8x64xf32> to vector<8x32xf32>
    %c0_178 = arith.constant 0 : index
    %c0_179 = arith.constant 0 : index
    %410 = vector.load %arg14[%c0_178, %c0_179] : memref<64x32xf32, #tpu.memory_space<vmem>>, vector<8x32xf32>
    tpu.vector_store %arg14[%c0_178, %c0_179], %409 {strides = array<i32>} : memref<64x32xf32, #tpu.memory_space<vmem>>, vector<8x32xf32>,
    %c0_180 = arith.constant 0 : index
    %c0_181 = arith.constant 0 : index
    %411 = vector.load %arg7[%c0_180, %c0_181] : memref<64x8xf32, #tpu.memory_space<vmem>>, vector<64x8xf32>
    %c0_182 = arith.constant 0 : index
    %c0_183 = arith.constant 0 : index
    %412 = vector.load %arg13[%c0_182, %c0_183] : memref<64x32xf32, #tpu.memory_space<vmem>>, vector<64x32xf32>
    %413 = vector.extract_strided_slice %411 {offsets = [0, 0], sizes = [32, 8], strides = [1, 1]} : vector<64x8xf32> to vector<32x8xf32>
    %cst_184 = arith.constant dense<0.000000e+00> : vector<64x8xf32>
    %414 = tpu.matmul %412, %413, %cst_184 {dimension_numbers = #tpu.dot_dimension_numbers<[1], [0], [0], [1], [0, 0, 1, 1], [], []>} : vector<64x32xf32>, vector<32x8xf32>, vector<64x8xf32> -> vector<64x8xf32>
    %c0_185 = arith.constant 0 : index
    %c0_186 = arith.constant 0 : index
    %415 = vector.load %arg14[%c0_185, %c0_186] : memref<64x32xf32, #tpu.memory_space<vmem>>, vector<64x32xf32>
    %416 = vector.extract_strided_slice %411 {offsets = [32, 0], sizes = [32, 8], strides = [1, 1]} : vector<64x8xf32> to vector<32x8xf32>
    %cst_187 = arith.constant dense<0.000000e+00> : vector<64x8xf32>
    %417 = tpu.matmul %415, %416, %cst_187 {dimension_numbers = #tpu.dot_dimension_numbers<[1], [0], [0], [1], [0, 0, 1, 1], [], []>} : vector<64x32xf32>, vector<32x8xf32>, vector<64x8xf32> -> vector<64x8xf32>
    %418 = arith.addf %414, %417 : vector<64x8xf32>
    %c0_188 = arith.constant 0 : index
    %c0_189 = arith.constant 0 : index
    %419 = vector.load %arg8[%c0_188, %c0_189] : memref<1x8xf32, #tpu.memory_space<vmem>>, vector<1x8xf32>
    %420 = vector.broadcast %419 : vector<1x8xf32> to vector<64x8xf32>
    %421 = arith.addf %418, %420 : vector<64x8xf32>
    %c0_190 = arith.constant 0 : index
    %c0_191 = arith.constant 0 : index
    %422 = vector.load %arg9[%c0_190, %c0_191] : memref<64x8xf32, #tpu.memory_space<vmem>>, vector<64x8xf32>
    tpu.vector_store %arg9[%c0_190, %c0_191], %421 {strides = array<i32>} : memref<64x8xf32, #tpu.memory_space<vmem>>, vector<64x8xf32>,
    return
  }
  func.func @transform_0(%arg0: i32) -> (i32, i32) {
    %c0_i32 = arith.constant 0 : i32
    %c0_i32_0 = arith.constant 0 : i32
    %c0_i32_1 = arith.constant 0 : i32
    return %c0_i32, %c0_i32_0 : i32, i32
  }
  func.func @transform_1(%arg0: i32) -> (i32, i32) {
    %c0_i32 = arith.constant 0 : i32
    %c0_i32_0 = arith.constant 0 : i32
    %c0_i32_1 = arith.constant 0 : i32
    return %c0_i32, %c0_i32_0 : i32, i32
  }
  func.func @transform_2(%arg0: i32) -> (i32, i32) {
    %c0_i32 = arith.constant 0 : i32
    %c0_i32_0 = arith.constant 0 : i32
    %c0_i32_1 = arith.constant 0 : i32
    return %c0_i32, %c0_i32_0 : i32, i32
  }
  func.func @transform_3(%arg0: i32) -> (i32, i32, i32) {
    %c0_i32 = arith.constant 0 : i32
    %c0_i32_0 = arith.constant 0 : i32
    %c0_i32_1 = arith.constant 0 : i32
    %c0_i32_2 = arith.constant 0 : i32
    return %c0_i32, %c0_i32_0, %c0_i32_1 : i32, i32, i32
  }
  func.func @transform_4(%arg0: i32) -> (i32, i32) {
    %c0_i32 = arith.constant 0 : i32
    %c0_i32_0 = arith.constant 0 : i32
    %c0_i32_1 = arith.constant 0 : i32
    return %c0_i32, %c0_i32_0 : i32, i32
  }
  func.func @transform_5(%arg0: i32) -> (i32, i32) {
    %c0_i32 = arith.constant 0 : i32
    %c0_i32_0 = arith.constant 0 : i32
    %c0_i32_1 = arith.constant 0 : i32
    return %c0_i32, %c0_i32_0 : i32, i32
  }
  func.func @transform_6(%arg0: i32) -> (i32, i32) {
    %c0_i32 = arith.constant 0 : i32
    %c0_i32_0 = arith.constant 0 : i32
    %c0_i32_1 = arith.constant 0 : i32
    return %c0_i32, %c0_i32_0 : i32, i32
  }
  func.func @transform_7(%arg0: i32) -> (i32, i32) {
    %c0_i32 = arith.constant 0 : i32
    %c0_i32_0 = arith.constant 0 : i32
    %c0_i32_1 = arith.constant 0 : i32
    return %c0_i32, %c0_i32_0 : i32, i32
  }
  func.func @transform_8(%arg0: i32) -> (i32, i32) {
    %c0_i32 = arith.constant 0 : i32
    %c0_i32_0 = arith.constant 0 : i32
    %c0_i32_1 = arith.constant 0 : i32
    return %c0_i32, %c0_i32_0 : i32, i32
  }
}

</mosaic_0001>

<bundles_post_ra>
// kernel: bidirectional_lstm_forward.1
= control target key start
LH: loop header
LB: loop body
LE: loop exit
PB: predicated region body
PF: predicated region fallthrough
CT: control target
= control target key end

     0   :  { %13 = vsyncpa [#allocation8], 0  ;;  %s4235_s0 = inlined_call_operand.vmem [shape: f32[64,16], index: 0, kind: input, shape index: {}]   ;;  %s4236_s1 = inlined_call_operand.vmem [shape: f32[16,512], index: 1, kind: input, shape index: {}]   ;;  %s4237_s2 = inlined_call_operand.vmem [shape: f32[1,512], index: 2, kind: input, shape index: {}]   ;;  %s4238_s3 = inlined_call_operand.hbm [shape: f32[2,64,256], index: 3, kind: input, shape index: {}]   ;;  %s4239_s4 = inlined_call_operand.hbm [shape: f32[64,512], index: 4, kind: input, shape index: {}]   ;;  %s4240_s5 = inlined_call_operand.vmem [shape: f32[1,512], index: 5, kind: input, shape index: {}]   ;;  %s4241_s6 = inlined_call_operand.vmem [shape: f32[64,8], index: 6, kind: input, shape index: {}]   ;;  %s4242_s7 = inlined_call_operand.vmem [shape: f32[1,8], index: 7, kind: input, shape index: {}]   ;;  %s4243_s8 = inlined_call_operand.vmem [shape: f32[64,8], index: 8, kind: output, shape index: {}]  }
   0x1   :  { %s25_s29 = sshll.u32 %s4238_s3, 4  ;;  %s26_s29 = int_to_ptr.hbm [resolvable:$true] %s25_s29 }
   0x2   :  { %14 = vsyncpa [#allocation10], 0  ;;  %s3162_s30 = smov [#allocation7]   ;;  %s38_s12 = sshll.u32 %s4239_s4, 4  ;;  %s39_s12 = int_to_ptr.hbm [resolvable:$true] %s38_s12 }
   0x3   :  { %s27_s9 = sshll.u32 %s3162_s30, 4  ;;  %s3163_s13 = smov 256   ;;  %s28_s9 = int_to_ptr.vmem [resolvable:$true] %s27_s9 }
   0x4   :  { %s3164_s14 = smov 16   ;;  %s3165_s15 = smov [#allocation9]  }
   0x5   :  { %33 = dma.hbm_to_vmem [thread:$0]  %s26_s29, 4096, %s28_s9, [#allocation8], %s3163_s13, %s3163_s13, %s3164_s14  }
   0x6   :  { %s40_s16 = sshll.u32 %s3165_s15, 4  ;;  %s3166_s17 = smov 512   ;;  %s41_s16 = int_to_ptr.vmem [resolvable:$true] %s40_s16 }
   0x7   :  { %s3167_s18 = smov 32  }
   0x8   :  { %46 = dma.hbm_to_vmem [thread:$0]  %s39_s12, 4096, %s41_s16, [#allocation10], %s3166_s17, %s3166_s17, %s3167_s18  }
   0x9   :  { %3158 = dma.done.wait [#allocation8], 4096  }
   0xa   :  { %3159 = vsyncadd [#allocation8], 4294963200 }
   0xb   :  { %3160 = dma.done.wait [#allocation10], 4096  }
   0xc   :  { %3161 = vsyncadd [#allocation10], 4294963200  ;;  %v73_v0 = vld [vmem:[%s4236_s1 + $0x20] sm:$0xff]  ;;  %v74_v1 = vld [vmem:[%s4236_s1 + $0x28] sm:$0xff]  ;;  %vm87_vm0 = vcmask 130048   ;;  %v3168_v31 = vmov 0.0  }
   0xd   :  { %v69_v2 = vld [vmem:[%s4236_s1] sm:$0xff]  ;;  %2905 = vmatpush.msra.mxu2 %v73_v0  ;;  %2907 = vmatpush.msra.mxu3 %v74_v1  ;;  %v70_v3 = vld [vmem:[%s4236_s1 + $0x8] sm:$0xff]  ;;  %v75_v5 = vld [vmem:[%s4236_s1 + $0x30] sm:$0xff]  ;;  %vm428_vm9 = vcmask 261120   ;;  %vm330_vm10 = vcmask 523264  }
   0xe   :  { %v3237_v4 = vld [vmem:[%s4235_s0 + $0x20] sm:$0xff]  ;;  %126 = vmatpush.msra.mxu0 %v73_v0  ;;  %167 = vmatpush.msra.mxu1 %v74_v1  ;;  %v76_v6 = vld [vmem:[%s4236_s1 + $0x38] sm:$0xff]  ;;  %v71_v7 = vld [vmem:[%s4236_s1 + $0x10] sm:$0xff] }
   0xf   :  { %2906 = vmatpush.msra.mxu2 %v69_v2  ;;  %2908 = vmatpush.msra.mxu3 %v70_v3  ;;  %v72_v8 = vld [vmem:[%s4236_s1 + $0x18] sm:$0xff]  ;;  %v61_v9 = vld [vmem:[%s4235_s0] sm:$0xff]  ;;  %v3263_v10 = vld [vmem:[%s4235_s0 + $0x28] sm:$0xff] }
  0x10   :  { %2737 = vmatmul.msk.f32.vlgmr.msra.gmra.mxu2 %vm87_vm0, %v3237_v4  ;;  %2745 = vmatmul.msk.f32.vlgmr.msra.gmra.mxu3 %vm87_vm0, %v3237_v4  ;;  %v62_v11 = vld [vmem:[%s4235_s0 + $0x8] sm:$0xff]  ;;  %v3277_v12 = vld [vmem:[%s4235_s0 + $0x30] sm:$0xff]  ;;  %v3291_v14 = vld [vmem:[%s4235_s0 + $0x38] sm:$0xff] }
  0x11   :  { %208 = vmatpush.msrb.mxu2 %v75_v5  ;;  %249 = vmatpush.msrb.mxu3 %v76_v6  ;;  %v63_v13 = vld [vmem:[%s4235_s0 + $0x10] sm:$0xff]  ;;  %v64_v15 = vld [vmem:[%s4235_s0 + $0x18] sm:$0xff]  ;;  %v3306_v17 = vld [vmem:[#allocation7 + $0x60] sm:$0xff] }
  0x12   :  { %127 = vmatpush.msra.mxu0 %v69_v2  ;;  %168 = vmatpush.msra.mxu1 %v70_v3  ;;  %v3304_v16 = vld [vmem:[#allocation7 + $0x70] sm:$0xff]  ;;  %v3316_v19 = vld [vmem:[#allocation7 + $0x40] sm:$0xff]  ;;  %v3326_v21 = vld [vmem:[#allocation7 + $0x78] sm:$0xff] }
  0x13   :  { %209 = vmatpush.msrb.mxu2 %v71_v7  ;;  %250 = vmatpush.msrb.mxu3 %v72_v8  ;;  %v3314_v18 = vld [vmem:[#allocation7 + $0x50] sm:$0xff]  ;;  %v3328_v22 = vld [vmem:[#allocation7 + $0x68] sm:$0xff]  ;;  %v3332_v23 = vld [vmem:[#allocation7 + $0x20] sm:$0xff] }
  0x14   :  { %2733 = vmatmul.msk.f32.vlgmr.msra.gmra.mxu0 %vm87_vm0, %v61_v9  ;;  %2741 = vmatmul.msk.f32.vlgmr.msra.gmra.mxu1 %vm87_vm0, %v61_v9  ;;  %v3324_v20 = vld [vmem:[#allocation7 + $0x30] sm:$0xff]  ;;  %v3334_v24 = vld [vmem:[#allocation7 + $0x58] sm:$0xff]  ;;  %v3346_v25 = vld [vmem:[#allocation7 + $0x48] sm:$0xff] }
  0x15   :  { %342 = vmatpush.msrb.mxu0 %v3304_v16  ;;  %450 = vmatpush.msra.mxu2 %v3304_v16  ;;  %v3348_v26 = vld [vmem:[#allocation7 + $0x10] sm:$0xff]  ;;  %v3350_v27 = vld [vmem:[#allocation7 + $0x38] sm:$0xff]  ;;  %v3354_v28 = vld [vmem:[#allocation7] sm:$0xff] }
  0x16   :  { %362 = vmatpush.msrb.mxu1 %v3326_v21  ;;  %470 = vmatpush.msra.mxu3 %v3326_v21  ;;  %v3356_v29 = vld [vmem:[#allocation7 + $0x28] sm:$0xff]  ;;  %v3362_v30 = vld [vmem:[#allocation7 + $0x18] sm:$0xff]  ;;  %v77_v41 = vld [vmem:[%s4237_s2] sm:$0xf]  ;;  %s3169_s2 = smov 64  }
  0x17   :  { %343 = vmatpush.msrb.mxu0 %v3306_v17  ;;  %451 = vmatpush.msra.mxu2 %v3306_v17  ;;  %v3368_v32 = vld [vmem:[#allocation7 + $0x8] sm:$0xff]  ;;  %v3443_v42 = vperm.slane %v77_v41, 1  ;;  %v3445_v43 = vperm.slane %v77_v41, 2  ;;  %v3451_v46 = vperm.slane %v77_v41, 0  ;;  %v3454_v48 = vperm.slane %v77_v41, 3 }
  0x18   :  { %2738 = vmatmul.msk.f32.gmra.mxu2 %vm87_vm0, %v3263_v10  ;;  %2746 = vmatmul.msk.f32.gmra.mxu3 %vm87_vm0, %v3263_v10 }
  0x19   :  { %344 = vmatpush.msrb.mxu0 %v3314_v18  ;;  %452 = vmatpush.msra.mxu2 %v3314_v18 }
  0x1a   :  { %363 = vmatpush.msrb.mxu1 %v3328_v22  ;;  %471 = vmatpush.msra.mxu3 %v3328_v22 }
  0x1b   :  { %345 = vmatpush.msrb.mxu0 %v3316_v19  ;;  %453 = vmatpush.msra.mxu2 %v3316_v19 }
  0x1c   :  { %2734 = vmatmul.msk.f32.gmra.mxu0 %vm87_vm0, %v62_v11  ;;  %2742 = vmatmul.msk.f32.gmra.mxu1 %vm87_vm0, %v62_v11 }
  0x1d   :  { %346 = vmatpush.msrb.mxu0 %v3324_v20  ;;  %454 = vmatpush.msra.mxu2 %v3324_v20 }
  0x1e   :  { %364 = vmatpush.msrb.mxu1 %v3334_v24  ;;  %472 = vmatpush.msra.mxu3 %v3334_v24 }
  0x1f   :  { %347 = vmatpush.msrb.mxu0 %v3332_v23  ;;  %455 = vmatpush.msra.mxu2 %v3332_v23 }
  0x20   :  { %2739 = vmatmul.msk.f32.gmra.mxu2 %vm87_vm0, %v3277_v12  ;;  %2747 = vmatmul.msk.f32.gmra.mxu3 %vm87_vm0, %v3277_v12 }
  0x21   :  { %365 = vmatpush.msrb.mxu1 %v3346_v25  ;;  %348 = vmatpush.msrb.mxu0 %v3348_v26 }
  0x22   :  { %473 = vmatpush.msra.mxu3 %v3346_v25  ;;  %456 = vmatpush.msra.mxu2 %v3348_v26 }
  0x23   :  { %366 = vmatpush.msrb.mxu1 %v3350_v27  ;;  %349 = vmatpush.msrb.mxu0 %v3354_v28 }
  0x24   :  { %2735 = vmatmul.msk.f32.gmra.mxu0 %vm87_vm0, %v63_v13  ;;  %2743 = vmatmul.msk.f32.gmra.mxu1 %vm87_vm0, %v63_v13 }
  0x25   :  { %474 = vmatpush.msra.mxu3 %v3350_v27  ;;  %367 = vmatpush.msrb.mxu1 %v3356_v29 }
  0x26   :  { %457 = vmatpush.msra.mxu2 %v3354_v28  ;;  %557 = vmatpush.msra.mxu0 %v3304_v16 }
  0x27   :  { %475 = vmatpush.msra.mxu3 %v3356_v29  ;;  %368 = vmatpush.msrb.mxu1 %v3362_v30 }
  0x28   :  { %2740 = vmatmul.msk.f32.gmra.mxu2 %vm87_vm0, %v3291_v14  ;;  %2748 = vmatmul.msk.f32.gmra.mxu3 %vm87_vm0, %v3291_v14 }
  0x29   :  { %369 = vmatpush.msrb.mxu1 %v3368_v32  ;;  %476 = vmatpush.msra.mxu3 %v3362_v30 }
  0x2a   :  { %558 = vmatpush.msra.mxu0 %v3306_v17 }
  0x2b   :  { %477 = vmatpush.msra.mxu3 %v3368_v32  ;;  %577 = vmatpush.msra.mxu1 %v3326_v21 }
  0x2c   :  { %2736 = vmatmul.msk.f32.gmra.mxu0 %vm87_vm0, %v64_v15  ;;  %2744 = vmatmul.msk.f32.gmra.mxu1 %vm87_vm0, %v64_v15 }
  0x2d   :  { %559 = vmatpush.msra.mxu0 %v3314_v18  ;;  %578 = vmatpush.msra.mxu1 %v3328_v22 }
  0x2f   :  { %560 = vmatpush.msra.mxu0 %v3316_v19  ;;  %579 = vmatpush.msra.mxu1 %v3334_v24 }
  0x30   :  { %2749 = vmatmul.msk.f32.vlgmr.msrb.gmra.mxu2 %vm87_vm0, %v61_v9  ;;  %2757 = vmatmul.msk.f32.vlgmr.msrb.gmra.mxu3 %vm87_vm0, %v61_v9 }
  0x31   :  { %664 = vmatpush.msrb.mxu2 %v3304_v16  ;;  %684 = vmatpush.msrb.mxu3 %v3326_v21 }
  0x32   :  { %580 = vmatpush.msra.mxu1 %v3346_v25  ;;  %561 = vmatpush.msra.mxu0 %v3324_v20 }
  0x33   :  { %665 = vmatpush.msrb.mxu2 %v3306_v17  ;;  %685 = vmatpush.msrb.mxu3 %v3328_v22 }
  0x34   :  { %350 = vmatmul.f32.vlgmr.msrb.gmra.mxu0 %v3168_v31  ;;  %370 = vmatmul.f32.vlgmr.msrb.gmra.mxu1 %v3168_v31 }
  0x35   :  { %666 = vmatpush.msrb.mxu2 %v3314_v18  ;;  %686 = vmatpush.msrb.mxu3 %v3334_v24 }
  0x36   :  { %581 = vmatpush.msra.mxu1 %v3350_v27  ;;  %562 = vmatpush.msra.mxu0 %v3332_v23 }
  0x37   :  { %667 = vmatpush.msrb.mxu2 %v3316_v19  ;;  %687 = vmatpush.msrb.mxu3 %v3346_v25 }
  0x38   :  { %2750 = vmatmul.msk.f32.gmra.mxu2 %vm87_vm0, %v62_v11  ;;  %2758 = vmatmul.msk.f32.gmra.mxu3 %vm87_vm0, %v62_v11 }
  0x39   :  { %668 = vmatpush.msrb.mxu2 %v3324_v20  ;;  %582 = vmatpush.msra.mxu1 %v3356_v29 }
  0x3a   :  { %563 = vmatpush.msra.mxu0 %v3348_v26  ;;  %688 = vmatpush.msrb.mxu3 %v3350_v27 }
  0x3b   :  { %669 = vmatpush.msrb.mxu2 %v3332_v23  ;;  %583 = vmatpush.msra.mxu1 %v3362_v30 }
  0x3c   :  { %564 = vmatpush.msra.mxu0 %v3354_v28  ;;  %689 = vmatpush.msrb.mxu3 %v3356_v29 }
  0x3d   :  { %584 = vmatpush.msra.mxu1 %v3368_v32  ;;  %670 = vmatpush.msrb.mxu2 %v3348_v26 }
  0x3e   :  { %771 = vmatpush.msrb.mxu0 %v3304_v16  ;;  %690 = vmatpush.msrb.mxu3 %v3362_v30 }
  0x3f   :  { %791 = vmatpush.msrb.mxu1 %v3326_v21  ;;  %671 = vmatpush.msrb.mxu2 %v3354_v28 }
  0x40   :  { %2751 = vmatmul.msk.f32.gmra.mxu2 %vm87_vm0, %v63_v13  ;;  %2759 = vmatmul.msk.f32.gmra.mxu3 %vm87_vm0, %v63_v13 }
  0x41   :  { %772 = vmatpush.msrb.mxu0 %v3306_v17  ;;  %691 = vmatpush.msrb.mxu3 %v3368_v32 }
  0x42   :  { %792 = vmatpush.msrb.mxu1 %v3328_v22 }
  0x43   :  { %773 = vmatpush.msrb.mxu0 %v3314_v18 }
  0x44   :  { %793 = vmatpush.msrb.mxu1 %v3334_v24 }
  0x45   :  { %774 = vmatpush.msrb.mxu0 %v3316_v19 }
  0x46   :  { %794 = vmatpush.msrb.mxu1 %v3346_v25 }
  0x47   :  { %775 = vmatpush.msrb.mxu0 %v3324_v20 }
  0x48   :  { %2752 = vmatmul.msk.f32.gmra.mxu2 %vm87_vm0, %v64_v15  ;;  %2760 = vmatmul.msk.f32.gmra.mxu3 %vm87_vm0, %v64_v15 }
  0x49   :  { %795 = vmatpush.msrb.mxu1 %v3350_v27  ;;  %776 = vmatpush.msrb.mxu0 %v3332_v23 }
  0x4b   :  { %796 = vmatpush.msrb.mxu1 %v3356_v29  ;;  %777 = vmatpush.msrb.mxu0 %v3348_v26 }
  0x4d   :  { %797 = vmatpush.msrb.mxu1 %v3362_v30  ;;  %778 = vmatpush.msrb.mxu0 %v3354_v28 }
  0x4f   :  { %798 = vmatpush.msrb.mxu1 %v3368_v32 }
  0x50   :  { %2753 = vmatmul.msk.f32.gmra.mxu2 %vm87_vm0, %v3237_v4  ;;  %2761 = vmatmul.msk.f32.gmra.mxu3 %vm87_vm0, %v3237_v4 }
  0x58   :  { %2754 = vmatmul.msk.f32.gmra.mxu2 %vm87_vm0, %v3263_v10  ;;  %2762 = vmatmul.msk.f32.gmra.mxu3 %vm87_vm0, %v3263_v10 }
  0x60   :  { %2755 = vmatmul.msk.f32.gmra.mxu2 %vm87_vm0, %v3277_v12  ;;  %2763 = vmatmul.msk.f32.gmra.mxu3 %vm87_vm0, %v3277_v12 }
  0x68   :  { %2756 = vmatmul.msk.f32.gmra.mxu2 %vm87_vm0, %v3291_v14  ;;  %2764 = vmatmul.msk.f32.gmra.mxu3 %vm87_vm0, %v3291_v14 }
  0x91   :  { %v3447_v44 = vpop.f32.mrf.mxu0  ;;  %v3449_v45 = vpop.f32.mrf.mxu1 }
  0x93   :  { %v141_v33 = vpop.f32.mrf.mxu2  ;;  %v182_v34 = vpop.f32.mrf.mxu3 }
  0x94   :  { %v142_v14 = vadd.f32 %v141_v33, %v3451_v46  ;;  %v183_v15 = vadd.f32 %v182_v34, %v3443_v42 }
  0x99   :  { %v132_v56 = vpop.f32.mrf.mxu0  ;;  %v173_v57 = vpop.f32.mrf.mxu1 }
  0x9b   :  { %v144_v35 = vpop.f32.mrf.mxu2  ;;  %v185_v36 = vpop.f32.mrf.mxu3 }
  0x9c   :  { %v145_v4 = vadd.f32 %v144_v35, %v3451_v46  ;;  %v186_v5 = vadd.f32 %v185_v36, %v3443_v42 }
  0xa1   :  { %v135_v8 = vpop.f32.mrf.mxu0  ;;  %v176_v9 = vpop.f32.mrf.mxu1 }
  0xa3   :  { %v147_v37 = vpop.f32.mrf.mxu2  ;;  %v188_v38 = vpop.f32.mrf.mxu3 }
  0xa4   :  { %v148_v60 = vadd.f32 %v147_v37, %v3451_v46  ;;  %v189_v61 = vadd.f32 %v188_v38, %v3443_v42 }
  0xab   :  { %v150_v39 = vpop.f32.mrf.mxu2  ;;  %v191_v40 = vpop.f32.mrf.mxu3 }
  0xac   :  { %v192_v47 = vadd.f32 %v191_v40, %v3443_v42  ;;  %v151_v51 = vadd.f32 %v150_v39, %v3451_v46  ;;  %v138_v39 = vpop.f32.mrf.mxu0  ;;  %v179_v40 = vpop.f32.mrf.mxu1 }
  0xad   :  { %v139_v41 = vadd.f32 %v138_v39, %v3451_v46 }
  0xb3   :  { %v211_v49 = vpop.f32.mrf.mxu2  ;;  %v252_v50 = vpop.f32.mrf.mxu3 }
  0xb4   :  { %v212_v52 = vadd.f32 %v211_v49, %v3445_v43  ;;  %v253_v53 = vadd.f32 %v252_v50, %v3454_v48 }
  0xb6   :  { %v3459_v54 = vadd.f32 %v212_v52, %v151_v51  ;;  %v3461_v55 = vadd.f32 %v253_v53, %v192_v47  ;;  %v180_v47 = vadd.f32 %v179_v40, %v3443_v42  ;;  %v136_v53 = vadd.f32 %v135_v8, %v3451_v46 }
  0xbb   :  { %v214_v58 = vpop.f32.mrf.mxu2  ;;  %v255_v59 = vpop.f32.mrf.mxu3 }
  0xbc   :  { %v215_v62 = vadd.f32 %v214_v58, %v3445_v43  ;;  %v256_v63 = vadd.f32 %v255_v59, %v3454_v48  ;;  %v177_v58 = vadd.f32 %v176_v9, %v3443_v42 }
  0xbe   :  { %v3467_v0 = vadd.f32 %v215_v62, %v148_v60  ;;  %v3469_v1 = vadd.f32 %v256_v63, %v189_v61 }
  0xc3   :  { %v217_v2 = vpop.f32.mrf.mxu2  ;;  %v258_v3 = vpop.f32.mrf.mxu3 }
  0xc4   :  { %v218_v6 = vadd.f32 %v217_v2, %v3445_v43  ;;  %v259_v7 = vadd.f32 %v258_v3, %v3454_v48  ;;  %v174_v3 = vadd.f32 %v173_v57, %v3443_v42 }
  0xc6   :  { %v3475_v10 = vadd.f32 %v218_v6, %v145_v4  ;;  %v3477_v11 = vadd.f32 %v259_v7, %v186_v5  ;;  %v133_v6 = vadd.f32 %v132_v56, %v3451_v46 }
  0xcb   :  { %v220_v12 = vpop.f32.mrf.mxu2  ;;  %v261_v13 = vpop.f32.mrf.mxu3 }
  0xcc   :  { %v221_v35 = vadd.f32 %v220_v12, %v3445_v43  ;;  %v262_v36 = vadd.f32 %v261_v13, %v3454_v48 }
  0xce   :  { %v3483_v37 = vadd.f32 %v221_v35, %v142_v14  ;;  %v3485_v38 = vadd.f32 %v262_v36, %v183_v15  ;;  %v130_v14 = vadd.f32 %v3447_v44, %v3451_v46  ;;  %v351_v35 = vpop.f32.mrf.mxu0 }
  0xd3   :  { %v223_v49 = vpop.f32.mrf.mxu2  ;;  %v264_v50 = vpop.f32.mrf.mxu3 }
  0xd4   :  { %v224_v33 = vadd.f32 %v223_v49, %v3445_v43  ;;  %v265_v34 = vadd.f32 %v264_v50, %v3454_v48  ;;  %v171_v49 = vadd.f32 %v3449_v45, %v3443_v42 }
  0xd6   :  { %v3491_v51 = vadd.f32 %v224_v33, %v139_v41  ;;  %v3493_v52 = vadd.f32 %v265_v34, %v180_v47  ;;  %v371_v33 = vpop.f32.mrf.mxu1 }
  0xdb   :  { %v226_v59 = vpop.f32.mrf.mxu2  ;;  %v267_v60 = vpop.f32.mrf.mxu3 }
  0xdc   :  { %v227_v61 = vadd.f32 %v226_v59, %v3445_v43  ;;  %v268_v62 = vadd.f32 %v267_v60, %v3454_v48 }
  0xde   :  { %v3499_v63 = vadd.f32 %v227_v61, %v136_v53  ;;  %v3501_v2 = vadd.f32 %v268_v62, %v177_v58 }
  0xe3   :  { %v229_v4 = vpop.f32.mrf.mxu2  ;;  %v270_v5 = vpop.f32.mrf.mxu3 }
  0xe4   :  { %v230_v7 = vadd.f32 %v229_v4, %v3445_v43  ;;  %v271_v8 = vadd.f32 %v270_v5, %v3454_v48 }
  0xe6   :  { %v3507_v9 = vadd.f32 %v230_v7, %v133_v6  ;;  %v3509_v12 = vadd.f32 %v271_v8, %v174_v3 }
  0xeb   :  { %v232_v13 = vpop.f32.mrf.mxu2  ;;  %v273_v56 = vpop.f32.mrf.mxu3 }
  0xec   :  { %v233_v15 = vadd.f32 %v232_v13, %v3445_v43  ;;  %v274_v41 = vadd.f32 %v273_v56, %v3454_v48 }
  0xee   :  { %v328_v57 = vadd.f32 %v233_v15, %v130_v14  ;;  %v329_v50 = vadd.f32 %v274_v41, %v171_v49 }
  0xf0   :  { %v374_v36 = vadd.f32 %v351_v35, %v328_v57  ;;  %v375_v44 = vadd.f32 %v371_v33, %v329_v50 }
  0xf2   :  { %v2765_v39 = vmul.f32 -1.442695, %v374_v36  ;;  %v2766_v3 = vmul.f32 -1.442695, %v375_v44 }
  0xf4   :  { %2918 = vpow2.f32 %v2765_v39 }
  0xfa   :  { %v2919_v40 = vpop.eup %2918 }
  0xfb   :  { %v382_v47 = vadd.f32 1.0, %v2919_v40 }
  0xfd   :  { %2920 = vrcp.f32 %v382_v47  ;;  %v395_v53 = vand.u32 2147483648, %v382_v47  ;;  %v393_v59 = vand.u32 2147483647, %v382_v47  ;;  %vm389_vm2 = vweird.f32 %v382_v47 }
  0xfe   :  { %2922 = vtanh.f32 %v375_v44 }
  0xff   :  { %v396_v48 = vor.u32 1.1754944e-38, %v395_v53  ;;  %vm394_vm4 = vcmp.eq.f32.partialorder %v393_v59, 8.507059e+37  ;;  %2924 = vpow2.f32 %v2766_v3 }
 0x103   :  { %v2921_v34 = vpop.eup %2920 }
 0x104   :  { %v385_v46 = vmul.f32 %v2921_v34, %v382_v47  ;;  %vm390_vm1 = vweird.f32 %v2921_v34  ;;  %v2923_v62 = vpop.eup %2922 }
 0x105   :  { %vm391_vm3 = vmor %vm389_vm2, %vm390_vm1  ;;  %v2925_v4 = vpop.eup %2924 }
 0x106   :  { %v386_v43 = vsub.f32 1.0, %v385_v46  ;;  %v383_v5 = vadd.f32 1.0, %v2925_v4 }
 0x108   :  { %v387_v58 = vmul.f32 %v2921_v34, %v386_v43  ;;  %2926 = vrcp.f32 %v383_v5  ;;  %v410_v36 = vand.u32 2147483648, %v383_v5  ;;  %vm404_vm6 = vweird.f32 %v383_v5 }
 0x109   :  { %v408_v39 = vand.u32 2147483647, %v383_v5 }
 0x10a   :  { %v388_v60 = vadd.f32 %v2921_v34, %v387_v58  ;;  %v411_v40 = vor.u32 1.1754944e-38, %v410_v36 }
 0x10b   :  { %vm409_vm8 = vcmp.eq.f32.partialorder %v408_v39, 8.507059e+37 }
 0x10c   :  { %v392_v61 = vsel %vm391_vm3, %v2921_v34, %v388_v60 }
 0x10d   :  { %v397_v42 = vsel %vm394_vm4, %v396_v48, %v392_v61 }
 0x10e   :  { %v416_v45 = vmul.f32 %v2923_v62, %v397_v42  ;;  %v2927_v6 = vpop.eup %2926  ;;  %v415_v14 = vmul.f32 0.0, %v397_v42 }
 0x10f   :  { %v400_v7 = vmul.f32 %v2927_v6, %v383_v5  ;;  %vm405_vm5 = vweird.f32 %v2927_v6 }
 0x110   :  { %418 = vrot.lane.b32.xlu0 %v416_v45, %s3169_s2  ;;  %vm406_vm7 = vmor %vm404_vm6, %vm405_vm5 }
 0x111   :  { %v401_v8 = vsub.f32 1.0, %v400_v7 }
 0x113   :  { %v402_v13 = vmul.f32 %v2927_v6, %v401_v8 }
 0x115   :  { %v403_v57 = vadd.f32 %v2927_v6, %v402_v13 }
 0x117   :  { %v407_v56 = vsel %vm406_vm7, %v2927_v6, %v403_v57 }
 0x118   :  { %v412_v47 = vsel %vm409_vm8, %v411_v40, %v407_v56 }
 0x182   :  { %v419_v15 = vpop.permute.xlu0 %418 }
 0x183   :  { %v3518_v35 = vadd.f32 %v419_v15, %v415_v14 }
 0x185   :  { %2928 = vtanh.f32 %v3518_v35 }
 0x18b   :  { %v2929_v41 = vpop.eup %2928 }
 0x18c   :  { %v3521_v49 = vmul.f32 %v2929_v41, %v412_v47 }
 0x18e   :  { %425 = vrot.lane.b32.xlu0 %v3521_v49, %s3169_s2 }
 0x200   :  { %v426_v50 = vpop.permute.xlu0 %425 }
 0x201   :  { %429 = vst.msk [vmem:[#allocation3] sm:$0xff] %vm428_vm9, %v426_v50  ;;  %2767 = vmatmul.msk.f32.vlgmr.msra.gmra.mxu2 %vm330_vm10, %v426_v50  ;;  %2768 = vmatmul.msk.f32.vlgmr.msra.gmra.mxu3 %vm330_vm10, %v426_v50 }
 0x202   :  { %878 = vmatpush.msra.mxu2 %v3304_v16  ;;  %898 = vmatpush.msra.mxu3 %v3326_v21 }
 0x204   :  { %879 = vmatpush.msra.mxu2 %v3306_v17  ;;  %899 = vmatpush.msra.mxu3 %v3328_v22 }
 0x206   :  { %880 = vmatpush.msra.mxu2 %v3314_v18  ;;  %900 = vmatpush.msra.mxu3 %v3334_v24 }
 0x208   :  { %881 = vmatpush.msra.mxu2 %v3316_v19  ;;  %901 = vmatpush.msra.mxu3 %v3346_v25 }
 0x20a   :  { %882 = vmatpush.msra.mxu2 %v3324_v20  ;;  %902 = vmatpush.msra.mxu3 %v3350_v27 }
 0x20c   :  { %883 = vmatpush.msra.mxu2 %v3332_v23  ;;  %903 = vmatpush.msra.mxu3 %v3356_v29 }
 0x20e   :  { %884 = vmatpush.msra.mxu2 %v3348_v26  ;;  %904 = vmatpush.msra.mxu3 %v3362_v30 }
 0x210   :  { %885 = vmatpush.msra.mxu2 %v3354_v28  ;;  %905 = vmatpush.msra.mxu3 %v3368_v32 }
 0x284   :  { %v459_v33 = vpop.f32.mrf.mxu2  ;;  %v479_v53 = vpop.f32.mrf.mxu3 }
 0x285   :  { %v482_v34 = vadd.f32 %v459_v33, %v3507_v9  ;;  %v483_v59 = vadd.f32 %v479_v53, %v3509_v12 }
 0x287   :  { %v2769_v44 = vmul.f32 -1.442695, %v482_v34  ;;  %v2770_v7 = vmul.f32 -1.442695, %v483_v59 }
 0x289   :  { %2930 = vpow2.f32 %v2769_v44 }
 0x28f   :  { %v2931_v46 = vpop.eup %2930 }
 0x290   :  { %v490_v43 = vadd.f32 1.0, %v2931_v46 }
 0x292   :  { %2932 = vrcp.f32 %v490_v43  ;;  %v503_v61 = vand.u32 2147483648, %v490_v43  ;;  %v501_v42 = vand.u32 2147483647, %v490_v43  ;;  %vm497_vm12 = vweird.f32 %v490_v43 }
 0x293   :  { %2934 = vtanh.f32 %v483_v59 }
 0x294   :  { %v504_v9 = vor.u32 1.1754944e-38, %v503_v61  ;;  %vm502_vm14 = vcmp.eq.f32.partialorder %v501_v42, 8.507059e+37  ;;  %2936 = vpow2.f32 %v2770_v7 }
 0x298   :  { %v2933_v58 = vpop.eup %2932 }
 0x299   :  { %v493_v60 = vmul.f32 %v2933_v58, %v490_v43  ;;  %vm498_vm11 = vweird.f32 %v2933_v58  ;;  %v2935_v4 = vpop.eup %2934 }
 0x29a   :  { %vm499_vm13 = vmor %vm497_vm12, %vm498_vm11  ;;  %v2937_v12 = vpop.eup %2936 }
 0x29b   :  { %v494_v48 = vsub.f32 1.0, %v493_v60  ;;  %v491_v8 = vadd.f32 1.0, %v2937_v12 }
 0x29d   :  { %v495_v62 = vmul.f32 %v2933_v58, %v494_v48  ;;  %2938 = vrcp.f32 %v491_v8  ;;  %v518_v41 = vand.u32 2147483648, %v491_v8  ;;  %vm512_vm0 = vweird.f32 %v491_v8 }
 0x29e   :  { %v516_v47 = vand.u32 2147483647, %v491_v8 }
 0x29f   :  { %v496_v45 = vadd.f32 %v2933_v58, %v495_v62  ;;  %v519_v33 = vor.u32 1.1754944e-38, %v518_v41 }
 0x2a0   :  { %vm517_vm2 = vcmp.eq.f32.partialorder %v516_v47, 8.507059e+37 }
 0x2a1   :  { %v500_v3 = vsel %vm499_vm13, %v2933_v58, %v496_v45 }
 0x2a2   :  { %v505_v5 = vsel %vm502_vm14, %v504_v9, %v500_v3 }
 0x2a3   :  { %v524_v6 = vmul.f32 %v2935_v4, %v505_v5  ;;  %v2939_v13 = vpop.eup %2938  ;;  %v523_v36 = vmul.f32 %v505_v5, %v3518_v35 }
 0x2a4   :  { %v508_v14 = vmul.f32 %v2939_v13, %v491_v8  ;;  %vm513_vm15 = vweird.f32 %v2939_v13 }
 0x2a5   :  { %526 = vrot.lane.b32.xlu1 %v524_v6, %s3169_s2  ;;  %vm514_vm1 = vmor %vm512_vm0, %vm513_vm15 }
 0x2a6   :  { %v509_v15 = vsub.f32 1.0, %v508_v14 }
 0x2a8   :  { %v510_v57 = vmul.f32 %v2939_v13, %v509_v15 }
 0x2aa   :  { %v511_v40 = vadd.f32 %v2939_v13, %v510_v57 }
 0x2ac   :  { %v515_v50 = vsel %vm514_vm1, %v2939_v13, %v511_v40 }
 0x2ad   :  { %v520_v44 = vsel %vm517_vm2, %v519_v33, %v515_v50 }
 0x317   :  { %v527_v39 = vpop.permute.xlu1 %526 }
 0x318   :  { %v3548_v56 = vadd.f32 %v527_v39, %v523_v36 }
 0x31a   :  { %2940 = vtanh.f32 %v3548_v56 }
 0x320   :  { %v2941_v34 = vpop.eup %2940 }
 0x321   :  { %v3551_v46 = vmul.f32 %v2941_v34, %v520_v44 }
 0x323   :  { %533 = vrot.lane.b32.xlu1 %v3551_v46, %s3169_s2 }
 0x395   :  { %v534_v35 = vpop.permute.xlu1 %533 }
 0x396   :  { %536 = vst.msk [vmem:[#allocation3 + $0x8] sm:$0xff] %vm428_vm9, %v534_v35  ;;  %2771 = vmatmul.msk.f32.vlgmr.msra.gmra.mxu0 %vm330_vm10, %v534_v35  ;;  %2772 = vmatmul.msk.f32.vlgmr.msra.gmra.mxu1 %vm330_vm10, %v534_v35 }
 0x397   :  { %985 = vmatpush.msra.mxu0 %v3304_v16  ;;  %1005 = vmatpush.msra.mxu1 %v3326_v21 }
 0x399   :  { %986 = vmatpush.msra.mxu0 %v3306_v17  ;;  %1006 = vmatpush.msra.mxu1 %v3328_v22 }
 0x39b   :  { %987 = vmatpush.msra.mxu0 %v3314_v18  ;;  %1007 = vmatpush.msra.mxu1 %v3334_v24 }
 0x39d   :  { %988 = vmatpush.msra.mxu0 %v3316_v19  ;;  %1008 = vmatpush.msra.mxu1 %v3346_v25 }
 0x39f   :  { %989 = vmatpush.msra.mxu0 %v3324_v20  ;;  %1009 = vmatpush.msra.mxu1 %v3350_v27 }
 0x3a1   :  { %990 = vmatpush.msra.mxu0 %v3332_v23  ;;  %1010 = vmatpush.msra.mxu1 %v3356_v29 }
 0x3a3   :  { %991 = vmatpush.msra.mxu0 %v3348_v26  ;;  %1011 = vmatpush.msra.mxu1 %v3362_v30 }
 0x3a5   :  { %992 = vmatpush.msra.mxu0 %v3354_v28  ;;  %1012 = vmatpush.msra.mxu1 %v3368_v32 }
 0x413   :  { %v566_v43 = vpop.f32.mrf.mxu0  ;;  %v586_v48 = vpop.f32.mrf.mxu1 }
 0x414   :  { %v589_v53 = vadd.f32 %v566_v43, %v3499_v63  ;;  %v590_v62 = vadd.f32 %v586_v48, %v3501_v2 }
 0x416   :  { %v2773_v58 = vmul.f32 -1.442695, %v589_v53  ;;  %v2774_v13 = vmul.f32 -1.442695, %v590_v62 }
 0x418   :  { %2942 = vpow2.f32 %v2773_v58 }
 0x41e   :  { %v2943_v59 = vpop.eup %2942 }
 0x41f   :  { %v597_v60 = vadd.f32 1.0, %v2943_v59 }
 0x421   :  { %2944 = vrcp.f32 %v597_v60  ;;  %v610_v9 = vand.u32 2147483648, %v597_v60  ;;  %v608_v4 = vand.u32 2147483647, %v597_v60  ;;  %vm604_vm4 = vweird.f32 %v597_v60 }
 0x422   :  { %2946 = vtanh.f32 %v590_v62 }
 0x423   :  { %v611_v63 = vor.u32 1.1754944e-38, %v610_v9  ;;  %vm609_vm6 = vcmp.eq.f32.partialorder %v608_v4, 8.507059e+37  ;;  %2948 = vpow2.f32 %v2774_v13 }
 0x427   :  { %v2945_v61 = vpop.eup %2944 }
 0x428   :  { %v600_v42 = vmul.f32 %v2945_v61, %v597_v60  ;;  %vm605_vm3 = vweird.f32 %v2945_v61  ;;  %v2947_v7 = vpop.eup %2946 }
 0x429   :  { %vm606_vm5 = vmor %vm604_vm4, %vm605_vm3  ;;  %v2949_v2 = vpop.eup %2948 }
 0x42a   :  { %v601_v45 = vsub.f32 1.0, %v600_v42  ;;  %v598_v14 = vadd.f32 1.0, %v2949_v2 }
 0x42c   :  { %v602_v3 = vmul.f32 %v2945_v61, %v601_v45  ;;  %2950 = vrcp.f32 %v598_v14  ;;  %v625_v33 = vand.u32 2147483648, %v598_v14  ;;  %vm619_vm8 = vweird.f32 %v598_v14 }
 0x42d   :  { %v623_v34 = vand.u32 2147483647, %v598_v14 }
 0x42e   :  { %v603_v5 = vadd.f32 %v2945_v61, %v602_v3  ;;  %v626_v35 = vor.u32 1.1754944e-38, %v625_v33 }
 0x42f   :  { %vm624_vm12 = vcmp.eq.f32.partialorder %v623_v34, 8.507059e+37 }
 0x430   :  { %v607_v6 = vsel %vm606_vm5, %v2945_v61, %v603_v5 }
 0x431   :  { %v612_v12 = vsel %vm609_vm6, %v611_v63, %v607_v6 }
 0x432   :  { %v631_v8 = vmul.f32 %v2947_v7, %v612_v12  ;;  %v2951_v15 = vpop.eup %2950  ;;  %v630_v40 = vmul.f32 %v612_v12, %v3548_v56 }
 0x433   :  { %v615_v57 = vmul.f32 %v2951_v15, %v598_v14  ;;  %vm620_vm7 = vweird.f32 %v2951_v15 }
 0x434   :  { %633 = vrot.lane.b32.xlu2 %v631_v8, %s3169_s2  ;;  %vm621_vm11 = vmor %vm619_vm8, %vm620_vm7 }
 0x435   :  { %v616_v36 = vsub.f32 1.0, %v615_v57 }
 0x437   :  { %v617_v39 = vmul.f32 %v2951_v15, %v616_v36 }
 0x439   :  { %v618_v50 = vadd.f32 %v2951_v15, %v617_v39 }
 0x43b   :  { %v622_v44 = vsel %vm621_vm11, %v2951_v15, %v618_v50 }
 0x43c   :  { %v627_v53 = vsel %vm624_vm12, %v626_v35, %v622_v44 }
 0x48e   :  { %v634_v41 = vpop.permute.xlu2 %633 }
 0x48f   :  { %v3578_v47 = vadd.f32 %v634_v41, %v630_v40 }
 0x491   :  { %2952 = vtanh.f32 %v3578_v47 }
 0x497   :  { %v2953_v43 = vpop.eup %2952 }
 0x498   :  { %v3581_v58 = vmul.f32 %v2953_v43, %v627_v53 }
 0x49a   :  { %640 = vrot.lane.b32.xlu2 %v3581_v58, %s3169_s2 }
 0x4f4   :  { %v641_v56 = vpop.permute.xlu2 %640 }
 0x4f5   :  { %643 = vst.msk [vmem:[#allocation3 + $0x10] sm:$0xff] %vm428_vm9, %v641_v56  ;;  %2775 = vmatmul.msk.f32.vlgmr.msrb.gmra.mxu2 %vm330_vm10, %v641_v56  ;;  %2776 = vmatmul.msk.f32.vlgmr.msrb.gmra.mxu3 %vm330_vm10, %v641_v56 }
 0x4f6   :  { %1092 = vmatpush.msrb.mxu2 %v3304_v16  ;;  %1112 = vmatpush.msrb.mxu3 %v3326_v21 }
 0x4f8   :  { %1093 = vmatpush.msrb.mxu2 %v3306_v17  ;;  %1113 = vmatpush.msrb.mxu3 %v3328_v22 }
 0x4fa   :  { %1094 = vmatpush.msrb.mxu2 %v3314_v18  ;;  %1114 = vmatpush.msrb.mxu3 %v3334_v24 }
 0x4fc   :  { %1095 = vmatpush.msrb.mxu2 %v3316_v19  ;;  %1115 = vmatpush.msrb.mxu3 %v3346_v25 }
 0x4fe   :  { %1096 = vmatpush.msrb.mxu2 %v3324_v20  ;;  %1116 = vmatpush.msrb.mxu3 %v3350_v27 }
 0x500   :  { %1097 = vmatpush.msrb.mxu2 %v3332_v23  ;;  %1117 = vmatpush.msrb.mxu3 %v3356_v29 }
 0x502   :  { %1098 = vmatpush.msrb.mxu2 %v3348_v26  ;;  %1118 = vmatpush.msrb.mxu3 %v3362_v30 }
 0x504   :  { %1099 = vmatpush.msrb.mxu2 %v3354_v28  ;;  %1119 = vmatpush.msrb.mxu3 %v3368_v32 }
 0x578   :  { %v673_v16 = vpop.f32.mrf.mxu2  ;;  %v693_v21 = vpop.f32.mrf.mxu3 }
 0x579   :  { %v696_v17 = vadd.f32 %v673_v16, %v3491_v51  ;;  %v697_v23 = vadd.f32 %v693_v21, %v3493_v52 }
 0x57b   :  { %v2777_v18 = vmul.f32 -1.442695, %v696_v17  ;;  %v2778_v48 = vmul.f32 -1.442695, %v697_v23 }
 0x57d   :  { %2954 = vpow2.f32 %v2777_v18 }
 0x583   :  { %v2955_v19 = vpop.eup %2954 }
 0x584   :  { %v704_v20 = vadd.f32 1.0, %v2955_v19 }
 0x586   :  { %2956 = vrcp.f32 %v704_v20  ;;  %v717_v26 = vand.u32 2147483648, %v704_v20  ;;  %v715_v28 = vand.u32 2147483647, %v704_v20  ;;  %vm711_vm14 = vweird.f32 %v704_v20 }
 0x587   :  { %2958 = vtanh.f32 %v697_v23 }
 0x588   :  { %v718_v30 = vor.u32 1.1754944e-38, %v717_v26  ;;  %vm716_vm0 = vcmp.eq.f32.partialorder %v715_v28, 8.507059e+37  ;;  %2960 = vpow2.f32 %v2778_v48 }
 0x58c   :  { %v2957_v22 = vpop.eup %2956 }
 0x58d   :  { %v707_v24 = vmul.f32 %v2957_v22, %v704_v20  ;;  %vm712_vm13 = vweird.f32 %v2957_v22  ;;  %v2959_v51 = vpop.eup %2958 }
 0x58e   :  { %vm713_vm15 = vmor %vm711_vm14, %vm712_vm13  ;;  %v2961_v52 = vpop.eup %2960 }
 0x58f   :  { %v708_v25 = vsub.f32 1.0, %v707_v24  ;;  %v705_v61 = vadd.f32 1.0, %v2961_v52 }
 0x591   :  { %v709_v27 = vmul.f32 %v2957_v22, %v708_v25  ;;  %2962 = vrcp.f32 %v705_v61  ;;  %v732_v6 = vand.u32 2147483648, %v705_v61  ;;  %vm726_vm2 = vweird.f32 %v705_v61 }
 0x592   :  { %v730_v7 = vand.u32 2147483647, %v705_v61 }
 0x593   :  { %v710_v29 = vadd.f32 %v2957_v22, %v709_v27  ;;  %v733_v8 = vor.u32 1.1754944e-38, %v732_v6 }
 0x594   :  { %vm731_vm4 = vcmp.eq.f32.partialorder %v730_v7, 8.507059e+37 }
 0x595   :  { %v714_v32 = vsel %vm713_vm15, %v2957_v22, %v710_v29 }
 0x596   :  { %v719_v59 = vsel %vm716_vm0, %v718_v30, %v714_v32 }
 0x597   :  { %v738_v60 = vmul.f32 %v2959_v51, %v719_v59  ;;  %v2963_v62 = vpop.eup %2962  ;;  %v737_v3 = vmul.f32 %v719_v59, %v3578_v47 }
 0x598   :  { %v722_v42 = vmul.f32 %v2963_v62, %v705_v61  ;;  %vm727_vm1 = vweird.f32 %v2963_v62 }
 0x599   :  { %740 = vrot.lane.b32.xlu0 %v738_v60, %s3169_s2  ;;  %vm728_vm3 = vmor %vm726_vm2, %vm727_vm1 }
 0x59a   :  { %v723_v45 = vsub.f32 1.0, %v722_v42 }
 0x59c   :  { %v724_v9 = vmul.f32 %v2963_v62, %v723_v45 }
 0x59e   :  { %v725_v63 = vadd.f32 %v2963_v62, %v724_v9 }
 0x5a0   :  { %v729_v12 = vsel %vm728_vm3, %v2963_v62, %v725_v63 }
 0x5a1   :  { %v734_v2 = vsel %vm731_vm4, %v733_v8, %v729_v12 }
 0x60b   :  { %v741_v4 = vpop.permute.xlu0 %740 }
 0x60c   :  { %v743_v5 = vadd.f32 %v741_v4, %v737_v3 }
 0x60e   :  { %2964 = vtanh.f32 %v743_v5 }
 0x614   :  { %v2965_v13 = vpop.eup %2964 }
 0x615   :  { %v3608_v14 = vmul.f32 %v2965_v13, %v734_v2 }
 0x617   :  { %747 = vrot.lane.b32.xlu1 %v3608_v14, %s3169_s2 }
 0x689   :  { %v748_v15 = vpop.permute.xlu1 %747 }
 0x68a   :  { %750 = vst.msk [vmem:[#allocation3 + $0x18] sm:$0xff] %vm428_vm9, %v748_v15  ;;  %2779 = vmatmul.msk.f32.vlgmr.msrb.gmra.mxu0 %vm330_vm10, %v748_v15  ;;  %2780 = vmatmul.msk.f32.vlgmr.msrb.gmra.mxu1 %vm330_vm10, %v748_v15 }
 0x707   :  { %v780_v57 = vpop.f32.mrf.mxu0  ;;  %v800_v47 = vpop.f32.mrf.mxu1 }
 0x708   :  { %v803_v36 = vadd.f32 %v780_v57, %v3483_v37  ;;  %v804_v33 = vadd.f32 %v800_v47, %v3485_v38 }
 0x70a   :  { %v2781_v39 = vmul.f32 -1.442695, %v803_v36  ;;  %v2782_v20 = vmul.f32 -1.442695, %v804_v33 }
 0x70c   :  { %2966 = vpow2.f32 %v2781_v39 }
 0x712   :  { %v2967_v40 = vpop.eup %2966 }
 0x713   :  { %v811_v41 = vadd.f32 1.0, %v2967_v40 }
 0x715   :  { %2968 = vrcp.f32 %v811_v41  ;;  %v824_v35 = vand.u32 2147483648, %v811_v41  ;;  %v822_v53 = vand.u32 2147483647, %v811_v41  ;;  %vm818_vm6 = vweird.f32 %v811_v41 }
 0x716   :  { %2970 = vtanh.f32 %v804_v33 }
 0x717   :  { %v825_v37 = vor.u32 1.1754944e-38, %v824_v35  ;;  %vm823_vm8 = vcmp.eq.f32.partialorder %v822_v53, 8.507059e+37  ;;  %2972 = vpow2.f32 %v2782_v20 }
 0x71b   :  { %v2969_v50 = vpop.eup %2968 }
 0x71c   :  { %v814_v34 = vmul.f32 %v2969_v50, %v811_v41  ;;  %vm819_vm5 = vweird.f32 %v2969_v50  ;;  %v2971_v17 = vpop.eup %2970 }
 0x71d   :  { %vm820_vm7 = vmor %vm818_vm6, %vm819_vm5  ;;  %v2973_v38 = vpop.eup %2972 }
 0x71e   :  { %v815_v44 = vsub.f32 1.0, %v814_v34  ;;  %v812_v21 = vadd.f32 1.0, %v2973_v38 }
 0x720   :  { %v816_v43 = vmul.f32 %v2969_v50, %v815_v44  ;;  %2974 = vrcp.f32 %v812_v21  ;;  %v839_v30 = vand.u32 2147483648, %v812_v21  ;;  %vm833_vm12 = vweird.f32 %v812_v21 }
 0x721   :  { %v837_v32 = vand.u32 2147483647, %v812_v21 }
 0x722   :  { %v817_v56 = vadd.f32 %v2969_v50, %v816_v43  ;;  %v840_v59 = vor.u32 1.1754944e-38, %v839_v30 }
 0x723   :  { %vm838_vm14 = vcmp.eq.f32.partialorder %v837_v32, 8.507059e+37 }
 0x724   :  { %v821_v16 = vsel %vm820_vm7, %v2969_v50, %v817_v56 }
 0x725   :  { %v826_v18 = vsel %vm823_vm8, %v825_v37, %v821_v16 }
 0x726   :  { %v845_v19 = vmul.f32 %v2971_v17, %v826_v18  ;;  %v2975_v22 = vpop.eup %2974  ;;  %v844_v26 = vmul.f32 %v826_v18, %v743_v5 }
 0x727   :  { %v829_v23 = vmul.f32 %v2975_v22, %v812_v21  ;;  %vm834_vm11 = vweird.f32 %v2975_v22 }
 0x728   :  { %847 = vrot.lane.b32.xlu2 %v845_v19, %s3169_s2  ;;  %vm835_vm13 = vmor %vm833_vm12, %vm834_vm11 }
 0x729   :  { %v830_v24 = vsub.f32 1.0, %v829_v23 }
 0x72b   :  { %v831_v25 = vmul.f32 %v2975_v22, %v830_v24 }
 0x72d   :  { %v832_v29 = vadd.f32 %v2975_v22, %v831_v25 }
 0x72f   :  { %v836_v51 = vsel %vm835_vm13, %v2975_v22, %v832_v29 }
 0x730   :  { %v841_v48 = vsel %vm838_vm14, %v840_v59, %v836_v51 }
 0x782   :  { %v848_v27 = vpop.permute.xlu2 %847 }
 0x783   :  { %v850_v28 = vadd.f32 %v848_v27, %v844_v26 }
 0x785   :  { %2976 = vtanh.f32 %v850_v28 }
 0x78b   :  { %v2977_v60 = vpop.eup %2976 }
 0x78c   :  { %v3618_v52 = vmul.f32 %v2977_v60, %v841_v48 }
 0x78e   :  { %854 = vrot.lane.b32.xlu0 %v3618_v52, %s3169_s2 }
 0x800   :  { %v855_v61 = vpop.permute.xlu0 %854 }
 0x801   :  { %857 = vst.msk [vmem:[#allocation3 + $0x20] sm:$0xff] %vm428_vm9, %v855_v61  ;;  %2783 = vmatmul.msk.f32.vlgmr.msra.gmra.mxu2 %vm330_vm10, %v855_v61  ;;  %2784 = vmatmul.msk.f32.vlgmr.msra.gmra.mxu3 %vm330_vm10, %v855_v61 }
 0x884   :  { %v887_v62 = vpop.f32.mrf.mxu2  ;;  %v907_v4 = vpop.f32.mrf.mxu3 }
 0x885   :  { %v910_v42 = vadd.f32 %v887_v62, %v3475_v10  ;;  %v911_v63 = vadd.f32 %v907_v4, %v3477_v11 }
 0x887   :  { %v2785_v45 = vmul.f32 -1.442695, %v910_v42  ;;  %v2786_v40 = vmul.f32 -1.442695, %v911_v63 }
 0x889   :  { %2978 = vpow2.f32 %v2785_v45 }
 0x88f   :  { %v2979_v9 = vpop.eup %2978 }
 0x890   :  { %v918_v3 = vadd.f32 1.0, %v2979_v9 }
 0x892   :  { %2980 = vrcp.f32 %v918_v3  ;;  %v931_v12 = vand.u32 2147483648, %v918_v3  ;;  %v929_v13 = vand.u32 2147483647, %v918_v3  ;;  %vm925_vm0 = vweird.f32 %v918_v3 }
 0x893   :  { %2982 = vtanh.f32 %v911_v63 }
 0x894   :  { %v932_v10 = vor.u32 1.1754944e-38, %v931_v12  ;;  %vm930_vm2 = vcmp.eq.f32.partialorder %v929_v13, 8.507059e+37  ;;  %2984 = vpow2.f32 %v2786_v40 }
 0x898   :  { %v2981_v5 = vpop.eup %2980 }
 0x899   :  { %v921_v6 = vmul.f32 %v2981_v5, %v918_v3  ;;  %vm926_vm15 = vweird.f32 %v2981_v5  ;;  %v2983_v57 = vpop.eup %2982 }
 0x89a   :  { %vm927_vm1 = vmor %vm925_vm0, %vm926_vm15  ;;  %v2985_v11 = vpop.eup %2984 }
 0x89b   :  { %v922_v7 = vsub.f32 1.0, %v921_v6  ;;  %v919_v41 = vadd.f32 1.0, %v2985_v11 }
 0x89d   :  { %v923_v8 = vmul.f32 %v2981_v5, %v922_v7  ;;  %2986 = vrcp.f32 %v919_v41  ;;  %v946_v56 = vand.u32 2147483648, %v919_v41  ;;  %vm940_vm4 = vweird.f32 %v919_v41 }
 0x89e   :  { %v944_v37 = vand.u32 2147483647, %v919_v41 }
 0x89f   :  { %v924_v2 = vadd.f32 %v2981_v5, %v923_v8  ;;  %v947_v17 = vor.u32 1.1754944e-38, %v946_v56 }
 0x8a0   :  { %vm945_vm6 = vcmp.eq.f32.partialorder %v944_v37, 8.507059e+37 }
 0x8a1   :  { %v928_v15 = vsel %vm927_vm1, %v2981_v5, %v924_v2 }
 0x8a2   :  { %v933_v36 = vsel %vm930_vm2, %v932_v10, %v928_v15 }
 0x8a3   :  { %v952_v39 = vmul.f32 %v2983_v57, %v933_v36  ;;  %v2987_v47 = vpop.eup %2986  ;;  %v951_v44 = vmul.f32 %v933_v36, %v850_v28 }
 0x8a4   :  { %v936_v50 = vmul.f32 %v2987_v47, %v919_v41  ;;  %vm941_vm3 = vweird.f32 %v2987_v47 }
 0x8a5   :  { %954 = vrot.lane.b32.xlu1 %v952_v39, %s3169_s2  ;;  %vm942_vm5 = vmor %vm940_vm4, %vm941_vm3 }
 0x8a6   :  { %v937_v33 = vsub.f32 1.0, %v936_v50 }
 0x8a8   :  { %v938_v34 = vmul.f32 %v2987_v47, %v937_v33 }
 0x8aa   :  { %v939_v53 = vadd.f32 %v2987_v47, %v938_v34 }
 0x8ac   :  { %v943_v16 = vsel %vm942_vm5, %v2987_v47, %v939_v53 }
 0x8ad   :  { %v948_v19 = vsel %vm945_vm6, %v947_v17, %v943_v16 }
 0x917   :  { %v955_v35 = vpop.permute.xlu1 %954 }
 0x918   :  { %v957_v43 = vadd.f32 %v955_v35, %v951_v44 }
 0x91a   :  { %2988 = vtanh.f32 %v957_v43 }
 0x920   :  { %v2989_v18 = vpop.eup %2988 }
 0x921   :  { %v3628_v20 = vmul.f32 %v2989_v18, %v948_v19 }
 0x923   :  { %961 = vrot.lane.b32.xlu2 %v3628_v20, %s3169_s2 }
 0x97d   :  { %v962_v38 = vpop.permute.xlu2 %961 }
 0x97e   :  { %964 = vst.msk [vmem:[#allocation3 + $0x28] sm:$0xff] %vm428_vm9, %v962_v38  ;;  %2787 = vmatmul.msk.f32.vlgmr.msra.gmra.mxu0 %vm330_vm10, %v962_v38  ;;  %2788 = vmatmul.msk.f32.vlgmr.msra.gmra.mxu1 %vm330_vm10, %v962_v38 }
 0x9fb   :  { %v994_v21 = vpop.f32.mrf.mxu0  ;;  %v1014_v26 = vpop.f32.mrf.mxu1 }
 0x9fc   :  { %v1017_v22 = vadd.f32 %v994_v21, %v3467_v0  ;;  %v1018_v28 = vadd.f32 %v1014_v26, %v3469_v1 }
 0x9fe   :  { %v2789_v23 = vmul.f32 -1.442695, %v1017_v22  ;;  %v2790_v45 = vmul.f32 -1.442695, %v1018_v28 }
 0xa00   :  { %2990 = vpow2.f32 %v2789_v23 }
 0xa06   :  { %v2991_v24 = vpop.eup %2990 }
 0xa07   :  { %v1025_v25 = vadd.f32 1.0, %v2991_v24 }
 0xa09   :  { %2992 = vrcp.f32 %v1025_v25  ;;  %v1038_v32 = vand.u32 2147483648, %v1025_v25  ;;  %v1036_v59 = vand.u32 2147483647, %v1025_v25  ;;  %vm1032_vm8 = vweird.f32 %v1025_v25 }
 0xa0a   :  { %2994 = vtanh.f32 %v1018_v28 }
 0xa0b   :  { %v1039_v0 = vor.u32 1.1754944e-38, %v1038_v32  ;;  %vm1037_vm12 = vcmp.eq.f32.partialorder %v1036_v59, 8.507059e+37  ;;  %2996 = vpow2.f32 %v2790_v45  ;;  %v1213_v45 = vld [vmem:[#allocation9 + $0xf0] sm:$0xff] }
 0xa0c   :  { %1349 = vmatpush.msra.mxu2 %v1213_v45  ;;  %v3779_v45 = vld [vmem:[#allocation7 + $0x98] sm:$0xff] }
 0xa0d   :  { %4266 = vst [vmem:[#allocation19_spill] sm:$0xff] %v3779_v45 }
 0xa0f   :  { %v2993_v27 = vpop.eup %2992 }
 0xa10   :  { %v1028_v29 = vmul.f32 %v2993_v27, %v1025_v25  ;;  %vm1033_vm7 = vweird.f32 %v2993_v27  ;;  %v2995_v61 = vpop.eup %2994 }
 0xa11   :  { %vm1034_vm11 = vmor %vm1032_vm8, %vm1033_vm7  ;;  %v2997_v1 = vpop.eup %2996 }
 0xa12   :  { %v1029_v30 = vsub.f32 1.0, %v1028_v29  ;;  %v1026_v9 = vadd.f32 1.0, %v2997_v1  ;;  %v1211_v1 = vld [vmem:[#allocation9 + $0xe0] sm:$0xff] }
 0xa13   :  { %1267 = vmatpush.msrb.mxu0 %v1211_v1  ;;  %v3789_v1 = vld [vmem:[#allocation7 + $0x88] sm:$0xff] }
 0xa14   :  { %v1030_v51 = vmul.f32 %v2993_v27, %v1029_v30  ;;  %2998 = vrcp.f32 %v1026_v9  ;;  %v1053_v13 = vand.u32 2147483648, %v1026_v9  ;;  %vm1047_vm14 = vweird.f32 %v1026_v9  ;;  %4267 = vst [vmem:[#allocation20_spill] sm:$0xff] %v3789_v1 }
 0xa15   :  { %v1051_v2 = vand.u32 2147483647, %v1026_v9 }
 0xa16   :  { %v1031_v60 = vadd.f32 %v2993_v27, %v1030_v51  ;;  %v1054_v15 = vor.u32 1.1754944e-38, %v1053_v13  ;;  %v1199_v13 = vld [vmem:[#allocation9 + $0x80] sm:$0xff] }
 0xa17   :  { %vm1052_vm0 = vcmp.eq.f32.partialorder %v1051_v2, 8.507059e+37  ;;  %v1200_v2 = vld [vmem:[#allocation9 + $0x88] sm:$0xff] }
 0xa18   :  { %v1035_v48 = vsel %vm1034_vm11, %v2993_v27, %v1031_v60 }
 0xa19   :  { %v1040_v62 = vsel %vm1037_vm12, %v1039_v0, %v1035_v48 }
 0xa1a   :  { %v1059_v42 = vmul.f32 %v2995_v61, %v1040_v62  ;;  %v2999_v3 = vpop.eup %2998  ;;  %v1058_v6 = vmul.f32 %v1040_v62, %v957_v43 }
 0xa1b   :  { %v1043_v4 = vmul.f32 %v2999_v3, %v1026_v9  ;;  %vm1048_vm13 = vweird.f32 %v2999_v3  ;;  %v1212_v9 = vld [vmem:[#allocation9 + $0xe8] sm:$0xff] }
 0xa1c   :  { %1061 = vrot.lane.b32.xlu0 %v1059_v42, %s3169_s2  ;;  %vm1049_vm15 = vmor %vm1047_vm14, %vm1048_vm13  ;;  %1308 = vmatpush.msrb.mxu1 %v1212_v9  ;;  %v1220_v9 = vld [vmem:[#allocation3 + $0x28] sm:$0xff] }
 0xa1d   :  { %v1044_v5 = vsub.f32 1.0, %v1043_v4  ;;  %v1209_v4 = vld [vmem:[#allocation9 + $0xd0] sm:$0xff] }
 0xa1e   :  { %1350 = vmatpush.msra.mxu2 %v1209_v4 }
 0xa1f   :  { %v1045_v63 = vmul.f32 %v2999_v3, %v1044_v5  ;;  %v1207_v5 = vld [vmem:[#allocation9 + $0xc0] sm:$0xff] }
 0xa20   :  { %1268 = vmatpush.msrb.mxu0 %v1207_v5 }
 0xa21   :  { %v1046_v8 = vadd.f32 %v2999_v3, %v1045_v63  ;;  %v1208_v63 = vld [vmem:[#allocation9 + $0xc8] sm:$0xff] }
 0xa22   :  { %1309 = vmatpush.msrb.mxu1 %v1208_v63 }
 0xa23   :  { %v1050_v10 = vsel %vm1049_vm15, %v2999_v3, %v1046_v8  ;;  %v1214_v3 = vld [vmem:[#allocation9 + $0xf8] sm:$0xff] }
 0xa24   :  { %v1055_v36 = vsel %vm1052_vm0, %v1054_v15, %v1050_v10  ;;  %1390 = vmatpush.msra.mxu3 %v1214_v3  ;;  %v1206_v8 = vld [vmem:[#allocation9 + $0xb8] sm:$0xff] }
 0xa25   :  { %v1202_v10 = vld [vmem:[#allocation9 + $0x98] sm:$0xff] }
 0xa8e   :  { %v1062_v7 = vpop.permute.xlu0 %1061 }
 0xa8f   :  { %v3638_v12 = vadd.f32 %v1062_v7, %v1058_v6  ;;  %v1210_v6 = vld [vmem:[#allocation9 + $0xd8] sm:$0xff]  ;;  %v1205_v7 = vld [vmem:[#allocation9 + $0xb0] sm:$0xff] }
 0xa90   :  { %1391 = vmatpush.msra.mxu3 %v1210_v6  ;;  %1351 = vmatpush.msra.mxu2 %v1205_v7 }
 0xa91   :  { %3000 = vtanh.f32 %v3638_v12 }
 0xa92   :  { %1392 = vmatpush.msra.mxu3 %v1206_v8 }
 0xa94   :  { %1393 = vmatpush.msra.mxu3 %v1202_v10 }
 0xa97   :  { %v3001_v57 = vpop.eup %3000 }
 0xa98   :  { %v1066_v39 = vmul.f32 %v3001_v57, %v1055_v36  ;;  %v1197_v57 = vld [vmem:[#allocation9 + $0x70] sm:$0xff]  ;;  %v1195_v36 = vld [vmem:[#allocation9 + $0x60] sm:$0xff] }
 0xa9a   :  { %1068 = vrot.lane.b32.xlu1 %v1066_v39, %s3169_s2 }
 0xaa2   :  { %1072 = vrot.lane.b32.xlu1 %v1066_v39, %s3167_s18  ;;  %v1193_v39 = vld [vmem:[#allocation9 + $0x50] sm:$0xff] }
 0xaaa   :  { %751 = vrot.lane.b32.xlu1 %v3608_v14, %s3167_s18 }
 0xab2   :  { %430 = vrot.lane.b32.xlu1 %v3521_v49, %s3167_s18 }
 0xb0c   :  { %v1069_v40 = vpop.permute.xlu1 %1068 }
 0xb0d   :  { %1071 = vst.msk [vmem:[#allocation3 + $0x30] sm:$0xff] %vm428_vm9, %v1069_v40  ;;  %2791 = vmatmul.msk.f32.vlgmr.msrb.gmra.mxu2 %vm330_vm10, %v1069_v40  ;;  %2792 = vmatmul.msk.f32.vlgmr.msrb.gmra.mxu3 %vm330_vm10, %v1069_v40  ;;  %v1191_v40 = vld [vmem:[#allocation9 + $0x40] sm:$0xff] }
 0xb14   :  { %v1073_v11 = vpop.permute.xlu1 %1072  ;;  %v1221_v3 = vld [vmem:[#allocation3 + $0x30] sm:$0xff] }
 0xb15   :  { %1075 = vst.msk [vmem:[#allocation4 + $0x8] sm:$0xff] %vm428_vm9, %v1073_v11  ;;  %v1198_v11 = vld [vmem:[#allocation9 + $0x78] sm:$0xff] }
 0xb16   :  { %1578 = vmatpush.msrb.mxu3 %v1198_v11 }
 0xb1c   :  { %v752_v41 = vpop.permute.xlu1 %751 }
 0xb1d   :  { %754 = vst.msk [vmem:[#allocation4 + $0x20] sm:$0xff] %vm428_vm9, %v752_v41 }
 0xb24   :  { %v431_v47 = vpop.permute.xlu1 %430 }
 0xb25   :  { %433 = vst.msk [vmem:[#allocation4 + $0x38] sm:$0xff] %vm428_vm9, %v431_v47  ;;  %v1196_v47 = vld [vmem:[#allocation9 + $0x68] sm:$0xff] }
 0xb90   :  { %v1101_v14 = vpop.f32.mrf.mxu2  ;;  %v1121_v44 = vpop.f32.mrf.mxu3 }
 0xb91   :  { %v1124_v50 = vadd.f32 %v1101_v14, %v3459_v54  ;;  %v1125_v43 = vadd.f32 %v1121_v44, %v3461_v55 }
 0xb93   :  { %v2793_v49 = vmul.f32 -1.442695, %v1124_v50  ;;  %v2794_v55 = vmul.f32 -1.442695, %v1125_v43 }
 0xb95   :  { %3002 = vpow2.f32 %v2793_v49  ;;  %v1189_v49 = vld [vmem:[#allocation9 + $0x30] sm:$0xff] }
 0xb9b   :  { %v3003_v33 = vpop.eup %3002 }
 0xb9c   :  { %v1132_v34 = vadd.f32 1.0, %v3003_v33  ;;  %v1187_v33 = vld [vmem:[#allocation9 + $0x20] sm:$0xff] }
 0xb9e   :  { %3004 = vrcp.f32 %v1132_v34  ;;  %v1145_v37 = vand.u32 2147483648, %v1132_v34  ;;  %v1143_v17 = vand.u32 2147483647, %v1132_v34  ;;  %vm1139_vm2 = vweird.f32 %v1132_v34 }
 0xb9f   :  { %3006 = vtanh.f32 %v1125_v43  ;;  %v1192_v43 = vld [vmem:[#allocation9 + $0x48] sm:$0xff] }
 0xba0   :  { %v1146_v54 = vor.u32 1.1754944e-38, %v1145_v37  ;;  %vm1144_vm4 = vcmp.eq.f32.partialorder %v1143_v17, 8.507059e+37  ;;  %3008 = vpow2.f32 %v2794_v55  ;;  %v1183_v37 = vld [vmem:[#allocation9] sm:$0xff] }
 0xba1   :  { %v3701_v55 = vld [vmem:[#allocation7 + $0xe0] sm:$0xff] }
 0xba4   :  { %v3005_v35 = vpop.eup %3004 }
 0xba5   :  { %v1135_v53 = vmul.f32 %v3005_v35, %v1132_v34  ;;  %vm1140_vm1 = vweird.f32 %v3005_v35  ;;  %v3007_v38 = vpop.eup %3006  ;;  %v1194_v34 = vld [vmem:[#allocation9 + $0x58] sm:$0xff] }
 0xba6   :  { %vm1141_vm3 = vmor %vm1139_vm2, %vm1140_vm1  ;;  %v3009_v23 = vpop.eup %3008  ;;  %1579 = vmatpush.msrb.mxu3 %v1194_v34 }
 0xba7   :  { %v1136_v56 = vsub.f32 1.0, %v1135_v53  ;;  %v1133_v24 = vadd.f32 1.0, %v3009_v23 }
 0xba9   :  { %v1137_v16 = vmul.f32 %v3005_v35, %v1136_v56  ;;  %3010 = vrcp.f32 %v1133_v24  ;;  %vm1154_vm6 = vweird.f32 %v1133_v24  ;;  %v1158_v59 = vand.u32 2147483647, %v1133_v24  ;;  %v1185_v56 = vld [vmem:[#allocation9 + $0x10] sm:$0xff] }
 0xbab   :  { %v1138_v18 = vadd.f32 %v3005_v35, %v1137_v16  ;;  %vm1159_vm8 = vcmp.eq.f32.partialorder %v1158_v59, 8.507059e+37  ;;  %v1190_v16 = vld [vmem:[#allocation9 + $0x38] sm:$0xff]  ;;  %v1217_v59 = vld [vmem:[#allocation3 + $0x10] sm:$0xff] }
 0xbac   :  { %1580 = vmatpush.msrb.mxu3 %v1190_v16 }
 0xbad   :  { %v1142_v19 = vsel %vm1141_vm3, %v3005_v35, %v1138_v18  ;;  %v1224_v35 = vld [vmem:[#allocation4 + $0x8] sm:$0xff] }
 0xbae   :  { %v1147_v21 = vsel %vm1144_vm4, %v1146_v54, %v1142_v19  ;;  %v1188_v18 = vld [vmem:[#allocation9 + $0x28] sm:$0xff]  ;;  %v1186_v19 = vld [vmem:[#allocation9 + $0x18] sm:$0xff] }
 0xbaf   :  { %v1166_v22 = vmul.f32 %v3007_v38, %v1147_v21  ;;  %v3011_v25 = vpop.eup %3010  ;;  %v1165_v29 = vmul.f32 %v1147_v21, %v3638_v12  ;;  %v1203_v12 = vld [vmem:[#allocation9 + $0xa0] sm:$0xff]  ;;  %v1184_v54 = vld [vmem:[#allocation9 + $0x8] sm:$0xff]  ;;  %1581 = vmatpush.msrb.mxu3 %v1186_v19  ;;  %v3693_v21 = vld [vmem:[#allocation7 + $0xf0] sm:$0xff] }
 0xbb0   :  { %v1150_v26 = vmul.f32 %v3011_v25, %v1133_v24  ;;  %vm1155_vm5 = vweird.f32 %v3011_v25  ;;  %1269 = vmatpush.msrb.mxu0 %v1203_v12  ;;  %v1227_v38 = vld [vmem:[#allocation4 + $0x20] sm:$0xff] }
 0xbb1   :  { %1168 = vrot.lane.b32.xlu2 %v1166_v22, %s3169_s2  ;;  %vm1156_vm7 = vmor %vm1154_vm6, %vm1155_vm5 }
 0xbb2   :  { %v1151_v27 = vsub.f32 1.0, %v1150_v26  ;;  %1270 = vmatpush.msrb.mxu0 %v1199_v13  ;;  %v3717_v26 = vld [vmem:[#allocation7 + $0xf8] sm:$0xff] }
 0xbb4   :  { %v1152_v28 = vmul.f32 %v3011_v25, %v1151_v27  ;;  %1455 = vmatpush.msra.mxu0 %v1195_v36  ;;  %v3719_v27 = vld [vmem:[#allocation7 + $0xc0] sm:$0xff] }
 0xbb6   :  { %v1153_v51 = vadd.f32 %v3011_v25, %v1152_v28  ;;  %1456 = vmatpush.msra.mxu0 %v1191_v40  ;;  %v1215_v28 = vld [vmem:[#allocation3] sm:$0xff] }
 0xbb8   :  { %1457 = vmatpush.msra.mxu0 %v1187_v33 }
 0xbb9   :  { %965 = vrot.lane.b32.xlu2 %v3628_v20, %s3167_s18  ;;  %v1160_v20 = vand.u32 2147483648, %v1133_v24  ;;  %v3709_v24 = vld [vmem:[#allocation7 + $0xd0] sm:$0xff] }
 0xbba   :  { %1458 = vmatpush.msra.mxu0 %v1183_v37 }
 0xbbb   :  { %v1161_v60 = vor.u32 1.1754944e-38, %v1160_v20  ;;  %v3743_v20 = vld [vmem:[#allocation7 + $0xa0] sm:$0xff] }
 0xbbc   :  { %4261 = vst [vmem:[#allocation14_spill] sm:$0xff] %v3743_v20 }
 0xbc1   :  { %644 = vrot.lane.b32.xlu2 %v3581_v58, %s3167_s18  ;;  %v1157_v58 = vsel %vm1156_vm7, %v3011_v25, %v1153_v51  ;;  %v1230_v25 = vld [vmem:[#allocation4 + $0x38] sm:$0xff] }
 0xbc2   :  { %v1162_v61 = vsel %vm1159_vm8, %v1161_v60, %v1157_v58  ;;  %v3741_v51 = vld [vmem:[#allocation7 + $0xd8] sm:$0xff]  ;;  %v3753_v58 = vld [vmem:[#allocation7 + $0xc8] sm:$0xff]  ;;  %v3755_v60 = vld [vmem:[#allocation7 + $0x90] sm:$0xff] }
 0xbc3   :  { %4262 = vst [vmem:[#allocation15_spill] sm:$0xff] %v3755_v60 }
 0xc0b   :  { %v1169_v30 = vpop.permute.xlu2 %1168 }
 0xc0c   :  { %v1171_v32 = vadd.f32 %v1169_v30, %v1165_v29  ;;  %v3729_v29 = vld [vmem:[#allocation7 + $0xe8] sm:$0xff]  ;;  %v3731_v30 = vld [vmem:[#allocation7 + $0xb0] sm:$0xff] }
 0xc0d   :  { %4260 = vst [vmem:[#allocation13_spill] sm:$0xff] %v3731_v30 }
 0xc0e   :  { %3012 = vtanh.f32 %v1171_v32  ;;  %v1216_v32 = vld [vmem:[#allocation3 + $0x8] sm:$0xff] }
 0xc13   :  { %v966_v0 = vpop.permute.xlu2 %965 }
 0xc14   :  { %v3013_v48 = vpop.eup %3012  ;;  %968 = vst.msk [vmem:[#allocation4 + $0x10] sm:$0xff] %vm428_vm9, %v966_v0  ;;  %v1218_v0 = vld [vmem:[#allocation3 + $0x18] sm:$0xff] }
 0xc15   :  { %v1173_v62 = vmul.f32 %v3013_v48, %v1162_v61  ;;  %v3765_v48 = vld [vmem:[#allocation7 + $0xb8] sm:$0xff]  ;;  %v3767_v61 = vld [vmem:[#allocation7 + $0x80] sm:$0xff] }
 0xc16   :  { %4263 = vst [vmem:[#allocation16_spill] sm:$0xff] %v3765_v48 }
 0xc17   :  { %1175 = vrot.lane.b32.xlu2 %v1173_v62, %s3169_s2  ;;  %1179 = vrot.lane.b32.xlu0 %v1173_v62, %s3167_s18  ;;  %4264 = vst [vmem:[#allocation17_spill] sm:$0xff] %v3767_v61  ;;  %v3775_v62 = vld [vmem:[#allocation7 + $0xa8] sm:$0xff] }
 0xc18   :  { %4265 = vst [vmem:[#allocation18_spill] sm:$0xff] %v3775_v62 }
 0xc1b   :  { %v645_v42 = vpop.permute.xlu2 %644  ;;  %v1225_v53 = vld [vmem:[#allocation4 + $0x10] sm:$0xff] }
 0xc1c   :  { %647 = vst.msk [vmem:[#allocation4 + $0x28] sm:$0xff] %vm428_vm9, %v645_v42  ;;  %v1219_v42 = vld [vmem:[#allocation3 + $0x20] sm:$0xff] }
 0xc1f   :  { %858 = vrot.lane.b32.xlu0 %v3618_v52, %s3167_s18  ;;  %v1204_v52 = vld [vmem:[#allocation9 + $0xa8] sm:$0xff] }
 0xc20   :  { %1310 = vmatpush.msrb.mxu1 %v1204_v52 }
 0xc22   :  { %1311 = vmatpush.msrb.mxu1 %v1200_v2 }
 0xc23   :  { %v1228_v22 = vld [vmem:[#allocation4 + $0x28] sm:$0xff] }
 0xc24   :  { %1496 = vmatpush.msra.mxu1 %v1196_v47 }
 0xc26   :  { %1497 = vmatpush.msra.mxu1 %v1192_v43 }
 0xc27   :  { %537 = vrot.lane.b32.xlu0 %v3551_v46, %s3167_s18  ;;  %v1201_v46 = vld [vmem:[#allocation9 + $0x90] sm:$0xff] }
 0xc28   :  { %1352 = vmatpush.msra.mxu2 %v1201_v46  ;;  %1498 = vmatpush.msra.mxu1 %v1188_v18 }
 0xc2a   :  { %1537 = vmatpush.msrb.mxu2 %v1197_v57  ;;  %1499 = vmatpush.msra.mxu1 %v1184_v54  ;;  %v1607_v54 = vld [vmem:[%s4240_s5] sm:$0xf] }
 0xc2b   :  { %v3898_v19 = vperm.slane %v1607_v54, 2 }
 0xc2c   :  { %1538 = vmatpush.msrb.mxu2 %v1193_v39 }
 0xc2e   :  { %1539 = vmatpush.msrb.mxu2 %v1189_v49 }
 0xc30   :  { %1540 = vmatpush.msrb.mxu2 %v1185_v56 }
 0xc71   :  { %v1176_v15 = vpop.permute.xlu2 %1175 }
 0xc72   :  { %1178 = vst.msk [vmem:[#allocation3 + $0x38] sm:$0xff] %vm428_vm9, %v1176_v15 }
 0xc79   :  { %v1222_v4 = vld [vmem:[#allocation3 + $0x38] sm:$0xff] }
 0xc89   :  { %v1180_v41 = vpop.permute.xlu0 %1179 }
 0xc8a   :  { %1182 = vst.msk [vmem:[#allocation4] sm:$0xff] %vm428_vm9, %v1180_v41 }
 0xc91   :  { %v859_v14 = vpop.permute.xlu0 %858  ;;  %v1223_v50 = vld [vmem:[#allocation4] sm:$0xff] }
 0xc92   :  { %861 = vst.msk [vmem:[#allocation4 + $0x18] sm:$0xff] %vm428_vm9, %v859_v14  ;;  %2795 = vmatmul.msk.f32.vlgmr.msrb.gmra.mxu0 %vm428_vm9, %v1223_v50  ;;  %2803 = vmatmul.msk.f32.vlgmr.msrb.gmra.mxu1 %vm428_vm9, %v1223_v50 }
 0xc93   :  { %2811 = vmatmul.msk.f32.vlgmr.msra.gmra.mxu2 %vm428_vm9, %v1223_v50  ;;  %2819 = vmatmul.msk.f32.vlgmr.msra.gmra.mxu3 %vm428_vm9, %v1223_v50 }
 0xc94   :  { %1712 = vmatpush.msrb.mxu0 %v3693_v21  ;;  %1819 = vmatpush.msra.mxu2 %v3693_v21 }
 0xc95   :  { %1732 = vmatpush.msrb.mxu1 %v3717_v26  ;;  %1839 = vmatpush.msra.mxu3 %v3717_v26 }
 0xc96   :  { %1713 = vmatpush.msrb.mxu0 %v3701_v55  ;;  %1820 = vmatpush.msra.mxu2 %v3701_v55 }
 0xc97   :  { %1733 = vmatpush.msrb.mxu1 %v3729_v29  ;;  %1840 = vmatpush.msra.mxu3 %v3729_v29 }
 0xc98   :  { %1714 = vmatpush.msrb.mxu0 %v3709_v24  ;;  %1821 = vmatpush.msra.mxu2 %v3709_v24 }
 0xc99   :  { %v538_v44 = vpop.permute.xlu0 %537  ;;  %v1226_v17 = vld [vmem:[#allocation4 + $0x18] sm:$0xff]  ;;  %1734 = vmatpush.msrb.mxu1 %v3741_v51  ;;  %1841 = vmatpush.msra.mxu3 %v3741_v51 }
 0xc9a   :  { %540 = vst.msk [vmem:[#allocation4 + $0x30] sm:$0xff] %vm428_vm9, %v538_v44  ;;  %2796 = vmatmul.msk.f32.gmra.mxu0 %vm428_vm9, %v1224_v35  ;;  %2804 = vmatmul.msk.f32.gmra.mxu1 %vm428_vm9, %v1224_v35 }
 0xc9b   :  { %2812 = vmatmul.msk.f32.gmra.mxu2 %vm428_vm9, %v1224_v35  ;;  %2820 = vmatmul.msk.f32.gmra.mxu3 %vm428_vm9, %v1224_v35 }
 0xc9c   :  { %1715 = vmatpush.msrb.mxu0 %v3719_v27  ;;  %1822 = vmatpush.msra.mxu2 %v3719_v27 }
 0xc9d   :  { %1735 = vmatpush.msrb.mxu1 %v3753_v58  ;;  %1842 = vmatpush.msra.mxu3 %v3753_v58 }
 0xc9e   :  { %1716 = vmatpush.msrb.mxu0 %v3731_v30  ;;  %1823 = vmatpush.msra.mxu2 %v3731_v30 }
 0xc9f   :  { %1736 = vmatpush.msrb.mxu1 %v3765_v48  ;;  %1843 = vmatpush.msra.mxu3 %v3765_v48 }
 0xca0   :  { %1717 = vmatpush.msrb.mxu0 %v3743_v20  ;;  %1824 = vmatpush.msra.mxu2 %v3743_v20 }
 0xca1   :  { %v1229_v23 = vld [vmem:[#allocation4 + $0x30] sm:$0xff]  ;;  %1737 = vmatpush.msrb.mxu1 %v3775_v62  ;;  %1844 = vmatpush.msra.mxu3 %v3775_v62 }
 0xca2   :  { %2797 = vmatmul.msk.f32.gmra.mxu0 %vm428_vm9, %v1225_v53  ;;  %2805 = vmatmul.msk.f32.gmra.mxu1 %vm428_vm9, %v1225_v53 }
 0xca3   :  { %2813 = vmatmul.msk.f32.gmra.mxu2 %vm428_vm9, %v1225_v53  ;;  %2821 = vmatmul.msk.f32.gmra.mxu3 %vm428_vm9, %v1225_v53 }
 0xca4   :  { %1718 = vmatpush.msrb.mxu0 %v3755_v60  ;;  %1825 = vmatpush.msra.mxu2 %v3755_v60 }
 0xca5   :  { %1738 = vmatpush.msrb.mxu1 %v3779_v45  ;;  %1845 = vmatpush.msra.mxu3 %v3779_v45 }
 0xca6   :  { %1719 = vmatpush.msrb.mxu0 %v3767_v61  ;;  %1826 = vmatpush.msra.mxu2 %v3767_v61 }
 0xca7   :  { %1739 = vmatpush.msrb.mxu1 %v3789_v1  ;;  %1846 = vmatpush.msra.mxu3 %v3789_v1 }
 0xcaa   :  { %2798 = vmatmul.msk.f32.gmra.mxu0 %vm428_vm9, %v1226_v17  ;;  %2806 = vmatmul.msk.f32.gmra.mxu1 %vm428_vm9, %v1226_v17 }
 0xcab   :  { %2814 = vmatmul.msk.f32.gmra.mxu2 %vm428_vm9, %v1226_v17  ;;  %2822 = vmatmul.msk.f32.gmra.mxu3 %vm428_vm9, %v1226_v17 }
 0xcb2   :  { %2799 = vmatmul.msk.f32.gmra.mxu0 %vm428_vm9, %v1227_v38  ;;  %2807 = vmatmul.msk.f32.gmra.mxu1 %vm428_vm9, %v1227_v38 }
 0xcb3   :  { %2815 = vmatmul.msk.f32.gmra.mxu2 %vm428_vm9, %v1227_v38  ;;  %2823 = vmatmul.msk.f32.gmra.mxu3 %vm428_vm9, %v1227_v38  ;;  %v3900_v38 = vperm.slane %v1607_v54, 3 }
 0xcba   :  { %2800 = vmatmul.msk.f32.gmra.mxu0 %vm428_vm9, %v1228_v22  ;;  %2808 = vmatmul.msk.f32.gmra.mxu1 %vm428_vm9, %v1228_v22 }
 0xcbb   :  { %2816 = vmatmul.msk.f32.gmra.mxu2 %vm428_vm9, %v1228_v22  ;;  %2824 = vmatmul.msk.f32.gmra.mxu3 %vm428_vm9, %v1228_v22 }
 0xcc2   :  { %2801 = vmatmul.msk.f32.gmra.mxu0 %vm428_vm9, %v1229_v23  ;;  %2809 = vmatmul.msk.f32.gmra.mxu1 %vm428_vm9, %v1229_v23 }
 0xcc3   :  { %2817 = vmatmul.msk.f32.gmra.mxu2 %vm428_vm9, %v1229_v23  ;;  %2825 = vmatmul.msk.f32.gmra.mxu3 %vm428_vm9, %v1229_v23 }
 0xcca   :  { %2802 = vmatmul.msk.f32.gmra.mxu0 %vm428_vm9, %v1230_v25  ;;  %2810 = vmatmul.msk.f32.gmra.mxu1 %vm428_vm9, %v1230_v25 }
 0xccb   :  { %2818 = vmatmul.msk.f32.gmra.mxu2 %vm428_vm9, %v1230_v25  ;;  %2826 = vmatmul.msk.f32.gmra.mxu3 %vm428_vm9, %v1230_v25 }
 0xcd2   :  { %2827 = vmatmul.msk.f32.vlgmr.msra.gmra.mxu0 %vm428_vm9, %v1215_v28  ;;  %2835 = vmatmul.msk.f32.vlgmr.msra.gmra.mxu1 %vm428_vm9, %v1215_v28 }
 0xcd3   :  { %2843 = vmatmul.msk.f32.vlgmr.msrb.gmra.mxu2 %vm428_vm9, %v1215_v28  ;;  %2851 = vmatmul.msk.f32.vlgmr.msrb.gmra.mxu3 %vm428_vm9, %v1215_v28 }
 0xcd4   :  { %1926 = vmatpush.msra.mxu0 %v3693_v21  ;;  %2033 = vmatpush.msrb.mxu2 %v3693_v21 }
 0xcd5   :  { %1946 = vmatpush.msra.mxu1 %v3717_v26  ;;  %2053 = vmatpush.msrb.mxu3 %v3717_v26 }
 0xcd6   :  { %1927 = vmatpush.msra.mxu0 %v3701_v55  ;;  %2034 = vmatpush.msrb.mxu2 %v3701_v55 }
 0xcd7   :  { %1947 = vmatpush.msra.mxu1 %v3729_v29  ;;  %2054 = vmatpush.msrb.mxu3 %v3729_v29 }
 0xcd8   :  { %1928 = vmatpush.msra.mxu0 %v3709_v24  ;;  %2035 = vmatpush.msrb.mxu2 %v3709_v24 }
 0xcd9   :  { %1948 = vmatpush.msra.mxu1 %v3741_v51  ;;  %2055 = vmatpush.msrb.mxu3 %v3741_v51 }
 0xcda   :  { %2828 = vmatmul.msk.f32.gmra.mxu0 %vm428_vm9, %v1216_v32  ;;  %2836 = vmatmul.msk.f32.gmra.mxu1 %vm428_vm9, %v1216_v32 }
 0xcdb   :  { %2844 = vmatmul.msk.f32.gmra.mxu2 %vm428_vm9, %v1216_v32  ;;  %2852 = vmatmul.msk.f32.gmra.mxu3 %vm428_vm9, %v1216_v32 }
 0xcdc   :  { %1929 = vmatpush.msra.mxu0 %v3719_v27  ;;  %2036 = vmatpush.msrb.mxu2 %v3719_v27 }
 0xcdd   :  { %1949 = vmatpush.msra.mxu1 %v3753_v58  ;;  %2056 = vmatpush.msrb.mxu3 %v3753_v58 }
 0xcde   :  { %1930 = vmatpush.msra.mxu0 %v3731_v30  ;;  %2037 = vmatpush.msrb.mxu2 %v3731_v30 }
 0xcdf   :  { %1950 = vmatpush.msra.mxu1 %v3765_v48  ;;  %2057 = vmatpush.msrb.mxu3 %v3765_v48 }
 0xce0   :  { %1931 = vmatpush.msra.mxu0 %v3743_v20  ;;  %2038 = vmatpush.msrb.mxu2 %v3743_v20 }
 0xce1   :  { %1951 = vmatpush.msra.mxu1 %v3775_v62  ;;  %2058 = vmatpush.msrb.mxu3 %v3775_v62 }
 0xce2   :  { %2829 = vmatmul.msk.f32.gmra.mxu0 %vm428_vm9, %v1217_v59  ;;  %2837 = vmatmul.msk.f32.gmra.mxu1 %vm428_vm9, %v1217_v59 }
 0xce3   :  { %2845 = vmatmul.msk.f32.gmra.mxu2 %vm428_vm9, %v1217_v59  ;;  %2853 = vmatmul.msk.f32.gmra.mxu3 %vm428_vm9, %v1217_v59 }
 0xce4   :  { %1932 = vmatpush.msra.mxu0 %v3755_v60  ;;  %2039 = vmatpush.msrb.mxu2 %v3755_v60 }
 0xce5   :  { %1952 = vmatpush.msra.mxu1 %v3779_v45  ;;  %2059 = vmatpush.msrb.mxu3 %v3779_v45 }
 0xce6   :  { %1933 = vmatpush.msra.mxu0 %v3767_v61  ;;  %2040 = vmatpush.msrb.mxu2 %v3767_v61 }
 0xce7   :  { %1953 = vmatpush.msra.mxu1 %v3789_v1  ;;  %2060 = vmatpush.msrb.mxu3 %v3789_v1 }
 0xcea   :  { %2830 = vmatmul.msk.f32.gmra.mxu0 %vm428_vm9, %v1218_v0  ;;  %2838 = vmatmul.msk.f32.gmra.mxu1 %vm428_vm9, %v1218_v0 }
 0xceb   :  { %2846 = vmatmul.msk.f32.gmra.mxu2 %vm428_vm9, %v1218_v0  ;;  %2854 = vmatmul.msk.f32.gmra.mxu3 %vm428_vm9, %v1218_v0  ;;  %v3902_v0 = vperm.slane %v1607_v54, 0 }
 0xcf2   :  { %2831 = vmatmul.msk.f32.gmra.mxu0 %vm428_vm9, %v1219_v42  ;;  %2839 = vmatmul.msk.f32.gmra.mxu1 %vm428_vm9, %v1219_v42 }
 0xcf3   :  { %2847 = vmatmul.msk.f32.gmra.mxu2 %vm428_vm9, %v1219_v42  ;;  %2855 = vmatmul.msk.f32.gmra.mxu3 %vm428_vm9, %v1219_v42  ;;  %v3904_v42 = vperm.slane %v1607_v54, 1 }
 0xcfa   :  { %2832 = vmatmul.msk.f32.gmra.mxu0 %vm428_vm9, %v1220_v9  ;;  %2840 = vmatmul.msk.f32.gmra.mxu1 %vm428_vm9, %v1220_v9 }
 0xcfb   :  { %2848 = vmatmul.msk.f32.gmra.mxu2 %vm428_vm9, %v1220_v9  ;;  %2856 = vmatmul.msk.f32.gmra.mxu3 %vm428_vm9, %v1220_v9 }
 0xd02   :  { %2833 = vmatmul.msk.f32.gmra.mxu0 %vm428_vm9, %v1221_v3  ;;  %2841 = vmatmul.msk.f32.gmra.mxu1 %vm428_vm9, %v1221_v3 }
 0xd03   :  { %2849 = vmatmul.msk.f32.gmra.mxu2 %vm428_vm9, %v1221_v3  ;;  %2857 = vmatmul.msk.f32.gmra.mxu3 %vm428_vm9, %v1221_v3 }
 0xd0a   :  { %2834 = vmatmul.msk.f32.gmra.mxu0 %vm428_vm9, %v1222_v4  ;;  %2842 = vmatmul.msk.f32.gmra.mxu1 %vm428_vm9, %v1222_v4 }
 0xd0b   :  { %2850 = vmatmul.msk.f32.gmra.mxu2 %vm428_vm9, %v1222_v4  ;;  %2858 = vmatmul.msk.f32.gmra.mxu3 %vm428_vm9, %v1222_v4 }
 0xd0f   :  { %v3833_v5 = vpop.f32.mrf.mxu0  ;;  %v3835_v63 = vpop.f32.mrf.mxu1 }
 0xd12   :  { %1720 = vmatmul.f32.vlgmr.msrb.gmra.mxu0 %v3168_v31  ;;  %1740 = vmatmul.f32.vlgmr.msrb.gmra.mxu1 %v3168_v31 }
 0xd13   :  { %2140 = vmatpush.msrb.mxu0 %v3693_v21  ;;  %2160 = vmatpush.msrb.mxu1 %v3717_v26 }
 0xd15   :  { %2141 = vmatpush.msrb.mxu0 %v3701_v55  ;;  %2161 = vmatpush.msrb.mxu1 %v3729_v29 }
 0xd16   :  { %v1354_v6 = vpop.f32.mrf.mxu2  ;;  %v1395_v7 = vpop.f32.mrf.mxu3 }
 0xd17   :  { %v1275_v12 = vpop.f32.mrf.mxu0  ;;  %v1316_v52 = vpop.f32.mrf.mxu1  ;;  %2142 = vmatpush.msrb.mxu0 %v3709_v24  ;;  %2162 = vmatpush.msrb.mxu1 %v3741_v51 }
 0xd19   :  { %2143 = vmatpush.msrb.mxu0 %v3719_v27  ;;  %2163 = vmatpush.msrb.mxu1 %v3753_v58 }
 0xd1b   :  { %2144 = vmatpush.msrb.mxu0 %v3731_v30  ;;  %2164 = vmatpush.msrb.mxu1 %v3765_v48 }
 0xd1d   :  { %2145 = vmatpush.msrb.mxu0 %v3743_v20  ;;  %2165 = vmatpush.msrb.mxu1 %v3775_v62 }
 0xd1e   :  { %v1357_v31 = vpop.f32.mrf.mxu2  ;;  %v1398_v8 = vpop.f32.mrf.mxu3 }
 0xd1f   :  { %v1278_v46 = vpop.f32.mrf.mxu0  ;;  %v1319_v13 = vpop.f32.mrf.mxu1  ;;  %2146 = vmatpush.msrb.mxu0 %v3755_v60  ;;  %2166 = vmatpush.msrb.mxu1 %v3779_v45 }
 0xd21   :  { %2147 = vmatpush.msrb.mxu0 %v3767_v61  ;;  %2167 = vmatpush.msrb.mxu1 %v3789_v1 }
 0xd26   :  { %v1360_v2 = vpop.f32.mrf.mxu2  ;;  %v1401_v10 = vpop.f32.mrf.mxu3 }
 0xd27   :  { %v1281_v15 = vpop.f32.mrf.mxu0  ;;  %v1322_v57 = vpop.f32.mrf.mxu1 }
 0xd2e   :  { %v3855_v36 = vpop.f32.mrf.mxu2  ;;  %v3857_v39 = vpop.f32.mrf.mxu3 }
 0xd2f   :  { %v3859_v40 = vpop.f32.mrf.mxu0  ;;  %v3861_v11 = vpop.f32.mrf.mxu1 }
 0xd36   :  { %v3863_v41 = vpop.f32.mrf.mxu2  ;;  %v3865_v47 = vpop.f32.mrf.mxu3 }
 0xd37   :  { %v3867_v14 = vpop.f32.mrf.mxu0  ;;  %v3869_v50 = vpop.f32.mrf.mxu1 }
 0xd3e   :  { %v3871_v49 = vpop.f32.mrf.mxu2  ;;  %v3873_v33 = vpop.f32.mrf.mxu3 }
 0xd3f   :  { %v3875_v34 = vpop.f32.mrf.mxu0  ;;  %v3877_v44 = vpop.f32.mrf.mxu1 }
 0xd46   :  { %v3879_v35 = vpop.f32.mrf.mxu2  ;;  %v3881_v43 = vpop.f32.mrf.mxu3 }
 0xd47   :  { %v3883_v53 = vpop.f32.mrf.mxu0  ;;  %v3885_v56 = vpop.f32.mrf.mxu1 }
 0xd4e   :  { %v3887_v37 = vpop.f32.mrf.mxu2  ;;  %v3889_v16 = vpop.f32.mrf.mxu3 }
 0xd4f   :  { %v3891_v17 = vpop.f32.mrf.mxu0  ;;  %v3893_v18 = vpop.f32.mrf.mxu1 }
 0xd56   :  { %v1542_v22 = vpop.f32.mrf.mxu2  ;;  %v1583_v23 = vpop.f32.mrf.mxu3 }
 0xd57   :  { %v1543_v25 = vadd.f32 %v1542_v22, %v1354_v6  ;;  %v1584_v28 = vadd.f32 %v1583_v23, %v1395_v7  ;;  %v1463_v32 = vpop.f32.mrf.mxu0  ;;  %v1504_v59 = vpop.f32.mrf.mxu1 }
 0xd58   :  { %v1464_v9 = vadd.f32 %v1463_v32, %v1275_v12  ;;  %v1505_v3 = vadd.f32 %v1504_v59, %v1316_v52 }
 0xd59   :  { %v3907_v4 = vadd.f32 %v3898_v19, %v1543_v25  ;;  %v3910_v1 = vadd.f32 %v3900_v38, %v1584_v28 }
 0xd5a   :  { %v3913_v61 = vadd.f32 %v3902_v0, %v1464_v9  ;;  %v3916_v6 = vadd.f32 %v3904_v42, %v1505_v3 }
 0xd5e   :  { %v1545_v7 = vpop.f32.mrf.mxu2  ;;  %v1586_v22 = vpop.f32.mrf.mxu3 }
 0xd5f   :  { %v1546_v23 = vadd.f32 %v1545_v7, %v1357_v31  ;;  %v1587_v45 = vadd.f32 %v1586_v22, %v1398_v8  ;;  %v1466_v54 = vpop.f32.mrf.mxu0  ;;  %v1507_v60 = vpop.f32.mrf.mxu1 }
 0xd60   :  { %v1467_v12 = vadd.f32 %v1466_v54, %v1278_v46  ;;  %v1508_v52 = vadd.f32 %v1507_v60, %v1319_v13 }
 0xd61   :  { %v1623_v25 = vadd.f32 %v3898_v19, %v1546_v23  ;;  %v1624_v32 = vadd.f32 %v3900_v38, %v1587_v45 }
 0xd62   :  { %v1625_v28 = vadd.f32 %v3902_v0, %v1467_v12  ;;  %v1626_v59 = vadd.f32 %v3904_v42, %v1508_v52 }
 0xd66   :  { %v1548_v9 = vpop.f32.mrf.mxu2  ;;  %v1589_v62 = vpop.f32.mrf.mxu3 }
 0xd67   :  { %v1549_v3 = vadd.f32 %v1548_v9, %v1360_v2  ;;  %v1590_v20 = vadd.f32 %v1589_v62, %v1401_v10  ;;  %v1469_v48 = vpop.f32.mrf.mxu0  ;;  %v1510_v30 = vpop.f32.mrf.mxu1 }
 0xd68   :  { %v1470_v31 = vadd.f32 %v1469_v48, %v1281_v15  ;;  %v1511_v8 = vadd.f32 %v1510_v30, %v1322_v57 }
 0xd69   :  { %v1627_v7 = vadd.f32 %v3898_v19, %v1549_v3  ;;  %v1628_v60 = vadd.f32 %v3900_v38, %v1590_v20 }
 0xd6a   :  { %v1629_v46 = vadd.f32 %v3902_v0, %v1470_v31  ;;  %v1630_v45 = vadd.f32 %v3904_v42, %v1511_v8 }
 0xd6e   :  { %v1551_v13 = vpop.f32.mrf.mxu2  ;;  %v1592_v22 = vpop.f32.mrf.mxu3 }
 0xd6f   :  { %v1552_v23 = vadd.f32 %v1551_v13, %v3855_v36  ;;  %v1593_v54 = vadd.f32 %v1592_v22, %v3857_v39  ;;  %v1472_v2 = vpop.f32.mrf.mxu0  ;;  %v1513_v62 = vpop.f32.mrf.mxu1 }
 0xd70   :  { %v1473_v10 = vadd.f32 %v1472_v2, %v3859_v40  ;;  %v1514_v30 = vadd.f32 %v1513_v62, %v3861_v11 }
 0xd71   :  { %v1631_v48 = vadd.f32 %v3898_v19, %v1552_v23  ;;  %v1632_v20 = vadd.f32 %v3900_v38, %v1593_v54 }
 0xd72   :  { %v1633_v15 = vadd.f32 %v3902_v0, %v1473_v10  ;;  %v1634_v57 = vadd.f32 %v3904_v42, %v1514_v30 }
 0xd74   :  { %v3934_v12 = vadd.f32 %v1633_v15, %v1631_v48  ;;  %v3936_v52 = vadd.f32 %v1634_v57, %v1632_v20 }
 0xd76   :  { %v1554_v36 = vpop.f32.mrf.mxu2  ;;  %v1595_v39 = vpop.f32.mrf.mxu3 }
 0xd77   :  { %v1555_v9 = vadd.f32 %v1554_v36, %v3863_v41  ;;  %v1596_v40 = vadd.f32 %v1595_v39, %v3865_v47  ;;  %v1475_v3 = vpop.f32.mrf.mxu0  ;;  %v1516_v11 = vpop.f32.mrf.mxu1 }
 0xd78   :  { %v1476_v31 = vadd.f32 %v1475_v3, %v3867_v14  ;;  %v1517_v8 = vadd.f32 %v1516_v11, %v3869_v50 }
 0xd79   :  { %v1635_v13 = vadd.f32 %v3898_v19, %v1555_v9  ;;  %v1636_v22 = vadd.f32 %v3900_v38, %v1596_v40 }
 0xd7a   :  { %v1637_v23 = vadd.f32 %v3902_v0, %v1476_v31  ;;  %v1638_v54 = vadd.f32 %v3904_v42, %v1517_v8 }
 0xd7b   :  { %v3946_v2 = vadd.f32 %v1635_v13, %v1629_v46  ;;  %v3948_v62 = vadd.f32 %v1636_v22, %v1630_v45 }
 0xd7c   :  { %v3950_v41 = vadd.f32 %v1637_v23, %v1627_v7  ;;  %v3952_v47 = vadd.f32 %v1638_v54, %v1628_v60 }
 0xd7e   :  { %v1557_v10 = vpop.f32.mrf.mxu2  ;;  %v1598_v14 = vpop.f32.mrf.mxu3 }
 0xd7f   :  { %v1558_v50 = vadd.f32 %v1557_v10, %v3871_v49  ;;  %v1599_v30 = vadd.f32 %v1598_v14, %v3873_v33  ;;  %v1478_v48 = vpop.f32.mrf.mxu0  ;;  %v1519_v20 = vpop.f32.mrf.mxu1 }
 0xd80   :  { %v1479_v15 = vadd.f32 %v1478_v48, %v3875_v34  ;;  %v1520_v57 = vadd.f32 %v1519_v20, %v3877_v44 }
 0xd81   :  { %v1639_v46 = vadd.f32 %v3898_v19, %v1558_v50  ;;  %v1640_v45 = vadd.f32 %v3900_v38, %v1599_v30 }
 0xd82   :  { %v1641_v7 = vadd.f32 %v3902_v0, %v1479_v15  ;;  %v1642_v60 = vadd.f32 %v3904_v42, %v1520_v57 }
 0xd83   :  { %v3962_v36 = vadd.f32 %v1639_v46, %v1625_v28  ;;  %v3964_v39 = vadd.f32 %v1640_v45, %v1626_v59 }
 0xd84   :  { %v3966_v49 = vadd.f32 %v1641_v7, %v1623_v25  ;;  %v3968_v33 = vadd.f32 %v1642_v60, %v1624_v32 }
 0xd86   :  { %v1560_v9 = vpop.f32.mrf.mxu2  ;;  %v1601_v34 = vpop.f32.mrf.mxu3 }
 0xd87   :  { %v1561_v44 = vadd.f32 %v1560_v9, %v3879_v35  ;;  %v1602_v40 = vadd.f32 %v1601_v34, %v3881_v43  ;;  %v1481_v3 = vpop.f32.mrf.mxu0  ;;  %v1522_v11 = vpop.f32.mrf.mxu1 }
 0xd88   :  { %v1482_v31 = vadd.f32 %v1481_v3, %v3883_v53  ;;  %v1523_v8 = vadd.f32 %v1522_v11, %v3885_v56  ;;  %v1461_v56 = vadd.f32 %v3891_v17, %v3833_v5 }
 0xd89   :  { %v1643_v28 = vadd.f32 %v3898_v19, %v1561_v44  ;;  %v1644_v59 = vadd.f32 %v3900_v38, %v1602_v40 }
 0xd8a   :  { %v1645_v25 = vadd.f32 %v3902_v0, %v1482_v31  ;;  %v1646_v32 = vadd.f32 %v3904_v42, %v1523_v8  ;;  %v1617_v54 = vadd.f32 %v3902_v0, %v1461_v56 }
 0xd8b   :  { %v3979_v13 = vadd.f32 %v1643_v28, %v3913_v61  ;;  %v3982_v35 = vadd.f32 %v1644_v59, %v3916_v6 }
 0xd8c   :  { %v3985_v43 = vadd.f32 %v1645_v25, %v3907_v4  ;;  %v3988_v53 = vadd.f32 %v1646_v32, %v3910_v1  ;;  %v1502_v1 = vadd.f32 %v3893_v18, %v3835_v63 }
 0xd8e   :  { %v1563_v22 = vpop.f32.mrf.mxu2  ;;  %v1604_v30 = vpop.f32.mrf.mxu3 }
 0xd8f   :  { %v1564_v23 = vadd.f32 %v1563_v22, %v3887_v37  ;;  %v1721_v10 = vpop.f32.mrf.mxu0  ;;  %v1605_v4 = vadd.f32 %v1604_v30, %v3889_v16  ;;  %v1618_v37 = vadd.f32 %v3904_v42, %v1502_v1  ;;  %v4269_v30 = vld [vmem:[#allocation16_spill] sm:$0xff]  ;;  %v4271_v1 = vld [vmem:[#allocation18_spill] sm:$0xff] }
 0xd91   :  { %v1647_v61 = vadd.f32 %v3898_v19, %v1564_v23  ;;  %v1648_v5 = vadd.f32 %v3900_v38, %v1605_v4  ;;  %v1741_v19 = vpop.f32.mrf.mxu1  ;;  %v4270_v4 = vld [vmem:[#allocation14_spill] sm:$0xff] }
 0xd93   :  { %v1702_v14 = vadd.f32 %v1647_v61, %v1617_v54  ;;  %v1703_v0 = vadd.f32 %v1648_v5, %v1618_v37  ;;  %v4273_v5 = vld [vmem:[#allocation19_spill] sm:$0xff]  ;;  %v4275_v37 = vld [vmem:[#allocation20_spill] sm:$0xff] }
 0xd95   :  { %v1744_v6 = vadd.f32 %v1721_v10, %v1702_v14  ;;  %v1745_v15 = vadd.f32 %v1741_v19, %v1703_v0 }
 0xd97   :  { %v2859_v50 = vmul.f32 -1.442695, %v1744_v6  ;;  %v2860_v34 = vmul.f32 -1.442695, %v1745_v15 }
 0xd99   :  { %3014 = vpow2.f32 %v2859_v50  ;;  %v4268_v50 = vld [vmem:[#allocation13_spill] sm:$0xff] }
 0xd9f   :  { %v3015_v48 = vpop.eup %3014 }
 0xda0   :  { %v1752_v17 = vadd.f32 1.0, %v3015_v48  ;;  %v4272_v48 = vld [vmem:[#allocation15_spill] sm:$0xff] }
 0xda2   :  { %3016 = vrcp.f32 %v1752_v17  ;;  %v1765_v45 = vand.u32 2147483648, %v1752_v17  ;;  %v1763_v16 = vand.u32 2147483647, %v1752_v17  ;;  %vm1759_vm12 = vweird.f32 %v1752_v17 }
 0xda3   :  { %3018 = vtanh.f32 %v1745_v15 }
 0xda4   :  { %v1766_v63 = vor.u32 1.1754944e-38, %v1765_v45  ;;  %vm1764_vm14 = vcmp.eq.f32.partialorder %v1763_v16, 8.507059e+37  ;;  %3020 = vpow2.f32 %v2860_v34 }
 0xda8   :  { %v3017_v20 = vpop.eup %3016 }
 0xda9   :  { %v1755_v57 = vmul.f32 %v3017_v20, %v1752_v17  ;;  %vm1760_vm11 = vweird.f32 %v3017_v20  ;;  %v3019_v38 = vpop.eup %3018  ;;  %v4274_v17 = vld [vmem:[#allocation17_spill] sm:$0xff] }
 0xdaa   :  { %vm1761_vm13 = vmor %vm1759_vm12, %vm1760_vm11  ;;  %v3021_v44 = vpop.eup %3020 }
 0xdab   :  { %v1756_v46 = vsub.f32 1.0, %v1755_v57  ;;  %v1753_v40 = vadd.f32 1.0, %v3021_v44 }
 0xdad   :  { %v1757_v7 = vmul.f32 %v3017_v20, %v1756_v46  ;;  %3022 = vrcp.f32 %v1753_v40  ;;  %v1780_v56 = vand.u32 2147483648, %v1753_v40  ;;  %vm1774_vm0 = vweird.f32 %v1753_v40 }
 0xdae   :  { %v1778_v22 = vand.u32 2147483647, %v1753_v40 }
 0xdaf   :  { %v1758_v60 = vadd.f32 %v3017_v20, %v1757_v7  ;;  %v1781_v54 = vor.u32 1.1754944e-38, %v1780_v56 }
 0xdb0   :  { %vm1779_vm2 = vcmp.eq.f32.partialorder %v1778_v22, 8.507059e+37 }
 0xdb1   :  { %v1762_v18 = vsel %vm1761_vm13, %v3017_v20, %v1758_v60 }
 0xdb2   :  { %v1767_v42 = vsel %vm1764_vm14, %v1766_v63, %v1762_v18 }
 0xdb3   :  { %v1786_v9 = vmul.f32 %v3019_v38, %v1767_v42  ;;  %v3023_v3 = vpop.eup %3022  ;;  %v1785_v28 = vmul.f32 0.0, %v1767_v42 }
 0xdb4   :  { %v1770_v11 = vmul.f32 %v3023_v3, %v1753_v40  ;;  %vm1775_vm15 = vweird.f32 %v3023_v3 }
 0xdb5   :  { %1788 = vrot.lane.b32.xlu0 %v1786_v9, %s3169_s2  ;;  %vm1776_vm1 = vmor %vm1774_vm0, %vm1775_vm15 }
 0xdb6   :  { %v1771_v31 = vsub.f32 1.0, %v1770_v11 }
 0xdb8   :  { %v1772_v8 = vmul.f32 %v3023_v3, %v1771_v31 }
 0xdba   :  { %v1773_v32 = vadd.f32 %v3023_v3, %v1772_v8 }
 0xdbc   :  { %v1777_v23 = vsel %vm1776_vm1, %v3023_v3, %v1773_v32 }
 0xdbd   :  { %v1782_v10 = vsel %vm1779_vm2, %v1781_v54, %v1777_v23 }
 0xe27   :  { %v1789_v59 = vpop.permute.xlu0 %1788 }
 0xe28   :  { %v4001_v25 = vadd.f32 %v1789_v59, %v1785_v28 }
 0xe2a   :  { %3024 = vtanh.f32 %v4001_v25 }
 0xe30   :  { %v3025_v61 = vpop.eup %3024 }
 0xe31   :  { %v4004_v14 = vmul.f32 %v3025_v61, %v1782_v10 }
 0xe33   :  { %1795 = vrot.lane.b32.xlu1 %v4004_v14, %s3169_s2 }
 0xea5   :  { %v1796_v6 = vpop.permute.xlu1 %1795 }
 0xea6   :  { %1798 = vst.msk [vmem:[#allocation5] sm:$0xff] %vm428_vm9, %v1796_v6  ;;  %2861 = vmatmul.msk.f32.vlgmr.msra.gmra.mxu2 %vm330_vm10, %v1796_v6  ;;  %2862 = vmatmul.msk.f32.vlgmr.msra.gmra.mxu3 %vm330_vm10, %v1796_v6 }
 0xea7   :  { %2247 = vmatpush.msra.mxu2 %v3693_v21  ;;  %2267 = vmatpush.msra.mxu3 %v3717_v26 }
 0xea9   :  { %2248 = vmatpush.msra.mxu2 %v3701_v55  ;;  %2268 = vmatpush.msra.mxu3 %v3729_v29 }
 0xeab   :  { %2249 = vmatpush.msra.mxu2 %v3709_v24  ;;  %2269 = vmatpush.msra.mxu3 %v3741_v51 }
 0xead   :  { %2250 = vmatpush.msra.mxu2 %v3719_v27  ;;  %2270 = vmatpush.msra.mxu3 %v3753_v58 }
 0xeaf   :  { %2251 = vmatpush.msra.mxu2 %v4268_v50  ;;  %2271 = vmatpush.msra.mxu3 %v4269_v30 }
 0xeb1   :  { %2252 = vmatpush.msra.mxu2 %v4270_v4  ;;  %2272 = vmatpush.msra.mxu3 %v4271_v1 }
 0xeb3   :  { %2253 = vmatpush.msra.mxu2 %v4272_v48  ;;  %2273 = vmatpush.msra.mxu3 %v4273_v5 }
 0xeb5   :  { %2254 = vmatpush.msra.mxu2 %v4274_v17  ;;  %2274 = vmatpush.msra.mxu3 %v4275_v37 }
 0xf29   :  { %v1828_v0 = vpop.f32.mrf.mxu2  ;;  %v1848_v46 = vpop.f32.mrf.mxu3 }
 0xf2a   :  { %v1851_v19 = vadd.f32 %v1828_v0, %v3979_v13  ;;  %v1852_v7 = vadd.f32 %v1848_v46, %v3982_v35 }
 0xf2c   :  { %v2863_v20 = vmul.f32 -1.442695, %v1851_v19  ;;  %v2864_v3 = vmul.f32 -1.442695, %v1852_v7 }
 0xf2e   :  { %3026 = vpow2.f32 %v2863_v20 }
 0xf34   :  { %v3027_v15 = vpop.eup %3026 }
 0xf35   :  { %v1859_v57 = vadd.f32 1.0, %v3027_v15 }
 0xf37   :  { %3028 = vrcp.f32 %v1859_v57  ;;  %v1872_v63 = vand.u32 2147483648, %v1859_v57  ;;  %v1870_v38 = vand.u32 2147483647, %v1859_v57  ;;  %vm1866_vm4 = vweird.f32 %v1859_v57 }
 0xf38   :  { %3030 = vtanh.f32 %v1852_v7 }
 0xf39   :  { %v1873_v13 = vor.u32 1.1754944e-38, %v1872_v63  ;;  %vm1871_vm6 = vcmp.eq.f32.partialorder %v1870_v38, 8.507059e+37  ;;  %3032 = vpow2.f32 %v2864_v3 }
 0xf3d   :  { %v3029_v45 = vpop.eup %3028 }
 0xf3e   :  { %v1862_v16 = vmul.f32 %v3029_v45, %v1859_v57  ;;  %vm1867_vm3 = vweird.f32 %v3029_v45  ;;  %v3031_v34 = vpop.eup %3030 }
 0xf3f   :  { %vm1868_vm5 = vmor %vm1866_vm4, %vm1867_vm3  ;;  %v3033_v35 = vpop.eup %3032 }
 0xf40   :  { %v1863_v60 = vsub.f32 1.0, %v1862_v16  ;;  %v1860_v11 = vadd.f32 1.0, %v3033_v35 }
 0xf42   :  { %v1864_v18 = vmul.f32 %v3029_v45, %v1863_v60  ;;  %3034 = vrcp.f32 %v1860_v11  ;;  %v1887_v54 = vand.u32 2147483648, %v1860_v11  ;;  %vm1881_vm8 = vweird.f32 %v1860_v11 }
 0xf43   :  { %v1885_v61 = vand.u32 2147483647, %v1860_v11 }
 0xf44   :  { %v1865_v42 = vadd.f32 %v3029_v45, %v1864_v18  ;;  %v1888_v6 = vor.u32 1.1754944e-38, %v1887_v54 }
 0xf45   :  { %vm1886_vm12 = vcmp.eq.f32.partialorder %v1885_v61, 8.507059e+37 }
 0xf46   :  { %v1869_v9 = vsel %vm1868_vm5, %v3029_v45, %v1865_v42 }
 0xf47   :  { %v1874_v44 = vsel %vm1871_vm6, %v1873_v13, %v1869_v9 }
 0xf48   :  { %v1893_v40 = vmul.f32 %v3031_v34, %v1874_v44  ;;  %v3035_v31 = vpop.eup %3034  ;;  %v1892_v32 = vmul.f32 %v1874_v44, %v4001_v25 }
 0xf49   :  { %v1877_v8 = vmul.f32 %v3035_v31, %v1860_v11  ;;  %vm1882_vm7 = vweird.f32 %v3035_v31 }
 0xf4a   :  { %1895 = vrot.lane.b32.xlu2 %v1893_v40, %s3169_s2  ;;  %vm1883_vm11 = vmor %vm1881_vm8, %vm1882_vm7 }
 0xf4b   :  { %v1878_v28 = vsub.f32 1.0, %v1877_v8 }
 0xf4d   :  { %v1879_v59 = vmul.f32 %v3035_v31, %v1878_v28 }
 0xf4f   :  { %v1880_v23 = vadd.f32 %v3035_v31, %v1879_v59 }
 0xf51   :  { %v1884_v10 = vsel %vm1883_vm11, %v3035_v31, %v1880_v23 }
 0xf52   :  { %v1889_v19 = vsel %vm1886_vm12, %v1888_v6, %v1884_v10 }
 0xfa4   :  { %v1896_v56 = vpop.permute.xlu2 %1895 }
 0xfa5   :  { %v4031_v22 = vadd.f32 %v1896_v56, %v1892_v32 }
 0xfa7   :  { %3036 = vtanh.f32 %v4031_v22 }
 0xfad   :  { %v3037_v0 = vpop.eup %3036 }
 0xfae   :  { %v4034_v20 = vmul.f32 %v3037_v0, %v1889_v19 }
 0xfb0   :  { %1902 = vrot.lane.b32.xlu0 %v4034_v20, %s3169_s2 }
0x1022   :  { %v1903_v25 = vpop.permute.xlu0 %1902 }
0x1023   :  { %1905 = vst.msk [vmem:[#allocation5 + $0x8] sm:$0xff] %vm428_vm9, %v1903_v25  ;;  %2865 = vmatmul.msk.f32.vlgmr.msra.gmra.mxu0 %vm330_vm10, %v1903_v25  ;;  %2866 = vmatmul.msk.f32.vlgmr.msra.gmra.mxu1 %vm330_vm10, %v1903_v25 }
0x1024   :  { %2354 = vmatpush.msra.mxu0 %v3693_v21  ;;  %2374 = vmatpush.msra.mxu1 %v3717_v26 }
0x1026   :  { %2355 = vmatpush.msra.mxu0 %v3701_v55  ;;  %2375 = vmatpush.msra.mxu1 %v3729_v29 }
0x1028   :  { %2356 = vmatpush.msra.mxu0 %v3709_v24  ;;  %2376 = vmatpush.msra.mxu1 %v3741_v51 }
0x102a   :  { %2357 = vmatpush.msra.mxu0 %v3719_v27  ;;  %2377 = vmatpush.msra.mxu1 %v3753_v58 }
0x102c   :  { %2358 = vmatpush.msra.mxu0 %v4268_v50  ;;  %2378 = vmatpush.msra.mxu1 %v4269_v30 }
0x102e   :  { %2359 = vmatpush.msra.mxu0 %v4270_v4  ;;  %2379 = vmatpush.msra.mxu1 %v4271_v1 }
0x1030   :  { %2360 = vmatpush.msra.mxu0 %v4272_v48  ;;  %2380 = vmatpush.msra.mxu1 %v4273_v5 }
0x1032   :  { %2361 = vmatpush.msra.mxu0 %v4274_v17  ;;  %2381 = vmatpush.msra.mxu1 %v4275_v37 }
0x10a0   :  { %v1935_v15 = vpop.f32.mrf.mxu0  ;;  %v1955_v16 = vpop.f32.mrf.mxu1 }
0x10a1   :  { %v1958_v57 = vadd.f32 %v1935_v15, %v3962_v36  ;;  %v1959_v63 = vadd.f32 %v1955_v16, %v3964_v39 }
0x10a3   :  { %v2867_v46 = vmul.f32 -1.442695, %v1958_v57  ;;  %v2868_v11 = vmul.f32 -1.442695, %v1959_v63 }
0x10a5   :  { %3038 = vpow2.f32 %v2867_v46 }
0x10ab   :  { %v3039_v45 = vpop.eup %3038 }
0x10ac   :  { %v1966_v7 = vadd.f32 1.0, %v3039_v45 }
0x10ae   :  { %3040 = vrcp.f32 %v1966_v7  ;;  %v1979_v42 = vand.u32 2147483648, %v1966_v7  ;;  %v1977_v9 = vand.u32 2147483647, %v1966_v7  ;;  %vm1973_vm14 = vweird.f32 %v1966_v7 }
0x10af   :  { %3042 = vtanh.f32 %v1959_v63 }
0x10b0   :  { %v1980_v36 = vor.u32 1.1754944e-38, %v1979_v42  ;;  %vm1978_vm0 = vcmp.eq.f32.partialorder %v1977_v9, 8.507059e+37  ;;  %3044 = vpow2.f32 %v2868_v11 }
0x10b4   :  { %v3041_v60 = vpop.eup %3040 }
0x10b5   :  { %v1969_v18 = vmul.f32 %v3041_v60, %v1966_v7  ;;  %vm1974_vm13 = vweird.f32 %v3041_v60  ;;  %v3043_v40 = vpop.eup %3042 }
0x10b6   :  { %vm1975_vm15 = vmor %vm1973_vm14, %vm1974_vm13  ;;  %v3045_v39 = vpop.eup %3044 }
0x10b7   :  { %v1970_v38 = vsub.f32 1.0, %v1969_v18  ;;  %v1967_v31 = vadd.f32 1.0, %v3045_v39 }
0x10b9   :  { %v1971_v13 = vmul.f32 %v3041_v60, %v1970_v38  ;;  %3046 = vrcp.f32 %v1967_v31  ;;  %v1994_v10 = vand.u32 2147483648, %v1967_v31  ;;  %vm1988_vm2 = vweird.f32 %v1967_v31 }
0x10ba   :  { %v1992_v6 = vand.u32 2147483647, %v1967_v31 }
0x10bb   :  { %v1972_v34 = vadd.f32 %v3041_v60, %v1971_v13  ;;  %v1995_v19 = vor.u32 1.1754944e-38, %v1994_v10 }
0x10bc   :  { %vm1993_vm4 = vcmp.eq.f32.partialorder %v1992_v6, 8.507059e+37 }
0x10bd   :  { %v1976_v44 = vsel %vm1975_vm15, %v3041_v60, %v1972_v34 }
0x10be   :  { %v1981_v3 = vsel %vm1978_vm0, %v1980_v36, %v1976_v44 }
0x10bf   :  { %v2000_v35 = vmul.f32 %v3043_v40, %v1981_v3  ;;  %v3047_v8 = vpop.eup %3046  ;;  %v1999_v56 = vmul.f32 %v1981_v3, %v4031_v22 }
0x10c0   :  { %v1984_v28 = vmul.f32 %v3047_v8, %v1967_v31  ;;  %vm1989_vm1 = vweird.f32 %v3047_v8 }
0x10c1   :  { %2002 = vrot.lane.b32.xlu1 %v2000_v35, %s3169_s2  ;;  %vm1990_vm3 = vmor %vm1988_vm2, %vm1989_vm1 }
0x10c2   :  { %v1985_v59 = vsub.f32 1.0, %v1984_v28 }
0x10c4   :  { %v1986_v32 = vmul.f32 %v3047_v8, %v1985_v59 }
0x10c6   :  { %v1987_v61 = vadd.f32 %v3047_v8, %v1986_v32 }
0x10c8   :  { %v1991_v0 = vsel %vm1990_vm3, %v3047_v8, %v1987_v61 }
0x10c9   :  { %v1996_v15 = vsel %vm1993_vm4, %v1995_v19, %v1991_v0 }
0x1133   :  { %v2003_v23 = vpop.permute.xlu1 %2002 }
0x1134   :  { %v4061_v54 = vadd.f32 %v2003_v23, %v1999_v56 }
0x1136   :  { %3048 = vtanh.f32 %v4061_v54 }
0x113c   :  { %v3049_v25 = vpop.eup %3048 }
0x113d   :  { %v4064_v57 = vmul.f32 %v3049_v25, %v1996_v15 }
0x113f   :  { %2009 = vrot.lane.b32.xlu2 %v4064_v57, %s3169_s2 }
0x1199   :  { %v2010_v22 = vpop.permute.xlu2 %2009 }
0x119a   :  { %2012 = vst.msk [vmem:[#allocation5 + $0x10] sm:$0xff] %vm428_vm9, %v2010_v22  ;;  %2869 = vmatmul.msk.f32.vlgmr.msrb.gmra.mxu2 %vm330_vm10, %v2010_v22  ;;  %2870 = vmatmul.msk.f32.vlgmr.msrb.gmra.mxu3 %vm330_vm10, %v2010_v22 }
0x119b   :  { %2461 = vmatpush.msrb.mxu2 %v3693_v21  ;;  %2481 = vmatpush.msrb.mxu3 %v3717_v26 }
0x119d   :  { %2462 = vmatpush.msrb.mxu2 %v3701_v55  ;;  %2482 = vmatpush.msrb.mxu3 %v3729_v29 }
0x119f   :  { %2463 = vmatpush.msrb.mxu2 %v3709_v24  ;;  %2483 = vmatpush.msrb.mxu3 %v3741_v51 }
0x11a1   :  { %2464 = vmatpush.msrb.mxu2 %v3719_v27  ;;  %2484 = vmatpush.msrb.mxu3 %v3753_v58 }
0x11a3   :  { %2465 = vmatpush.msrb.mxu2 %v4268_v50  ;;  %2485 = vmatpush.msrb.mxu3 %v4269_v30 }
0x11a5   :  { %2466 = vmatpush.msrb.mxu2 %v4270_v4  ;;  %2486 = vmatpush.msrb.mxu3 %v4271_v1 }
0x11a7   :  { %2467 = vmatpush.msrb.mxu2 %v4272_v48  ;;  %2487 = vmatpush.msrb.mxu3 %v4273_v5 }
0x11a9   :  { %2468 = vmatpush.msrb.mxu2 %v4274_v17  ;;  %2488 = vmatpush.msrb.mxu3 %v4275_v37 }
0x121d   :  { %v2042_v21 = vpop.f32.mrf.mxu2  ;;  %v2062_v29 = vpop.f32.mrf.mxu3 }
0x121e   :  { %v2065_v55 = vadd.f32 %v2042_v21, %v3946_v2  ;;  %v2066_v58 = vadd.f32 %v2062_v29, %v3948_v62 }
0x1220   :  { %v2871_v24 = vmul.f32 -1.442695, %v2065_v55  ;;  %v2872_v7 = vmul.f32 -1.442695, %v2066_v58 }
0x1222   :  { %3050 = vpow2.f32 %v2871_v24 }
0x1228   :  { %v3051_v26 = vpop.eup %3050 }
0x1229   :  { %v2073_v27 = vadd.f32 1.0, %v3051_v26 }
0x122b   :  { %3052 = vrcp.f32 %v2073_v27  ;;  %v2086_v4 = vand.u32 2147483648, %v2073_v27  ;;  %v2084_v48 = vand.u32 2147483647, %v2073_v27  ;;  %vm2080_vm6 = vweird.f32 %v2073_v27 }
0x122c   :  { %3054 = vtanh.f32 %v2066_v58 }
0x122d   :  { %v2087_v2 = vor.u32 1.1754944e-38, %v2086_v4  ;;  %vm2085_vm8 = vcmp.eq.f32.partialorder %v2084_v48, 8.507059e+37  ;;  %3056 = vpow2.f32 %v2872_v7 }
0x1231   :  { %v3053_v51 = vpop.eup %3052 }
0x1232   :  { %v2076_v50 = vmul.f32 %v3053_v51, %v2073_v27  ;;  %vm2081_vm5 = vweird.f32 %v3053_v51  ;;  %v3055_v37 = vpop.eup %3054 }
0x1233   :  { %vm2082_vm7 = vmor %vm2080_vm6, %vm2081_vm5  ;;  %v3057_v62 = vpop.eup %3056 }
0x1234   :  { %v2077_v30 = vsub.f32 1.0, %v2076_v50  ;;  %v2074_v16 = vadd.f32 1.0, %v3057_v62 }
0x1236   :  { %v2078_v1 = vmul.f32 %v3053_v51, %v2077_v30  ;;  %3058 = vrcp.f32 %v2074_v16  ;;  %v2101_v36 = vand.u32 2147483648, %v2074_v16  ;;  %vm2095_vm12 = vweird.f32 %v2074_v16 }
0x1237   :  { %v2099_v44 = vand.u32 2147483647, %v2074_v16 }
0x1238   :  { %v2079_v5 = vadd.f32 %v3053_v51, %v2078_v1  ;;  %v2102_v3 = vor.u32 1.1754944e-38, %v2101_v36 }
0x1239   :  { %vm2100_vm14 = vcmp.eq.f32.partialorder %v2099_v44, 8.507059e+37 }
0x123a   :  { %v2083_v17 = vsel %vm2082_vm7, %v3053_v51, %v2079_v5 }
0x123b   :  { %v2088_v46 = vsel %vm2085_vm8, %v2087_v2, %v2083_v17 }
0x123c   :  { %v2107_v45 = vmul.f32 %v3055_v37, %v2088_v46  ;;  %v3059_v60 = vpop.eup %3058  ;;  %v2106_v42 = vmul.f32 %v2088_v46, %v4061_v54 }
0x123d   :  { %v2091_v63 = vmul.f32 %v3059_v60, %v2074_v16  ;;  %vm2096_vm11 = vweird.f32 %v3059_v60 }
0x123e   :  { %2109 = vrot.lane.b32.xlu0 %v2107_v45, %s3169_s2  ;;  %vm2097_vm13 = vmor %vm2095_vm12, %vm2096_vm11 }
0x123f   :  { %v2092_v18 = vsub.f32 1.0, %v2091_v63 }
0x1241   :  { %v2093_v38 = vmul.f32 %v3059_v60, %v2092_v18 }
0x1243   :  { %v2094_v34 = vadd.f32 %v3059_v60, %v2093_v38 }
0x1245   :  { %v2098_v40 = vsel %vm2097_vm13, %v3059_v60, %v2094_v34 }
0x1246   :  { %v2103_v11 = vsel %vm2100_vm14, %v2102_v3, %v2098_v40 }
0x12b0   :  { %v2110_v13 = vpop.permute.xlu0 %2109 }
0x12b1   :  { %v2112_v9 = vadd.f32 %v2110_v13, %v2106_v42 }
0x12b3   :  { %3060 = vtanh.f32 %v2112_v9 }
0x12b9   :  { %v3061_v35 = vpop.eup %3060 }
0x12ba   :  { %v4091_v39 = vmul.f32 %v3061_v35, %v2103_v11 }
0x12bc   :  { %2116 = vrot.lane.b32.xlu1 %v4091_v39, %s3169_s2 }
0x132e   :  { %v2117_v31 = vpop.permute.xlu1 %2116 }
0x132f   :  { %2119 = vst.msk [vmem:[#allocation5 + $0x18] sm:$0xff] %vm428_vm9, %v2117_v31  ;;  %2873 = vmatmul.msk.f32.vlgmr.msrb.gmra.mxu0 %vm330_vm10, %v2117_v31  ;;  %2874 = vmatmul.msk.f32.vlgmr.msrb.gmra.mxu1 %vm330_vm10, %v2117_v31 }
0x13ac   :  { %v2149_v8 = vpop.f32.mrf.mxu0  ;;  %v2169_v23 = vpop.f32.mrf.mxu1 }
0x13ad   :  { %v2172_v28 = vadd.f32 %v2149_v8, %v3934_v12  ;;  %v2173_v61 = vadd.f32 %v2169_v23, %v3936_v52 }
0x13af   :  { %v2875_v59 = vmul.f32 -1.442695, %v2172_v28  ;;  %v2876_v26 = vmul.f32 -1.442695, %v2173_v61 }
0x13b1   :  { %3062 = vpow2.f32 %v2875_v59 }
0x13b7   :  { %v3063_v32 = vpop.eup %3062 }
0x13b8   :  { %v2180_v56 = vadd.f32 1.0, %v3063_v32 }
0x13ba   :  { %3064 = vrcp.f32 %v2180_v56  ;;  %v2193_v0 = vand.u32 2147483648, %v2180_v56  ;;  %v2191_v25 = vand.u32 2147483647, %v2180_v56  ;;  %vm2187_vm0 = vweird.f32 %v2180_v56 }
0x13bb   :  { %3066 = vtanh.f32 %v2173_v61 }
0x13bc   :  { %v2194_v12 = vor.u32 1.1754944e-38, %v2193_v0  ;;  %vm2192_vm2 = vcmp.eq.f32.partialorder %v2191_v25, 8.507059e+37  ;;  %3068 = vpow2.f32 %v2876_v26  ;;  %v2555_v26 = vld [vmem:[%s4241_s6 + $0x18] sm:$0xff] }
0x13bd   :  { %2677 = vmatpush.msrb.mxu1 %v2555_v26 }
0x13c0   :  { %v3065_v54 = vpop.eup %3064 }
0x13c1   :  { %v2183_v10 = vmul.f32 %v3065_v54, %v2180_v56  ;;  %vm2188_vm15 = vweird.f32 %v3065_v54  ;;  %v3067_v21 = vpop.eup %3066 }
0x13c2   :  { %vm2189_vm1 = vmor %vm2187_vm0, %vm2188_vm15  ;;  %v3069_v52 = vpop.eup %3068 }
0x13c3   :  { %v2184_v6 = vsub.f32 1.0, %v2183_v10  ;;  %v2181_v27 = vadd.f32 1.0, %v3069_v52  ;;  %v2554_v52 = vld [vmem:[%s4241_s6 + $0x10] sm:$0xff] }
0x13c4   :  { %2678 = vmatpush.msrb.mxu1 %v2554_v52 }
0x13c5   :  { %v2185_v19 = vmul.f32 %v3065_v54, %v2184_v6  ;;  %3070 = vrcp.f32 %v2181_v27  ;;  %v2208_v5 = vand.u32 2147483648, %v2181_v27  ;;  %vm2202_vm4 = vweird.f32 %v2181_v27 }
0x13c6   :  { %v2206_v2 = vand.u32 2147483647, %v2181_v27 }
0x13c7   :  { %v2186_v15 = vadd.f32 %v3065_v54, %v2185_v19  ;;  %v2209_v37 = vor.u32 1.1754944e-38, %v2208_v5 }
0x13c8   :  { %vm2207_vm6 = vcmp.eq.f32.partialorder %v2206_v2, 8.507059e+37 }
0x13c9   :  { %v2190_v22 = vsel %vm2189_vm1, %v3065_v54, %v2186_v15 }
0x13ca   :  { %v2195_v55 = vsel %vm2192_vm2, %v2194_v12, %v2190_v22 }
0x13cb   :  { %v2214_v24 = vmul.f32 %v3067_v21, %v2195_v55  ;;  %v3071_v29 = vpop.eup %3070  ;;  %v2213_v30 = vmul.f32 %v2195_v55, %v2112_v9 }
0x13cc   :  { %v2198_v51 = vmul.f32 %v3071_v29, %v2181_v27  ;;  %vm2203_vm3 = vweird.f32 %v3071_v29  ;;  %v2553_v27 = vld [vmem:[%s4241_s6 + $0x8] sm:$0xff] }
0x13cd   :  { %2216 = vrot.lane.b32.xlu2 %v2214_v24, %s3169_s2  ;;  %vm2204_vm5 = vmor %vm2202_vm4, %vm2203_vm3  ;;  %2679 = vmatpush.msrb.mxu1 %v2553_v27 }
0x13ce   :  { %v2199_v58 = vsub.f32 1.0, %v2198_v51 }
0x13d0   :  { %v2200_v50 = vmul.f32 %v3071_v29, %v2199_v58  ;;  %v2560_v58 = vld [vmem:[#allocation5] sm:$0xff] }
0x13d2   :  { %v2201_v48 = vadd.f32 %v3071_v29, %v2200_v50  ;;  %v2561_v50 = vld [vmem:[#allocation5 + $0x8] sm:$0xff] }
0x13d4   :  { %v2205_v17 = vsel %vm2204_vm5, %v3071_v29, %v2201_v48  ;;  %v2552_v29 = vld [vmem:[%s4241_s6] sm:$0xff] }
0x13d5   :  { %v2210_v45 = vsel %vm2207_vm6, %v2209_v37, %v2205_v17  ;;  %2680 = vmatpush.msrb.mxu1 %v2552_v29 }
0x1427   :  { %v2217_v4 = vpop.permute.xlu2 %2216 }
0x1428   :  { %v2219_v1 = vadd.f32 %v2217_v4, %v2213_v30  ;;  %v2562_v30 = vld [vmem:[#allocation5 + $0x10] sm:$0xff]  ;;  %v2563_v4 = vld [vmem:[#allocation5 + $0x18] sm:$0xff] }
0x142a   :  { %3072 = vtanh.f32 %v2219_v1 }
0x1430   :  { %v3073_v46 = vpop.eup %3072 }
0x1431   :  { %v4101_v7 = vmul.f32 %v3073_v46, %v2210_v45 }
0x1433   :  { %2223 = vrot.lane.b32.xlu0 %v4101_v7, %s3169_s2 }
0x14a5   :  { %v2224_v62 = vpop.permute.xlu0 %2223 }
0x14a6   :  { %2226 = vst.msk [vmem:[#allocation5 + $0x20] sm:$0xff] %vm428_vm9, %v2224_v62  ;;  %2877 = vmatmul.msk.f32.vlgmr.msra.gmra.mxu2 %vm330_vm10, %v2224_v62  ;;  %2878 = vmatmul.msk.f32.vlgmr.msra.gmra.mxu3 %vm330_vm10, %v2224_v62 }
0x1529   :  { %v2256_v16 = vpop.f32.mrf.mxu2  ;;  %v2276_v42 = vpop.f32.mrf.mxu3 }
0x152a   :  { %v2279_v60 = vadd.f32 %v2256_v16, %v3950_v41  ;;  %v2280_v9 = vadd.f32 %v2276_v42, %v3952_v47 }
0x152c   :  { %v2879_v63 = vmul.f32 -1.442695, %v2279_v60  ;;  %v2880_v59 = vmul.f32 -1.442695, %v2280_v9 }
0x152e   :  { %3074 = vpow2.f32 %v2879_v63 }
0x1534   :  { %v3075_v18 = vpop.eup %3074 }
0x1535   :  { %v2287_v38 = vadd.f32 1.0, %v3075_v18 }
0x1537   :  { %3076 = vrcp.f32 %v2287_v38  ;;  %v2300_v44 = vand.u32 2147483648, %v2287_v38  ;;  %v2298_v3 = vand.u32 2147483647, %v2287_v38  ;;  %vm2294_vm8 = vweird.f32 %v2287_v38 }
0x1538   :  { %3078 = vtanh.f32 %v2280_v9 }
0x1539   :  { %v2301_v41 = vor.u32 1.1754944e-38, %v2300_v44  ;;  %vm2299_vm12 = vcmp.eq.f32.partialorder %v2298_v3, 8.507059e+37  ;;  %3080 = vpow2.f32 %v2880_v59 }
0x153d   :  { %v3077_v13 = vpop.eup %3076 }
0x153e   :  { %v2290_v34 = vmul.f32 %v3077_v13, %v2287_v38  ;;  %vm2295_vm7 = vweird.f32 %v3077_v13  ;;  %v3079_v31 = vpop.eup %3078 }
0x153f   :  { %vm2296_vm11 = vmor %vm2294_vm8, %vm2295_vm7  ;;  %v3081_v47 = vpop.eup %3080 }
0x1540   :  { %v2291_v36 = vsub.f32 1.0, %v2290_v34  ;;  %v2288_v32 = vadd.f32 1.0, %v3081_v47 }
0x1542   :  { %v2292_v40 = vmul.f32 %v3077_v13, %v2291_v36  ;;  %3082 = vrcp.f32 %v2288_v32  ;;  %v2315_v25 = vand.u32 2147483648, %v2288_v32  ;;  %vm2309_vm14 = vweird.f32 %v2288_v32 }
0x1543   :  { %v2313_v15 = vand.u32 2147483647, %v2288_v32 }
0x1544   :  { %v2293_v35 = vadd.f32 %v3077_v13, %v2292_v40  ;;  %v2316_v22 = vor.u32 1.1754944e-38, %v2315_v25 }
0x1545   :  { %vm2314_vm0 = vcmp.eq.f32.partialorder %v2313_v15, 8.507059e+37 }
0x1546   :  { %v2297_v11 = vsel %vm2296_vm11, %v3077_v13, %v2293_v35 }
0x1547   :  { %v2302_v8 = vsel %vm2299_vm12, %v2301_v41, %v2297_v11 }
0x1548   :  { %v2321_v28 = vmul.f32 %v3079_v31, %v2302_v8  ;;  %v3083_v56 = vpop.eup %3082  ;;  %v2320_v10 = vmul.f32 %v2302_v8, %v2219_v1  ;;  %v2564_v1 = vld [vmem:[#allocation5 + $0x20] sm:$0xff] }
0x1549   :  { %v2305_v23 = vmul.f32 %v3083_v56, %v2288_v32  ;;  %vm2310_vm13 = vweird.f32 %v3083_v56 }
0x154a   :  { %2323 = vrot.lane.b32.xlu1 %v2321_v28, %s3169_s2  ;;  %vm2311_vm15 = vmor %vm2309_vm14, %vm2310_vm13 }
0x154b   :  { %v2306_v54 = vsub.f32 1.0, %v2305_v23 }
0x154d   :  { %v2307_v61 = vmul.f32 %v3083_v56, %v2306_v54 }
0x154f   :  { %v2308_v19 = vadd.f32 %v3083_v56, %v2307_v61 }
0x1551   :  { %v2312_v12 = vsel %vm2311_vm15, %v3083_v56, %v2308_v19 }
0x1552   :  { %v2317_v55 = vsel %vm2314_vm0, %v2316_v22, %v2312_v12 }
0x15bc   :  { %v2324_v6 = vpop.permute.xlu1 %2323 }
0x15bd   :  { %v4111_v0 = vadd.f32 %v2324_v6, %v2320_v10 }
0x15bf   :  { %3084 = vtanh.f32 %v4111_v0 }
0x15c5   :  { %v3085_v21 = vpop.eup %3084 }
0x15c6   :  { %v4114_v24 = vmul.f32 %v3085_v21, %v2317_v55 }
0x15c8   :  { %2330 = vrot.lane.b32.xlu2 %v4114_v24, %s3169_s2 }
0x1622   :  { %v2331_v51 = vpop.permute.xlu2 %2330 }
0x1623   :  { %2333 = vst.msk [vmem:[#allocation5 + $0x28] sm:$0xff] %vm428_vm9, %v2331_v51  ;;  %2881 = vmatmul.msk.f32.vlgmr.msra.gmra.mxu0 %vm330_vm10, %v2331_v51  ;;  %2882 = vmatmul.msk.f32.vlgmr.msra.gmra.mxu1 %vm330_vm10, %v2331_v51 }
0x162a   :  { %v2565_v48 = vld [vmem:[#allocation5 + $0x28] sm:$0xff] }
0x162b   :  { %2897 = vmatmul.msk.f32.vlgmr.msrb.gmra.mxu1 %vm428_vm9, %v2560_v58 }
0x1633   :  { %2898 = vmatmul.msk.f32.gmra.mxu1 %vm428_vm9, %v2561_v50 }
0x163b   :  { %2899 = vmatmul.msk.f32.gmra.mxu1 %vm428_vm9, %v2562_v30 }
0x1643   :  { %2900 = vmatmul.msk.f32.gmra.mxu1 %vm428_vm9, %v2563_v4 }
0x164b   :  { %2901 = vmatmul.msk.f32.gmra.mxu1 %vm428_vm9, %v2564_v1 }
0x1653   :  { %2902 = vmatmul.msk.f32.gmra.mxu1 %vm428_vm9, %v2565_v48 }
0x16a0   :  { %v2363_v5 = vpop.f32.mrf.mxu0  ;;  %v2383_v45 = vpop.f32.mrf.mxu1 }
0x16a1   :  { %v2386_v2 = vadd.f32 %v2363_v5, %v3966_v49  ;;  %v2387_v16 = vadd.f32 %v2383_v45, %v3968_v33 }
0x16a3   :  { %v2883_v17 = vmul.f32 -1.442695, %v2386_v2  ;;  %v2884_v40 = vmul.f32 -1.442695, %v2387_v16 }
0x16a5   :  { %3086 = vpow2.f32 %v2883_v17 }
0x16ab   :  { %v3087_v37 = vpop.eup %3086 }
0x16ac   :  { %v2394_v46 = vadd.f32 1.0, %v3087_v37 }
0x16ae   :  { %3088 = vrcp.f32 %v2394_v46  ;;  %v2407_v18 = vand.u32 2147483648, %v2394_v46  ;;  %v2405_v42 = vand.u32 2147483647, %v2394_v46  ;;  %vm2401_vm2 = vweird.f32 %v2394_v46 }
0x16af   :  { %3090 = vtanh.f32 %v2387_v16 }
0x16b0   :  { %v2408_v49 = vor.u32 1.1754944e-38, %v2407_v18  ;;  %vm2406_vm4 = vcmp.eq.f32.partialorder %v2405_v42, 8.507059e+37  ;;  %3092 = vpow2.f32 %v2884_v40  ;;  %v2559_v40 = vld [vmem:[%s4241_s6 + $0x38] sm:$0xff] }
0x16b1   :  { %2612 = vmatpush.msrb.mxu0 %v2559_v40 }
0x16b4   :  { %v3089_v62 = vpop.eup %3088 }
0x16b5   :  { %v2397_v60 = vmul.f32 %v3089_v62, %v2394_v46  ;;  %vm2402_vm1 = vweird.f32 %v3089_v62  ;;  %v3091_v34 = vpop.eup %3090 }
0x16b6   :  { %vm2403_vm3 = vmor %vm2401_vm2, %vm2402_vm1  ;;  %v3093_v33 = vpop.eup %3092  ;;  %vm2718_vm2 = vcmask 64512  }
0x16b7   :  { %v2398_v63 = vsub.f32 1.0, %v2397_v60  ;;  %v2395_v3 = vadd.f32 1.0, %v3093_v33  ;;  %v2558_v33 = vld [vmem:[%s4241_s6 + $0x30] sm:$0xff] }
0x16b8   :  { %2613 = vmatpush.msrb.mxu0 %v2558_v33 }
0x16b9   :  { %v2399_v38 = vmul.f32 %v3089_v62, %v2398_v63  ;;  %3094 = vrcp.f32 %v2395_v3  ;;  %v2422_v32 = vand.u32 2147483648, %v2395_v3  ;;  %vm2416_vm6 = vweird.f32 %v2395_v3 }
0x16ba   :  { %v2420_v56 = vand.u32 2147483647, %v2395_v3 }
0x16bb   :  { %v2400_v13 = vadd.f32 %v3089_v62, %v2399_v38  ;;  %v2423_v54 = vor.u32 1.1754944e-38, %v2422_v32 }
0x16bc   :  { %vm2421_vm8 = vcmp.eq.f32.partialorder %v2420_v56, 8.507059e+37 }
0x16bd   :  { %v2404_v9 = vsel %vm2403_vm3, %v3089_v62, %v2400_v13 }
0x16be   :  { %v2409_v36 = vsel %vm2406_vm4, %v2408_v49, %v2404_v9 }
0x16bf   :  { %v2428_v44 = vmul.f32 %v3091_v34, %v2409_v36  ;;  %v3095_v35 = vpop.eup %3094  ;;  %v2427_v8 = vmul.f32 %v2409_v36, %v4111_v0 }
0x16c0   :  { %v2412_v41 = vmul.f32 %v3095_v35, %v2395_v3  ;;  %vm2417_vm5 = vweird.f32 %v3095_v35  ;;  %v2557_v3 = vld [vmem:[%s4241_s6 + $0x28] sm:$0xff] }
0x16c1   :  { %2430 = vrot.lane.b32.xlu0 %v2428_v44, %s3169_s2  ;;  %vm2418_vm7 = vmor %vm2416_vm6, %vm2417_vm5  ;;  %2614 = vmatpush.msrb.mxu0 %v2557_v3 }
0x16c2   :  { %v2413_v11 = vsub.f32 1.0, %v2412_v41 }
0x16c4   :  { %v2414_v31 = vmul.f32 %v3095_v35, %v2413_v11 }
0x16c6   :  { %v2415_v47 = vadd.f32 %v3095_v35, %v2414_v31 }
0x16c8   :  { %v2419_v23 = vsel %vm2418_vm7, %v3095_v35, %v2415_v47 }
0x16c9   :  { %v2424_v10 = vsel %vm2421_vm8, %v2423_v54, %v2419_v23 }
0x1733   :  { %v2431_v28 = vpop.permute.xlu0 %2430 }
0x1734   :  { %v4143_v59 = vadd.f32 %v2431_v28, %v2427_v8 }
0x1736   :  { %3096 = vtanh.f32 %v4143_v59 }
0x173c   :  { %v3097_v61 = vpop.eup %3096 }
0x173d   :  { %v2435_v6 = vmul.f32 %v3097_v61, %v2424_v10  ;;  %v2682_v61 = vpop.f32.mrf.mxu1  ;;  %v2917_v10 = vld [vmem:[%s4242_s7] ss:$0 sm:$0xff] }
0x173f   :  { %2437 = vrot.lane.b32.xlu1 %v2435_v6, %s3169_s2 }
0x1747   :  { %2441 = vrot.lane.b32.xlu1 %v2435_v6, %s3167_s18  ;;  %v2685_v6 = vpop.f32.mrf.mxu1 }
0x174f   :  { %2120 = vrot.lane.b32.xlu1 %v4091_v39, %s3167_s18 }
0x1757   :  { %1799 = vrot.lane.b32.xlu1 %v4004_v14, %s3167_s18 }
0x17b1   :  { %v2438_v0 = vpop.permute.xlu1 %2437 }
0x17b2   :  { %2440 = vst.msk [vmem:[#allocation5 + $0x30] sm:$0xff] %vm428_vm9, %v2438_v0  ;;  %2885 = vmatmul.msk.f32.vlgmr.msrb.gmra.mxu2 %vm330_vm10, %v2438_v0  ;;  %2886 = vmatmul.msk.f32.vlgmr.msrb.gmra.mxu3 %vm330_vm10, %v2438_v0 }
0x17b9   :  { %v2442_v19 = vpop.permute.xlu1 %2441  ;;  %v2566_v25 = vld [vmem:[#allocation5 + $0x30] sm:$0xff] }
0x17ba   :  { %2444 = vst.msk [vmem:[#allocation6 + $0x8] sm:$0xff] %vm428_vm9, %v2442_v19  ;;  %2903 = vmatmul.msk.f32.gmra.mxu1 %vm428_vm9, %v2566_v25 }
0x17c1   :  { %v2121_v15 = vpop.permute.xlu1 %2120  ;;  %v2569_v28 = vld [vmem:[#allocation6 + $0x8] sm:$0xff] }
0x17c2   :  { %2123 = vst.msk [vmem:[#allocation6 + $0x20] sm:$0xff] %vm428_vm9, %v2121_v15 }
0x17c9   :  { %v1800_v39 = vpop.permute.xlu1 %1799  ;;  %v2572_v32 = vld [vmem:[#allocation6 + $0x20] sm:$0xff] }
0x17ca   :  { %1802 = vst.msk [vmem:[#allocation6 + $0x38] sm:$0xff] %vm428_vm9, %v1800_v39 }
0x17d1   :  { %v2575_v54 = vld [vmem:[#allocation6 + $0x38] sm:$0xff] }
0x1835   :  { %v2470_v14 = vpop.f32.mrf.mxu2  ;;  %v2490_v26 = vpop.f32.mrf.mxu3 }
0x1836   :  { %v2493_v12 = vadd.f32 %v2470_v14, %v3985_v43  ;;  %v2494_v27 = vadd.f32 %v2490_v26, %v3988_v53  ;;  %v2688_v14 = vpop.f32.mrf.mxu1 }
0x1838   :  { %v2887_v22 = vmul.f32 -1.442695, %v2493_v12  ;;  %v2888_v53 = vmul.f32 -1.442695, %v2494_v27 }
0x183a   :  { %3098 = vpow2.f32 %v2887_v22 }
0x183e   :  { %v2691_v26 = vpop.f32.mrf.mxu1 }
0x1840   :  { %v3099_v21 = vpop.eup %3098 }
0x1841   :  { %v2501_v55 = vadd.f32 1.0, %v3099_v21 }
0x1843   :  { %3100 = vrcp.f32 %v2501_v55  ;;  %v2514_v58 = vand.u32 2147483648, %v2501_v55  ;;  %v2512_v30 = vand.u32 2147483647, %v2501_v55  ;;  %vm2508_vm11 = vweird.f32 %v2501_v55 }
0x1844   :  { %3102 = vtanh.f32 %v2494_v27 }
0x1845   :  { %v2515_v43 = vor.u32 1.1754944e-38, %v2514_v58  ;;  %vm2513_vm13 = vcmp.eq.f32.partialorder %v2512_v30, 8.507059e+37  ;;  %3104 = vpow2.f32 %v2888_v53 }
0x1849   :  { %v3101_v52 = vpop.eup %3100 }
0x184a   :  { %v2504_v29 = vmul.f32 %v3101_v52, %v2501_v55  ;;  %vm2509_vm10 = vweird.f32 %v3101_v52  ;;  %v3103_v48 = vpop.eup %3102 }
0x184b   :  { %vm2510_vm12 = vmor %vm2508_vm11, %vm2509_vm10  ;;  %v3105_v17 = vpop.eup %3104 }
0x184c   :  { %v2505_v51 = vsub.f32 1.0, %v2504_v29  ;;  %v2502_v37 = vadd.f32 1.0, %v3105_v17 }
0x184e   :  { %v2506_v50 = vmul.f32 %v3101_v52, %v2505_v51  ;;  %3106 = vrcp.f32 %v2502_v37  ;;  %vm2523_vm15 = vweird.f32 %v2502_v37  ;;  %v2527_v42 = vand.u32 2147483647, %v2502_v37  ;;  %v2694_v51 = vpop.f32.mrf.mxu1 }
0x1850   :  { %v2507_v4 = vadd.f32 %v3101_v52, %v2506_v50  ;;  %vm2528_vm1 = vcmp.eq.f32.partialorder %v2527_v42, 8.507059e+37 }
0x1852   :  { %v2511_v1 = vsel %vm2510_vm12, %v3101_v52, %v2507_v4 }
0x1853   :  { %v2516_v5 = vsel %vm2513_vm13, %v2515_v43, %v2511_v1 }
0x1854   :  { %v2535_v2 = vmul.f32 %v3103_v48, %v2516_v5  ;;  %v3107_v46 = vpop.eup %3106  ;;  %v2534_v60 = vmul.f32 %v2516_v5, %v4143_v59 }
0x1855   :  { %v2519_v45 = vmul.f32 %v3107_v46, %v2502_v37  ;;  %vm2524_vm14 = vweird.f32 %v3107_v46 }
0x1856   :  { %2537 = vrot.lane.b32.xlu2 %v2535_v2, %s3169_s2  ;;  %vm2525_vm0 = vmor %vm2523_vm15, %vm2524_vm14  ;;  %v2697_v4 = vpop.f32.mrf.mxu1 }
0x1857   :  { %v2520_v62 = vsub.f32 1.0, %v2519_v45 }
0x1859   :  { %v2521_v16 = vmul.f32 %v3107_v46, %v2520_v62 }
0x185b   :  { %v2522_v38 = vadd.f32 %v3107_v46, %v2521_v16 }
0x185e   :  { %2334 = vrot.lane.b32.xlu2 %v4114_v24, %s3167_s18  ;;  %v2529_v24 = vand.u32 2147483648, %v2502_v37  ;;  %v2700_v5 = vpop.f32.mrf.mxu1 }
0x1860   :  { %v2530_v13 = vor.u32 1.1754944e-38, %v2529_v24 }
0x1866   :  { %2013 = vrot.lane.b32.xlu2 %v4064_v57, %s3167_s18  ;;  %v2526_v57 = vsel %vm2525_vm0, %v3107_v46, %v2522_v38 }
0x1867   :  { %v2531_v34 = vsel %vm2528_vm1, %v2530_v13, %v2526_v57 }
0x18b0   :  { %v2538_v63 = vpop.permute.xlu2 %2537 }
0x18b1   :  { %v2540_v18 = vadd.f32 %v2538_v63, %v2534_v60 }
0x18b3   :  { %3108 = vtanh.f32 %v2540_v18 }
0x18b8   :  { %v2335_v49 = vpop.permute.xlu2 %2334 }
0x18b9   :  { %v3109_v9 = vpop.eup %3108  ;;  %2337 = vst.msk [vmem:[#allocation6 + $0x10] sm:$0xff] %vm428_vm9, %v2335_v49 }
0x18ba   :  { %v2542_v36 = vmul.f32 %v3109_v9, %v2531_v34 }
0x18bc   :  { %2544 = vrot.lane.b32.xlu2 %v2542_v36, %s3169_s2  ;;  %2548 = vrot.lane.b32.xlu0 %v2542_v36, %s3167_s18 }
0x18c0   :  { %v2014_v44 = vpop.permute.xlu2 %2013  ;;  %v2570_v59 = vld [vmem:[#allocation6 + $0x10] sm:$0xff] }
0x18c1   :  { %2016 = vst.msk [vmem:[#allocation6 + $0x28] sm:$0xff] %vm428_vm9, %v2014_v44 }
0x18c4   :  { %2227 = vrot.lane.b32.xlu0 %v4101_v7, %s3167_s18  ;;  %v2556_v7 = vld [vmem:[%s4241_s6 + $0x20] sm:$0xff] }
0x18c5   :  { %2615 = vmatpush.msrb.mxu0 %v2556_v7 }
0x18c8   :  { %v2573_v56 = vld [vmem:[#allocation6 + $0x28] sm:$0xff] }
0x18cc   :  { %1906 = vrot.lane.b32.xlu0 %v4034_v20, %s3167_s18 }
0x1916   :  { %v2545_v20 = vpop.permute.xlu2 %2544 }
0x1917   :  { %2547 = vst.msk [vmem:[#allocation5 + $0x38] sm:$0xff] %vm428_vm9, %v2545_v20 }
0x191e   :  { %v2567_v35 = vld [vmem:[#allocation5 + $0x38] sm:$0xff] }
0x191f   :  { %2904 = vmatmul.msk.f32.gmra.mxu1 %vm428_vm9, %v2567_v35 }
0x192e   :  { %v2549_v41 = vpop.permute.xlu0 %2548 }
0x192f   :  { %2551 = vst.msk [vmem:[#allocation6] sm:$0xff] %vm428_vm9, %v2549_v41 }
0x1936   :  { %v2228_v11 = vpop.permute.xlu0 %2227  ;;  %v2568_v31 = vld [vmem:[#allocation6] sm:$0xff] }
0x1937   :  { %2230 = vst.msk [vmem:[#allocation6 + $0x18] sm:$0xff] %vm428_vm9, %v2228_v11  ;;  %2889 = vmatmul.msk.f32.vlgmr.msrb.gmra.mxu0 %vm428_vm9, %v2568_v31 }
0x193e   :  { %v1907_v8 = vpop.permute.xlu0 %1906  ;;  %v2571_v47 = vld [vmem:[#allocation6 + $0x18] sm:$0xff] }
0x193f   :  { %1909 = vst.msk [vmem:[#allocation6 + $0x30] sm:$0xff] %vm428_vm9, %v1907_v8  ;;  %2890 = vmatmul.msk.f32.gmra.mxu0 %vm428_vm9, %v2569_v28 }
0x1946   :  { %v2574_v23 = vld [vmem:[#allocation6 + $0x30] sm:$0xff] }
0x1947   :  { %2891 = vmatmul.msk.f32.gmra.mxu0 %vm428_vm9, %v2570_v59 }
0x194f   :  { %2892 = vmatmul.msk.f32.gmra.mxu0 %vm428_vm9, %v2571_v47 }
0x1957   :  { %2893 = vmatmul.msk.f32.gmra.mxu0 %vm428_vm9, %v2572_v32 }
0x195f   :  { %2894 = vmatmul.msk.f32.gmra.mxu0 %vm428_vm9, %v2573_v56 }
0x1967   :  { %2895 = vmatmul.msk.f32.gmra.mxu0 %vm428_vm9, %v2574_v23 }
0x196f   :  { %2896 = vmatmul.msk.f32.gmra.mxu0 %vm428_vm9, %v2575_v54 }
0x199c   :  { %v2703_v37 = vpop.f32.mrf.mxu1 }
0x19b4   :  { %v2617_v0 = vpop.f32.mrf.mxu0 }
0x19b5   :  { %v2683_v19 = vadd.f32 %v2682_v61, %v2617_v0 }
0x19b7   :  { %v2710_v25 = vadd.f32 %v2917_v10, %v2683_v19 }
0x19b9   :  { %2719 = vst.msk [vmem:[%s4243_s8] sm:$0xff] %vm2718_vm2, %v2710_v25 }
0x19bc   :  { %v2620_v15 = vpop.f32.mrf.mxu0 }
0x19bd   :  { %v2686_v39 = vadd.f32 %v2685_v6, %v2620_v15 }
0x19bf   :  { %v2711_v12 = vadd.f32 %v2917_v10, %v2686_v39 }
0x19c1   :  { %2720 = vst.msk [vmem:[%s4243_s8 + $0x8] sm:$0xff] %vm2718_vm2, %v2711_v12 }
0x19c4   :  { %v2623_v22 = vpop.f32.mrf.mxu0 }
0x19c5   :  { %v2689_v21 = vadd.f32 %v2688_v14, %v2623_v22 }
0x19c7   :  { %v2712_v55 = vadd.f32 %v2917_v10, %v2689_v21 }
0x19c9   :  { %2721 = vst.msk [vmem:[%s4243_s8 + $0x10] sm:$0xff] %vm2718_vm2, %v2712_v55 }
0x19cc   :  { %v2626_v52 = vpop.f32.mrf.mxu0 }
0x19cd   :  { %v2692_v27 = vadd.f32 %v2691_v26, %v2626_v52 }
0x19cf   :  { %v2713_v29 = vadd.f32 %v2917_v10, %v2692_v27 }
0x19d1   :  { %2722 = vst.msk [vmem:[%s4243_s8 + $0x18] sm:$0xff] %vm2718_vm2, %v2713_v29 }
0x19d4   :  { %v2629_v58 = vpop.f32.mrf.mxu0 }
0x19d5   :  { %v2695_v50 = vadd.f32 %v2694_v51, %v2629_v58 }
0x19d7   :  { %v2714_v30 = vadd.f32 %v2917_v10, %v2695_v50 }
0x19d9   :  { %2723 = vst.msk [vmem:[%s4243_s8 + $0x20] sm:$0xff] %vm2718_vm2, %v2714_v30 }
0x19dc   :  { %v2632_v43 = vpop.f32.mrf.mxu0 }
0x19dd   :  { %v2698_v1 = vadd.f32 %v2697_v4, %v2632_v43 }
0x19df   :  { %v2715_v48 = vadd.f32 %v2917_v10, %v2698_v1 }
0x19e1   :  { %2724 = vst.msk [vmem:[%s4243_s8 + $0x28] sm:$0xff] %vm2718_vm2, %v2715_v48 }
0x19e4   :  { %v2635_v2 = vpop.f32.mrf.mxu0 }
0x19e5   :  { %v2701_v53 = vadd.f32 %v2700_v5, %v2635_v2 }
0x19e7   :  { %v2716_v17 = vadd.f32 %v2917_v10, %v2701_v53 }
0x19e9   :  { %2725 = vst.msk [vmem:[%s4243_s8 + $0x30] sm:$0xff] %vm2718_vm2, %v2716_v17 }
0x19ec   :  { %v2638_v46 = vpop.f32.mrf.mxu0 }
0x19ed   :  { %v2704_v45 = vadd.f32 %v2703_v37, %v2638_v46 }
0x19ef   :  { %v2717_v62 = vadd.f32 %v2917_v10, %v2704_v45 }
0x19f1   :  { %2726 = vst.msk [vmem:[%s4243_s8 + $0x38] sm:$0xff] %vm2718_vm2, %v2717_v62 }
0x19f2   :  { %2731 = vsyncpa [#allocation8], 1 }
0x19f3   :  { %2732 = vsyncpa [#allocation10], 1 }

</bundles_post_ra>
